<compile_context>
chip_gen: v5e
topology: v5e:2x2
jax: 0.10.0
libtpu: 0.0.40
codegen_flags: <defaults>
</compile_context>

<pallas_src>
import math
import functools

import jax
import jax.numpy as jnp
from jax.experimental import pallas as pl
from jax.experimental.pallas import tpu as pltpu

LN_EPS = 1e-5  # torch.nn.LayerNorm default


def _layer_norm(x, w, b):
    # Single pass (sum + sum of squares), f32 math, variance clamped >= 0.
    d = x.shape[-1]
    inv_d = 1.0 / d
    mean = jnp.sum(x, axis=-1, keepdims=True) * inv_d
    var = jnp.sum(x * x, axis=-1, keepdims=True) * inv_d - mean * mean
    var = jnp.maximum(var, 0.0)
    return (x - mean) * jax.lax.rsqrt(var + LN_EPS) * w + b


def vit_encoder_kernel(num_heads, depth,
                       x_ref,
                       ln1w_ref, ln1b_ref,
                       wqkv_ref,
                       wproj_ref, projb_ref,
                       ln2w_ref, ln2b_ref,
                       fc1w_ref, fc1b_ref,
                       fc2w_ref, fc2b_ref,
                       flnw_ref, flnb_ref,
                       feat_ref, final_ref,
                       x_vmem):
    """Grid = (batch, layer).  One ViTBlock per (b, l) step; x carried in VMEM.

      wqkv  : (1, D, 3D) bf16, columns ordered (qkv, h, hd); q cols pre-scaled
      wproj : (1, D, D)  bf16, rows ordered (h, hd)
      fc1/2 : (1, D, H) / (1, H, D) bf16
    """
    l = pl.program_id(1)

    @pl.when(l == 0)
    def _():
        x_vmem[...] = x_ref[0]

    x = x_vmem[...]                                   # (N, D) f32, layer input
    feat_ref[0, 0] = x                                # features[l] = x (pre-layer)

    n, d = x.shape
    hd = d // num_heads
    bf16 = jnp.bfloat16

    # ---------------- attention branch ----------------
    y = _layer_norm(x, ln1w_ref[0], ln1b_ref[0])

    # Single lane-dense QKV projection: (N, D) @ (D, 3D), full MXU width.
    qkv = jnp.dot(y.astype(bf16), wqkv_ref[0],
                  preferred_element_type=jnp.float32)            # (N, 3D) f32
    # Relayout once to per-head views: columns are (qkv, h, hd).
    qkv = jnp.swapaxes(qkv.reshape(n, 3 * num_heads, hd), 0, 1)  # (3h, N, hd)
    qkv = qkv.astype(bf16)
    q = qkv[:num_heads]                                          # (h, N, hd)
    k = qkv[num_heads:2 * num_heads]
    v = qkv[2 * num_heads:]

    # scores already carry head_dim**-0.5 (folded into the q weight columns)
    energy = jnp.einsum('hqd,hkd->hqk', q, k,
                        preferred_element_type=jnp.float32)      # (h, N, N) f32
    m = jnp.max(energy, axis=-1, keepdims=True)
    p = jnp.exp(energy - m)
    l_sum = jnp.sum(p, axis=-1, keepdims=True)                   # (h, N, 1)

    out = jnp.einsum('hqk,hkd->hqd', p.astype(bf16), v,
                     preferred_element_type=jnp.float32)         # (h, N, hd)
    # Normalize AFTER the AV matmul (N/hd fewer VPU multiplies).
    out = out * pl.reciprocal(l_sum, approx=True)

    # Head merge ('b h n d -> b n (h d)') + output projection in one matmul:
    # heads are part of the K = D contraction on the MXU.
    out_merged = jnp.swapaxes(out, 0, 1).reshape(n, d)           # (N, D) f32
    attn = jnp.dot(out_merged.astype(bf16), wproj_ref[0],
                   preferred_element_type=jnp.float32) + projb_ref[0]
    x1 = x + attn

    # ---------------- MLP branch ----------------
    y2 = _layer_norm(x1, ln2w_ref[0], ln2b_ref[0])
    h1 = jnp.dot(y2.astype(bf16), fc1w_ref[0],
                 preferred_element_type=jnp.float32) + fc1b_ref[0]
    # exact GELU (erf-based, torch.nn.GELU default)
    h1 = 0.5 * h1 * (1.0 + jax.lax.erf(h1 * (1.0 / math.sqrt(2.0))))
    h2 = jnp.dot(h1.astype(bf16), fc2w_ref[0],
                 preferred_element_type=jnp.float32) + fc2b_ref[0]
    x_out = x1 + h2

    x_vmem[...] = x_out

    @pl.when(l == depth - 1)
    def _():
        final_ref[0] = _layer_norm(x_out, flnw_ref[...], flnb_ref[...])


# ----------------------- wrapper-side weight layout -----------------------
def prepare_encoder_params(layer_params, num_heads):
    """One-time (load-time) prep: fold q scale, cast matmul weights to bf16,
    stack per-layer weights along a leading layer axis."""
    D = layer_params[0]["qkv_w"].shape[0]
    assert D % num_heads == 0, "embed_dim must be divisible by num_heads"
    hd = D // num_heads
    scale = hd ** -0.5
    bf16 = jnp.bfloat16

    def prep(p):
        wqkv = jnp.concatenate([p["qkv_w"][:, :D] * scale, p["qkv_w"][:, D:]],
                               axis=1).astype(bf16)              # (D, 3D)
        return {
            "ln1_w": p["ln1_w"], "ln1_b": p["ln1_b"],
            "wqkv": wqkv,
            "wproj": p["proj_w"].astype(bf16),                   # (D, D), rows (h, hd)
            "proj_b": p["proj_b"],
            "ln2_w": p["ln2_w"], "ln2_b": p["ln2_b"],
            "fc1_w": p["fc1_w"].astype(bf16), "fc1_b": p["fc1_b"],
            "fc2_w": p["fc2_w"].astype(bf16), "fc2_b": p["fc2_b"],
        }

    preps = [prep(p) for p in layer_params]
    return {key: jnp.stack([pp[key] for pp in preps], axis=0) for key in preps[0]}


def _vmem_limit_bytes():
    cap = 128 * 1024 * 1024
    try:
        info = pltpu.get_tpu_info()
        cap = int(getattr(info, "vmem_capacity_bytes", cap))
    except Exception:
        pass
    # 64 MiB on v5e/v6e (128 MiB physical); 3/4 of physical (48 MiB) on v7x
    # so the compiler keeps headroom for internal scratch.
    return min(64 * 1024 * 1024, (cap * 3) // 4)


def vit_encoder_forward(x, sp, final_ln_w, final_ln_b, num_heads):
    """Matches ViTEncoder.forward: returns [x0, ..., x_{depth-1}, norm(x_depth)]."""
    B, N, D = x.shape
    L = sp["wqkv"].shape[0]
    H = sp["fc1_w"].shape[-1]

    def lspec(*shape):          # per-layer weight block, selected by layer index
        zeros = (0,) * len(shape)
        return pl.BlockSpec((1,) + shape, lambda b, l, z=zeros: (l,) + z)

    def cspec(*shape):          # grid-invariant block
        zeros = (0,) * len(shape)
        return pl.BlockSpec(shape, lambda b, l, z=zeros: z)

    kernel = functools.partial(vit_encoder_kernel, num_heads, L)
    feats, final = pl.pallas_call(
        kernel,
        out_shape=(jax.ShapeDtypeStruct((L, B, N, D), x.dtype),
                   jax.ShapeDtypeStruct((B, N, D), x.dtype)),
        grid=(B, L),
        in_specs=[
            pl.BlockSpec((1, N, D), lambda b, l: (b, 0, 0)),   # x (read at l==0)
            lspec(1, D), lspec(1, D),                          # ln1 w, b
            lspec(D, 3 * D),                                   # wqkv (q pre-scaled)
            lspec(D, D), lspec(1, D),                          # wproj, proj bias
            lspec(1, D), lspec(1, D),                          # ln2 w, b
            lspec(D, H), lspec(1, H),                          # fc1 w, b
            lspec(H, D), lspec(1, D),                          # fc2 w, b
            cspec(1, D), cspec(1, D),                          # final LayerNorm w, b
        ],
        out_specs=(
            pl.BlockSpec((1, 1, N, D), lambda b, l: (l, b, 0, 0)),  # features[l]
            pl.BlockSpec((1, N, D), lambda b, l: (b, 0, 0)),        # final norm
        ),
        scratch_shapes=[pltpu.VMEM((N, D), jnp.float32)],           # resident x
        compiler_params=pltpu.CompilerParams(
            dimension_semantics=("parallel", "arbitrary"),
            vmem_limit_bytes=_vmem_limit_bytes(),
        ),
    )(x, sp["ln1_w"], sp["ln1_b"], sp["wqkv"], sp["wproj"], sp["proj_b"],
      sp["ln2_w"], sp["ln2_b"], sp["fc1_w"], sp["fc1_b"], sp["fc2_w"], sp["fc2_b"],
      final_ln_w, final_ln_b)

    return [feats[i] for i in range(L)] + [final]


# ----------------------- pure-JAX f32 reference (for checking) -----------------------
def _ref_block(x, p, num_heads):
    B, N, D = x.shape
    d = D // num_heads

    def ln(z, w, b):
        m = jnp.mean(z, -1, keepdims=True)
        v = jnp.mean((z - m) ** 2, -1, keepdims=True)
        return (z - m) / jnp.sqrt(v + LN_EPS) * w + b

    y = ln(x, p["ln1_w"], p["ln1_b"])
    qkv = y @ p["qkv_w"]                                   # (B, N, 3D)
    qkv = qkv.reshape(B, N, 3, num_heads, d)
    q, k, v = qkv[:, :, 0], qkv[:, :, 1], qkv[:, :, 2]
    q = q.transpose(0, 2, 1, 3); k = k.transpose(0, 2, 1, 3); v = v.transpose(0, 2, 1, 3)
    e = jnp.einsum("bhij,bhkj->bhik", q, k) * (d ** -0.5)
    a = jax.nn.softmax(e, axis=-1)
    o = jnp.einsum("bhij,bhjk->bhik", a, v)
    o = o.transpose(0, 2, 1, 3).reshape(B, N, D)
    o = o @ p["proj_w"] + p["proj_b"]
    x1 = x + o
    y2 = ln(x1, p["ln2_w"], p["ln2_b"])
    h1 = y2 @ p["fc1_w"] + p["fc1_b"]
    h1 = 0.5 * h1 * (1.0 + jax.lax.erf(h1 / math.sqrt(2.0)))
    h2 = h1 @ p["fc2_w"] + p["fc2_b"]
    return x1 + h2


def _ref_encoder(x, layer_params, w, b, num_heads):
    feats = []
    for p in layer_params:
        feats.append(x)
        x = _ref_block(x, p, num_heads)
    m = jnp.mean(x, -1, keepdims=True)
    v = jnp.mean((x - m) ** 2, -1, keepdims=True)
    feats.append((x - m) / jnp.sqrt(v + LN_EPS) * w + b)
    return feats


# ----------------------- parameter construction -----------------------
def make_block_params(key, D, H):
    ks = jax.random.split(key, 6)
    s = 0.02
    return {
        "ln1_w": jnp.ones((1, D), jnp.float32),
        "ln1_b": jnp.zeros((1, D), jnp.float32),
        "qkv_w": s * jax.random.normal(ks[0], (D, 3 * D), jnp.float32),
        "proj_w": s * jax.random.normal(ks[1], (D, D), jnp.float32),
        "proj_b": s * jax.random.normal(ks[2], (1, D), jnp.float32),
        "ln2_w": jnp.ones((1, D), jnp.float32),
        "ln2_b": jnp.zeros((1, D), jnp.float32),
        "fc1_w": s * jax.random.normal(ks[3], (D, H), jnp.float32),
        "fc1_b": s * jax.random.normal(ks[4], (1, H), jnp.float32),
        "fc2_w": s * jax.random.normal(ks[5], (H, D), jnp.float32),
        "fc2_b": jnp.zeros((1, D), jnp.float32),
    }


if __name__ == "__main__":
    # small, lane/sublane-aligned shapes:
    # batch=2, tokens=16, embed_dim=128, heads=4 (head_dim=32), depth=2, expansion=4
    B, N, D = 2, 16, 128
    NUM_HEADS = 4
    DEPTH = 2
    EXPANSION = 4
    H = EXPANSION * D

    key = jax.random.PRNGKey(0)
    kx, *kl = jax.random.split(key, DEPTH + 1)
    x = jax.random.normal(kx, (B, N, D), jnp.float32)

    layer_params = [make_block_params(kl[i], D, H) for i in range(DEPTH)]
    final_ln_w = jnp.ones((1, D), jnp.float32)
    final_ln_b = jnp.zeros((1, D), jnp.float32)

    # one-time (load-time) weight layout / bf16 cast / stacking
    stacked = prepare_encoder_params(layer_params, NUM_HEADS)

    feats = vit_encoder_forward(x, stacked, final_ln_w, final_ln_b, NUM_HEADS)
    feats = [jax.block_until_ready(f) for f in feats]

    # sanity-check against the pure-JAX f32 reference (kernel uses bf16 MXU
    # operands + approx softmax reciprocal, so tolerance is loosened).
    ref = _ref_encoder(x, layer_params, final_ln_w, final_ln_b, NUM_HEADS)
    for got, want in zip(feats, ref):
        assert got.shape == want.shape
        assert jnp.max(jnp.abs(got - want)) < 5e-2
    print("KERNEL_OK")
</pallas_src>

<mosaic_0001>
module attributes {stable_mosaic.version = 11 : i64} {
  func.func @vit_encoder_kernel(%arg0: i32, %arg1: i32, %arg2: memref<1x16x128xf32, #tpu.memory_space<vmem>>, %arg3: memref<1x1x128xf32, #tpu.memory_space<vmem>>, %arg4: memref<1x1x128xf32, #tpu.memory_space<vmem>>, %arg5: memref<1x128x384xbf16, #tpu.memory_space<vmem>>, %arg6: memref<1x128x128xbf16, #tpu.memory_space<vmem>>, %arg7: memref<1x1x128xf32, #tpu.memory_space<vmem>>, %arg8: memref<1x1x128xf32, #tpu.memory_space<vmem>>, %arg9: memref<1x1x128xf32, #tpu.memory_space<vmem>>, %arg10: memref<1x128x512xbf16, #tpu.memory_space<vmem>>, %arg11: memref<1x1x512xf32, #tpu.memory_space<vmem>>, %arg12: memref<1x512x128xbf16, #tpu.memory_space<vmem>>, %arg13: memref<1x1x128xf32, #tpu.memory_space<vmem>>, %arg14: memref<1x128xf32, #tpu.memory_space<vmem>>, %arg15: memref<1x128xf32, #tpu.memory_space<vmem>>, %arg16: memref<1x1x16x128xf32, #tpu.memory_space<vmem>>, %arg17: memref<1x16x128xf32, #tpu.memory_space<vmem>>, %arg18: memref<16x128xf32, #tpu.memory_space<vmem>>) attributes {dimension_semantics = [#tpu.dimension_semantics<parallel>, #tpu.dimension_semantics<arbitrary>], iteration_bounds = array<i64: 2, 2>, scalar_prefetch = 0 : i64, scratch_operands = 1 : i64, tpu.core_type = #tpu.core_type<tc>, window_params = [{transform_indices = @transform_0, window_bounds = array<i64: 1, 16, 128>}, {transform_indices = @transform_1, window_bounds = array<i64: 1, 1, 128>}, {transform_indices = @transform_2, window_bounds = array<i64: 1, 1, 128>}, {transform_indices = @transform_3, window_bounds = array<i64: 1, 128, 384>}, {transform_indices = @transform_4, window_bounds = array<i64: 1, 128, 128>}, {transform_indices = @transform_5, window_bounds = array<i64: 1, 1, 128>}, {transform_indices = @transform_6, window_bounds = array<i64: 1, 1, 128>}, {transform_indices = @transform_7, window_bounds = array<i64: 1, 1, 128>}, {transform_indices = @transform_8, window_bounds = array<i64: 1, 128, 512>}, {transform_indices = @transform_9, window_bounds = array<i64: 1, 1, 512>}, {transform_indices = @transform_10, window_bounds = array<i64: 1, 512, 128>}, {transform_indices = @transform_11, window_bounds = array<i64: 1, 1, 128>}, {pipeline_mode = #tpu.pipeline_mode<synchronous>, transform_indices = @transform_12, window_bounds = array<i64: 1, 128>}, {pipeline_mode = #tpu.pipeline_mode<synchronous>, transform_indices = @transform_13, window_bounds = array<i64: 1, 128>}, {transform_indices = @transform_14, window_bounds = array<i64: 1, 1, 16, 128>}, {transform_indices = @transform_15, window_bounds = array<i64: 1, 16, 128>}]} {
    %c0_i32 = arith.constant 0 : i32
    %0 = arith.cmpi eq, %arg1, %c0_i32 : i32
    %1 = arith.extui %0 : i1 to i32
    %c0_i32_0 = arith.constant 0 : i32
    %2 = arith.cmpi ne, %1, %c0_i32_0 : i32
    scf.if %2 {
      %c0_64 = arith.constant 0 : index
      %c0_65 = arith.constant 0 : index
      %c0_66 = arith.constant 0 : index
      %126 = vector.load %arg2[%c0_64, %c0_65, %c0_66] : memref<1x16x128xf32, #tpu.memory_space<vmem>>, vector<1x16x128xf32>
      %127 = vector.shape_cast %126 : vector<1x16x128xf32> to vector<16x128xf32>
      %c0_67 = arith.constant 0 : index
      %c0_68 = arith.constant 0 : index
      %128 = vector.load %arg18[%c0_67, %c0_68] : memref<16x128xf32, #tpu.memory_space<vmem>>, vector<16x128xf32>
      tpu.vector_store %arg18[%c0_67, %c0_68], %127 {strides = array<i32>} : memref<16x128xf32, #tpu.memory_space<vmem>>, vector<16x128xf32>,
    } else {
    }
    %c0 = arith.constant 0 : index
    %c0_1 = arith.constant 0 : index
    %3 = vector.load %arg18[%c0, %c0_1] : memref<16x128xf32, #tpu.memory_space<vmem>>, vector<16x128xf32>
    %c0_2 = arith.constant 0 : index
    %c0_3 = arith.constant 0 : index
    %c0_4 = arith.constant 0 : index
    %c0_5 = arith.constant 0 : index
    %4 = vector.load %arg16[%c0_2, %c0_3, %c0_4, %c0_5] : memref<1x1x16x128xf32, #tpu.memory_space<vmem>>, vector<1x1x16x128xf32>
    %5 = vector.shape_cast %4 : vector<1x1x16x128xf32> to vector<16x128xf32>
    %6 = vector.shape_cast %3 : vector<16x128xf32> to vector<1x1x16x128xf32>
    tpu.vector_store %arg16[%c0_2, %c0_3, %c0_4, %c0_5], %6 {strides = array<i32>} : memref<1x1x16x128xf32, #tpu.memory_space<vmem>>, vector<1x1x16x128xf32>,
    %c0_6 = arith.constant 0 : index
    %c0_7 = arith.constant 0 : index
    %c0_8 = arith.constant 0 : index
    %7 = vector.load %arg3[%c0_6, %c0_7, %c0_8] : memref<1x1x128xf32, #tpu.memory_space<vmem>>, vector<1x1x128xf32>
    %8 = vector.shape_cast %7 : vector<1x1x128xf32> to vector<1x128xf32>
    %c0_9 = arith.constant 0 : index
    %c0_10 = arith.constant 0 : index
    %c0_11 = arith.constant 0 : index
    %9 = vector.load %arg4[%c0_9, %c0_10, %c0_11] : memref<1x1x128xf32, #tpu.memory_space<vmem>>, vector<1x1x128xf32>
    %10 = vector.shape_cast %9 : vector<1x1x128xf32> to vector<1x128xf32>
    %cst = arith.constant dense<0.000000e+00> : vector<16xf32>
    %11 = vector.multi_reduction <add>, %3, %cst [1] : vector<16x128xf32> to vector<16xf32>
    %12 = vector.shape_cast %11 : vector<16xf32> to vector<16x1xf32>
    %cst_12 = arith.constant 7.812500e-03 : f32
    %13 = vector.broadcast %cst_12 : f32 to vector<16x1xf32>
    %14 = arith.mulf %12, %13 : vector<16x1xf32>
    %15 = arith.mulf %3, %3 : vector<16x128xf32>
    %cst_13 = arith.constant dense<0.000000e+00> : vector<16xf32>
    %16 = vector.multi_reduction <add>, %15, %cst_13 [1] : vector<16x128xf32> to vector<16xf32>
    %17 = vector.shape_cast %16 : vector<16xf32> to vector<16x1xf32>
    %cst_14 = arith.constant 7.812500e-03 : f32
    %18 = vector.broadcast %cst_14 : f32 to vector<16x1xf32>
    %19 = arith.mulf %17, %18 : vector<16x1xf32>
    %20 = arith.mulf %14, %14 : vector<16x1xf32>
    %21 = arith.subf %19, %20 : vector<16x1xf32>
    %cst_15 = arith.constant 0.000000e+00 : f32
    %22 = vector.broadcast %cst_15 : f32 to vector<16x1xf32>
    %23 = arith.maximumf %21, %22 : vector<16x1xf32>
    %24 = vector.broadcast %14 : vector<16x1xf32> to vector<16x128xf32>
    %25 = arith.subf %3, %24 : vector<16x128xf32>
    %cst_16 = arith.constant 9.99999974E-6 : f32
    %26 = vector.broadcast %cst_16 : f32 to vector<16x1xf32>
    %27 = arith.addf %23, %26 : vector<16x1xf32>
    %28 = math.rsqrt %27 : vector<16x1xf32>
    %29 = vector.broadcast %28 : vector<16x1xf32> to vector<16x128xf32>
    %30 = arith.mulf %25, %29 : vector<16x128xf32>
    %31 = vector.broadcast %8 : vector<1x128xf32> to vector<16x128xf32>
    %32 = arith.mulf %30, %31 : vector<16x128xf32>
    %33 = vector.broadcast %10 : vector<1x128xf32> to vector<16x128xf32>
    %34 = arith.addf %32, %33 : vector<16x128xf32>
    %35 = arith.truncf %34 : vector<16x128xf32> to vector<16x128xbf16>
    %c0_17 = arith.constant 0 : index
    %c0_18 = arith.constant 0 : index
    %c0_19 = arith.constant 0 : index
    %36 = vector.load %arg5[%c0_17, %c0_18, %c0_19] : memref<1x128x384xbf16, #tpu.memory_space<vmem>>, vector<1x128x384xbf16>
    %37 = vector.shape_cast %36 : vector<1x128x384xbf16> to vector<128x384xbf16>
    %cst_20 = arith.constant dense<0.000000e+00> : vector<16x384xf32>
    %38 = tpu.matmul %35, %37, %cst_20 {dimension_numbers = #tpu.dot_dimension_numbers<[1], [0], [0], [1], [0, 0, 1, 1], [], []>} : vector<16x128xbf16>, vector<128x384xbf16>, vector<16x384xf32> -> vector<16x384xf32>
    %39 = vector.shape_cast %38 : vector<16x384xf32> to vector<16x12x32xf32>
    %40 = tpu.transpose %39, [1, 0, 2] : vector<16x12x32xf32> -> vector<12x16x32xf32>
    %41 = arith.truncf %40 : vector<12x16x32xf32> to vector<12x16x32xbf16>
    %42 = vector.extract_strided_slice %41 {offsets = [0, 0, 0], sizes = [4, 16, 32], strides = [1, 1, 1]} : vector<12x16x32xbf16> to vector<4x16x32xbf16>
    %43 = vector.extract_strided_slice %41 {offsets = [4, 0, 0], sizes = [4, 16, 32], strides = [1, 1, 1]} : vector<12x16x32xbf16> to vector<4x16x32xbf16>
    %44 = vector.extract_strided_slice %41 {offsets = [8, 0, 0], sizes = [4, 16, 32], strides = [1, 1, 1]} : vector<12x16x32xbf16> to vector<4x16x32xbf16>
    "tpu.trace_start"() <{level = 10 : i32, message = "hqd,hkd->hqk"}> : () -> ()
    %cst_21 = arith.constant dense<0.000000e+00> : vector<4x16x16xf32>
    %45 = tpu.matmul %42, %43, %cst_21 {dimension_numbers = #tpu.dot_dimension_numbers<[2], [2], [1], [1], [0, 0, 0, 1, 1, 1], [0], [0]>} : vector<4x16x32xbf16>, vector<4x16x32xbf16>, vector<4x16x16xf32> -> vector<4x16x16xf32>
    "tpu.trace_stop"() : () -> ()
    %cst_22 = arith.constant dense<0xFF800000> : vector<4x16xf32>
    %46 = vector.multi_reduction <maximumf>, %45, %cst_22 [2] : vector<4x16x16xf32> to vector<4x16xf32>
    %47 = vector.shape_cast %46 : vector<4x16xf32> to vector<4x16x1xf32>
    %48 = vector.broadcast %47 : vector<4x16x1xf32> to vector<4x16x16xf32>
    %49 = arith.subf %45, %48 : vector<4x16x16xf32>
    %50 = math.exp %49 : vector<4x16x16xf32>
    %cst_23 = arith.constant dense<0.000000e+00> : vector<4x16xf32>
    %51 = vector.multi_reduction <add>, %50, %cst_23 [2] : vector<4x16x16xf32> to vector<4x16xf32>
    %52 = vector.shape_cast %51 : vector<4x16xf32> to vector<4x16x1xf32>
    %53 = arith.truncf %50 : vector<4x16x16xf32> to vector<4x16x16xbf16>
    "tpu.trace_start"() <{level = 10 : i32, message = "hqk,hkd->hqd"}> : () -> ()
    %cst_24 = arith.constant dense<0.000000e+00> : vector<4x16x32xf32>
    %54 = tpu.matmul %53, %44, %cst_24 {dimension_numbers = #tpu.dot_dimension_numbers<[2], [1], [1], [2], [0, 0, 0, 1, 1, 2], [0], [0]>} : vector<4x16x16xbf16>, vector<4x16x32xbf16>, vector<4x16x32xf32> -> vector<4x16x32xf32>
    "tpu.trace_stop"() : () -> ()
    %55 = tpu.reciprocal %52 {approx = true} : vector<4x16x1xf32> -> vector<4x16x1xf32>
    %56 = vector.broadcast %55 : vector<4x16x1xf32> to vector<4x16x32xf32>
    %57 = arith.mulf %54, %56 : vector<4x16x32xf32>
    %58 = tpu.transpose %57, [1, 0, 2] : vector<4x16x32xf32> -> vector<16x4x32xf32>
    %59 = vector.shape_cast %58 : vector<16x4x32xf32> to vector<16x128xf32>
    %60 = arith.truncf %59 : vector<16x128xf32> to vector<16x128xbf16>
    %c0_25 = arith.constant 0 : index
    %c0_26 = arith.constant 0 : index
    %c0_27 = arith.constant 0 : index
    %61 = vector.load %arg6[%c0_25, %c0_26, %c0_27] : memref<1x128x128xbf16, #tpu.memory_space<vmem>>, vector<1x128x128xbf16>
    %62 = vector.shape_cast %61 : vector<1x128x128xbf16> to vector<128x128xbf16>
    %cst_28 = arith.constant dense<0.000000e+00> : vector<16x128xf32>
    %63 = tpu.matmul %60, %62, %cst_28 {dimension_numbers = #tpu.dot_dimension_numbers<[1], [0], [0], [1], [0, 0, 1, 1], [], []>} : vector<16x128xbf16>, vector<128x128xbf16>, vector<16x128xf32> -> vector<16x128xf32>
    %c0_29 = arith.constant 0 : index
    %c0_30 = arith.constant 0 : index
    %c0_31 = arith.constant 0 : index
    %64 = vector.load %arg7[%c0_29, %c0_30, %c0_31] : memref<1x1x128xf32, #tpu.memory_space<vmem>>, vector<1x1x128xf32>
    %65 = vector.shape_cast %64 : vector<1x1x128xf32> to vector<1x128xf32>
    %66 = vector.broadcast %65 : vector<1x128xf32> to vector<16x128xf32>
    %67 = arith.addf %63, %66 : vector<16x128xf32>
    %68 = arith.addf %3, %67 : vector<16x128xf32>
    %c0_32 = arith.constant 0 : index
    %c0_33 = arith.constant 0 : index
    %c0_34 = arith.constant 0 : index
    %69 = vector.load %arg8[%c0_32, %c0_33, %c0_34] : memref<1x1x128xf32, #tpu.memory_space<vmem>>, vector<1x1x128xf32>
    %70 = vector.shape_cast %69 : vector<1x1x128xf32> to vector<1x128xf32>
    %c0_35 = arith.constant 0 : index
    %c0_36 = arith.constant 0 : index
    %c0_37 = arith.constant 0 : index
    %71 = vector.load %arg9[%c0_35, %c0_36, %c0_37] : memref<1x1x128xf32, #tpu.memory_space<vmem>>, vector<1x1x128xf32>
    %72 = vector.shape_cast %71 : vector<1x1x128xf32> to vector<1x128xf32>
    %cst_38 = arith.constant dense<0.000000e+00> : vector<16xf32>
    %73 = vector.multi_reduction <add>, %68, %cst_38 [1] : vector<16x128xf32> to vector<16xf32>
    %74 = vector.shape_cast %73 : vector<16xf32> to vector<16x1xf32>
    %cst_39 = arith.constant 7.812500e-03 : f32
    %75 = vector.broadcast %cst_39 : f32 to vector<16x1xf32>
    %76 = arith.mulf %74, %75 : vector<16x1xf32>
    %77 = arith.mulf %68, %68 : vector<16x128xf32>
    %cst_40 = arith.constant dense<0.000000e+00> : vector<16xf32>
    %78 = vector.multi_reduction <add>, %77, %cst_40 [1] : vector<16x128xf32> to vector<16xf32>
    %79 = vector.shape_cast %78 : vector<16xf32> to vector<16x1xf32>
    %cst_41 = arith.constant 7.812500e-03 : f32
    %80 = vector.broadcast %cst_41 : f32 to vector<16x1xf32>
    %81 = arith.mulf %79, %80 : vector<16x1xf32>
    %82 = arith.mulf %76, %76 : vector<16x1xf32>
    %83 = arith.subf %81, %82 : vector<16x1xf32>
    %cst_42 = arith.constant 0.000000e+00 : f32
    %84 = vector.broadcast %cst_42 : f32 to vector<16x1xf32>
    %85 = arith.maximumf %83, %84 : vector<16x1xf32>
    %86 = vector.broadcast %76 : vector<16x1xf32> to vector<16x128xf32>
    %87 = arith.subf %68, %86 : vector<16x128xf32>
    %cst_43 = arith.constant 9.99999974E-6 : f32
    %88 = vector.broadcast %cst_43 : f32 to vector<16x1xf32>
    %89 = arith.addf %85, %88 : vector<16x1xf32>
    %90 = math.rsqrt %89 : vector<16x1xf32>
    %91 = vector.broadcast %90 : vector<16x1xf32> to vector<16x128xf32>
    %92 = arith.mulf %87, %91 : vector<16x128xf32>
    %93 = vector.broadcast %70 : vector<1x128xf32> to vector<16x128xf32>
    %94 = arith.mulf %92, %93 : vector<16x128xf32>
    %95 = vector.broadcast %72 : vector<1x128xf32> to vector<16x128xf32>
    %96 = arith.addf %94, %95 : vector<16x128xf32>
    %97 = arith.truncf %96 : vector<16x128xf32> to vector<16x128xbf16>
    %c0_44 = arith.constant 0 : index
    %c0_45 = arith.constant 0 : index
    %c0_46 = arith.constant 0 : index
    %98 = vector.load %arg10[%c0_44, %c0_45, %c0_46] : memref<1x128x512xbf16, #tpu.memory_space<vmem>>, vector<1x128x512xbf16>
    %99 = vector.shape_cast %98 : vector<1x128x512xbf16> to vector<128x512xbf16>
    %cst_47 = arith.constant dense<0.000000e+00> : vector<16x512xf32>
    %100 = tpu.matmul %97, %99, %cst_47 {dimension_numbers = #tpu.dot_dimension_numbers<[1], [0], [0], [1], [0, 0, 1, 1], [], []>} : vector<16x128xbf16>, vector<128x512xbf16>, vector<16x512xf32> -> vector<16x512xf32>
    %c0_48 = arith.constant 0 : index
    %c0_49 = arith.constant 0 : index
    %c0_50 = arith.constant 0 : index
    %101 = vector.load %arg11[%c0_48, %c0_49, %c0_50] : memref<1x1x512xf32, #tpu.memory_space<vmem>>, vector<1x1x512xf32>
    %102 = vector.shape_cast %101 : vector<1x1x512xf32> to vector<1x512xf32>
    %103 = vector.broadcast %102 : vector<1x512xf32> to vector<16x512xf32>
    %104 = arith.addf %100, %103 : vector<16x512xf32>
    %cst_51 = arith.constant 5.000000e-01 : f32
    %105 = vector.broadcast %cst_51 : f32 to vector<16x512xf32>
    %106 = arith.mulf %105, %104 : vector<16x512xf32>
    %cst_52 = arith.constant 0.707106769 : f32
    %107 = vector.broadcast %cst_52 : f32 to vector<16x512xf32>
    %108 = arith.mulf %104, %107 : vector<16x512xf32>
    %109 = math.erf %108 : vector<16x512xf32>
    %cst_53 = arith.constant 1.000000e+00 : f32
    %110 = vector.broadcast %cst_53 : f32 to vector<16x512xf32>
    %111 = arith.addf %110, %109 : vector<16x512xf32>
    %112 = arith.mulf %106, %111 : vector<16x512xf32>
    %113 = arith.truncf %112 : vector<16x512xf32> to vector<16x512xbf16>
    %c0_54 = arith.constant 0 : index
    %c0_55 = arith.constant 0 : index
    %c0_56 = arith.constant 0 : index
    %114 = vector.load %arg12[%c0_54, %c0_55, %c0_56] : memref<1x512x128xbf16, #tpu.memory_space<vmem>>, vector<1x512x128xbf16>
    %115 = vector.shape_cast %114 : vector<1x512x128xbf16> to vector<512x128xbf16>
    %cst_57 = arith.constant dense<0.000000e+00> : vector<16x128xf32>
    %116 = tpu.matmul %113, %115, %cst_57 {dimension_numbers = #tpu.dot_dimension_numbers<[1], [0], [0], [1], [0, 0, 1, 1], [], []>} : vector<16x512xbf16>, vector<512x128xbf16>, vector<16x128xf32> -> vector<16x128xf32>
    %c0_58 = arith.constant 0 : index
    %c0_59 = arith.constant 0 : index
    %c0_60 = arith.constant 0 : index
    %117 = vector.load %arg13[%c0_58, %c0_59, %c0_60] : memref<1x1x128xf32, #tpu.memory_space<vmem>>, vector<1x1x128xf32>
    %118 = vector.shape_cast %117 : vector<1x1x128xf32> to vector<1x128xf32>
    %119 = vector.broadcast %118 : vector<1x128xf32> to vector<16x128xf32>
    %120 = arith.addf %116, %119 : vector<16x128xf32>
    %121 = arith.addf %68, %120 : vector<16x128xf32>
    %c0_61 = arith.constant 0 : index
    %c0_62 = arith.constant 0 : index
    %122 = vector.load %arg18[%c0_61, %c0_62] : memref<16x128xf32, #tpu.memory_space<vmem>>, vector<16x128xf32>
    tpu.vector_store %arg18[%c0_61, %c0_62], %121 {strides = array<i32>} : memref<16x128xf32, #tpu.memory_space<vmem>>, vector<16x128xf32>,
    %c1_i32 = arith.constant 1 : i32
    %123 = arith.cmpi eq, %arg1, %c1_i32 : i32
    %124 = arith.extui %123 : i1 to i32
    %c0_i32_63 = arith.constant 0 : i32
    %125 = arith.cmpi ne, %124, %c0_i32_63 : i32
    scf.if %125 {
      %c0_64 = arith.constant 0 : index
      %c0_65 = arith.constant 0 : index
      %126 = vector.load %arg14[%c0_64, %c0_65] : memref<1x128xf32, #tpu.memory_space<vmem>>, vector<1x128xf32>
      %c0_66 = arith.constant 0 : index
      %c0_67 = arith.constant 0 : index
      %127 = vector.load %arg15[%c0_66, %c0_67] : memref<1x128xf32, #tpu.memory_space<vmem>>, vector<1x128xf32>
      %cst_68 = arith.constant dense<0.000000e+00> : vector<16xf32>
      %128 = vector.multi_reduction <add>, %121, %cst_68 [1] : vector<16x128xf32> to vector<16xf32>
      %129 = vector.shape_cast %128 : vector<16xf32> to vector<16x1xf32>
      %cst_69 = arith.constant 7.812500e-03 : f32
      %130 = vector.broadcast %cst_69 : f32 to vector<16x1xf32>
      %131 = arith.mulf %129, %130 : vector<16x1xf32>
      %132 = arith.mulf %121, %121 : vector<16x128xf32>
      %cst_70 = arith.constant dense<0.000000e+00> : vector<16xf32>
      %133 = vector.multi_reduction <add>, %132, %cst_70 [1] : vector<16x128xf32> to vector<16xf32>
      %134 = vector.shape_cast %133 : vector<16xf32> to vector<16x1xf32>
      %cst_71 = arith.constant 7.812500e-03 : f32
      %135 = vector.broadcast %cst_71 : f32 to vector<16x1xf32>
      %136 = arith.mulf %134, %135 : vector<16x1xf32>
      %137 = arith.mulf %131, %131 : vector<16x1xf32>
      %138 = arith.subf %136, %137 : vector<16x1xf32>
      %cst_72 = arith.constant 0.000000e+00 : f32
      %139 = vector.broadcast %cst_72 : f32 to vector<16x1xf32>
      %140 = arith.maximumf %138, %139 : vector<16x1xf32>
      %141 = vector.broadcast %131 : vector<16x1xf32> to vector<16x128xf32>
      %142 = arith.subf %121, %141 : vector<16x128xf32>
      %cst_73 = arith.constant 9.99999974E-6 : f32
      %143 = vector.broadcast %cst_73 : f32 to vector<16x1xf32>
      %144 = arith.addf %140, %143 : vector<16x1xf32>
      %145 = math.rsqrt %144 : vector<16x1xf32>
      %146 = vector.broadcast %145 : vector<16x1xf32> to vector<16x128xf32>
      %147 = arith.mulf %142, %146 : vector<16x128xf32>
      %148 = vector.broadcast %126 : vector<1x128xf32> to vector<16x128xf32>
      %149 = arith.mulf %147, %148 : vector<16x128xf32>
      %150 = vector.broadcast %127 : vector<1x128xf32> to vector<16x128xf32>
      %151 = arith.addf %149, %150 : vector<16x128xf32>
      %c0_74 = arith.constant 0 : index
      %c0_75 = arith.constant 0 : index
      %c0_76 = arith.constant 0 : index
      %152 = vector.load %arg17[%c0_74, %c0_75, %c0_76] : memref<1x16x128xf32, #tpu.memory_space<vmem>>, vector<1x16x128xf32>
      %153 = vector.shape_cast %152 : vector<1x16x128xf32> to vector<16x128xf32>
      %154 = vector.shape_cast %151 : vector<16x128xf32> to vector<1x16x128xf32>
      tpu.vector_store %arg17[%c0_74, %c0_75, %c0_76], %154 {strides = array<i32>} : memref<1x16x128xf32, #tpu.memory_space<vmem>>, vector<1x16x128xf32>,
    } else {
    }
    return
  }
  func.func @transform_0(%arg0: i32, %arg1: i32) -> (i32, i32, i32) {
    %c0_i32 = arith.constant 0 : i32
    %c0_i32_0 = arith.constant 0 : i32
    %c0_i32_1 = arith.constant 0 : i32
    return %arg0, %c0_i32, %c0_i32_0 : i32, i32, i32
  }
  func.func @transform_1(%arg0: i32, %arg1: i32) -> (i32, i32, i32) {
    %c0_i32 = arith.constant 0 : i32
    %c0_i32_0 = arith.constant 0 : i32
    %c0_i32_1 = arith.constant 0 : i32
    return %arg1, %c0_i32, %c0_i32_0 : i32, i32, i32
  }
  func.func @transform_2(%arg0: i32, %arg1: i32) -> (i32, i32, i32) {
    %c0_i32 = arith.constant 0 : i32
    %c0_i32_0 = arith.constant 0 : i32
    %c0_i32_1 = arith.constant 0 : i32
    return %arg1, %c0_i32, %c0_i32_0 : i32, i32, i32
  }
  func.func @transform_3(%arg0: i32, %arg1: i32) -> (i32, i32, i32) {
    %c0_i32 = arith.constant 0 : i32
    %c0_i32_0 = arith.constant 0 : i32
    %c0_i32_1 = arith.constant 0 : i32
    return %arg1, %c0_i32, %c0_i32_0 : i32, i32, i32
  }
  func.func @transform_4(%arg0: i32, %arg1: i32) -> (i32, i32, i32) {
    %c0_i32 = arith.constant 0 : i32
    %c0_i32_0 = arith.constant 0 : i32
    %c0_i32_1 = arith.constant 0 : i32
    return %arg1, %c0_i32, %c0_i32_0 : i32, i32, i32
  }
  func.func @transform_5(%arg0: i32, %arg1: i32) -> (i32, i32, i32) {
    %c0_i32 = arith.constant 0 : i32
    %c0_i32_0 = arith.constant 0 : i32
    %c0_i32_1 = arith.constant 0 : i32
    return %arg1, %c0_i32, %c0_i32_0 : i32, i32, i32
  }
  func.func @transform_6(%arg0: i32, %arg1: i32) -> (i32, i32, i32) {
    %c0_i32 = arith.constant 0 : i32
    %c0_i32_0 = arith.constant 0 : i32
    %c0_i32_1 = arith.constant 0 : i32
    return %arg1, %c0_i32, %c0_i32_0 : i32, i32, i32
  }
  func.func @transform_7(%arg0: i32, %arg1: i32) -> (i32, i32, i32) {
    %c0_i32 = arith.constant 0 : i32
    %c0_i32_0 = arith.constant 0 : i32
    %c0_i32_1 = arith.constant 0 : i32
    return %arg1, %c0_i32, %c0_i32_0 : i32, i32, i32
  }
  func.func @transform_8(%arg0: i32, %arg1: i32) -> (i32, i32, i32) {
    %c0_i32 = arith.constant 0 : i32
    %c0_i32_0 = arith.constant 0 : i32
    %c0_i32_1 = arith.constant 0 : i32
    return %arg1, %c0_i32, %c0_i32_0 : i32, i32, i32
  }
  func.func @transform_9(%arg0: i32, %arg1: i32) -> (i32, i32, i32) {
    %c0_i32 = arith.constant 0 : i32
    %c0_i32_0 = arith.constant 0 : i32
    %c0_i32_1 = arith.constant 0 : i32
    return %arg1, %c0_i32, %c0_i32_0 : i32, i32, i32
  }
  func.func @transform_10(%arg0: i32, %arg1: i32) -> (i32, i32, i32) {
    %c0_i32 = arith.constant 0 : i32
    %c0_i32_0 = arith.constant 0 : i32
    %c0_i32_1 = arith.constant 0 : i32
    return %arg1, %c0_i32, %c0_i32_0 : i32, i32, i32
  }
  func.func @transform_11(%arg0: i32, %arg1: i32) -> (i32, i32, i32) {
    %c0_i32 = arith.constant 0 : i32
    %c0_i32_0 = arith.constant 0 : i32
    %c0_i32_1 = arith.constant 0 : i32
    return %arg1, %c0_i32, %c0_i32_0 : i32, i32, i32
  }
  func.func @transform_12(%arg0: i32, %arg1: i32) -> (i32, i32) {
    %c0_i32 = arith.constant 0 : i32
    %c0_i32_0 = arith.constant 0 : i32
    %c0_i32_1 = arith.constant 0 : i32
    return %c0_i32, %c0_i32_0 : i32, i32
  }
  func.func @transform_13(%arg0: i32, %arg1: i32) -> (i32, i32) {
    %c0_i32 = arith.constant 0 : i32
    %c0_i32_0 = arith.constant 0 : i32
    %c0_i32_1 = arith.constant 0 : i32
    return %c0_i32, %c0_i32_0 : i32, i32
  }
  func.func @transform_14(%arg0: i32, %arg1: i32) -> (i32, i32, i32, i32) {
    %c0_i32 = arith.constant 0 : i32
    %c0_i32_0 = arith.constant 0 : i32
    %c0_i32_1 = arith.constant 0 : i32
    return %arg1, %arg0, %c0_i32, %c0_i32_0 : i32, i32, i32, i32
  }
  func.func @transform_15(%arg0: i32, %arg1: i32) -> (i32, i32, i32) {
    %c0_i32 = arith.constant 0 : i32
    %c0_i32_0 = arith.constant 0 : i32
    %c0_i32_1 = arith.constant 0 : i32
    return %arg0, %c0_i32, %c0_i32_0 : i32, i32, i32
  }
}

</mosaic_0001>

<bundles_post_ra>
// kernel: tpu_custom_call.1
= control target key start
LH: loop header
LB: loop body
LE: loop exit
PB: predicated region body
PF: predicated region fallthrough
CT: control target
= control target key end

     0   :  { %s7208_s0 = inlined_call_operand.hbm [shape: f32[2,16,128], index: 0, kind: input, shape index: {}]   ;;  %s7209_s1 = inlined_call_operand.hbm [shape: f32[2,1,128], index: 1, kind: input, shape index: {}]   ;;  %s7210_s2 = inlined_call_operand.hbm [shape: f32[2,1,128], index: 2, kind: input, shape index: {}]   ;;  %s7211_s3 = inlined_call_operand.hbm [shape: bf16[2,128,384], index: 3, kind: input, shape index: {}]   ;;  %s7212_s4 = inlined_call_operand.hbm [shape: bf16[2,128,128], index: 4, kind: input, shape index: {}]   ;;  %s7213_s5 = inlined_call_operand.hbm [shape: f32[2,1,128], index: 5, kind: input, shape index: {}]   ;;  %s7214_s6 = inlined_call_operand.hbm [shape: f32[2,1,128], index: 6, kind: input, shape index: {}]   ;;  %s7215_s7 = inlined_call_operand.hbm [shape: f32[2,1,128], index: 7, kind: input, shape index: {}]   ;;  %s7216_s8 = inlined_call_operand.hbm [shape: bf16[2,128,512], index: 8, kind: input, shape index: {}]   ;;  %s7217_s9 = inlined_call_operand.vmem [shape: f32[2,1,512], index: 9, kind: input, shape index: {}]   ;;  %s7218_s10 = inlined_call_operand.hbm [shape: bf16[2,512,128], index: 10, kind: input, shape index: {}]   ;;  %s7219_s11 = inlined_call_operand.vmem [shape: f32[2,1,128], index: 11, kind: input, shape index: {}]   ;;  %s7220_s12 = inlined_call_operand.vmem [shape: f32[1,128], index: 12, kind: input, shape index: {}]   ;;  %s7221_s13 = inlined_call_operand.vmem [shape: f32[1,128], index: 13, kind: input, shape index: {}]   ;;  %s7222_s14 = inlined_call_operand.hbm [shape: f32[2,2,16,128], index: 14, kind: output, shape index: {0}]   ;;  %s7223_s15 = inlined_call_operand.hbm [shape: f32[2,16,128], index: 15, kind: output, shape index: {1}]  }
   0x1   :  { %7250 = sst [smem:[#allocation47_spill]] %s7208_s0 }
   0x2   :  { %7251 = sst [smem:[#allocation48_spill]] %s7209_s1 }
   0x3   :  { %7252 = sst [smem:[#allocation49_spill]] %s7210_s2 }
   0x4   :  { %7253 = sst [smem:[#allocation50_spill]] %s7211_s3 }
   0x5   :  { %7254 = sst [smem:[#allocation51_spill]] %s7212_s4 }
   0x6   :  { %7255 = sst [smem:[#allocation52_spill]] %s7213_s5 }
   0x7   :  { %7256 = sst [smem:[#allocation53_spill]] %s7214_s6 }
   0x8   :  { %7257 = sst [smem:[#allocation54_spill]] %s7215_s7 }
   0x9   :  { %7258 = sst [smem:[#allocation55_spill]] %s7216_s8 }
   0xa   :  { %7259 = sst [smem:[#allocation56_spill]] %s7217_s9 }
   0xb   :  { %7260 = sst [smem:[#allocation57_spill]] %s7218_s10 }
   0xc   :  { %7261 = sst [smem:[#allocation58_spill]] %s7219_s11 }
   0xd   :  { %7262 = sst [smem:[#allocation59_spill]] %s7220_s12 }
   0xe   :  { %7263 = sst [smem:[#allocation60_spill]] %s7221_s13 }
   0xf   :  { %7264 = sst [smem:[#allocation61_spill]] %s7222_s14 }
  0x10   :  { %7265 = sst [smem:[#allocation62_spill]] %s7223_s15 }
  0x11   :  { %21 = vsyncpa [#allocation4], 0 }
  0x12   :  { %23 = vsyncpa [#allocation4 + $0x1], 0 }
  0x13   :  { %24 = vsyncpa [#allocation7], 0 }
  0x14   :  { %26 = vsyncpa [#allocation7 + $0x1], 0 }
  0x15   :  { %27 = vsyncpa [#allocation10], 0 }
  0x16   :  { %29 = vsyncpa [#allocation10 + $0x1], 0 }
  0x17   :  { %30 = vsyncpa [#allocation13], 0 }
  0x18   :  { %32 = vsyncpa [#allocation13 + $0x1], 0 }
  0x19   :  { %33 = vsyncpa [#allocation16], 0 }
  0x1a   :  { %35 = vsyncpa [#allocation16 + $0x1], 0 }
  0x1b   :  { %36 = vsyncpa [#allocation19], 0 }
  0x1c   :  { %38 = vsyncpa [#allocation19 + $0x1], 0 }
  0x1d   :  { %39 = vsyncpa [#allocation5], 0 }
  0x1e   :  { %41 = vsyncpa [#allocation5 + $0x1], 0 }
  0x1f   :  { %42 = vsyncpa [#allocation22], 0 }
  0x20   :  { %44 = vsyncpa [#allocation22 + $0x1], 0  ;;  %s5465_s18 = smov 0   ;;  %s5467_s19 = smov 0  }
  0x21   :  { %s5469_s20 = smov 0   ;;  %s5471_s21 = smov 0  }
  0x22   :  { %s5473_s22 = smov 0   ;;  %s5475_s23 = smov 0  }
  0x23   :  { %s5477_s24 = smov 0   ;;  %s5479_s25 = smov 0  }
  0x24   :  { %s5481_s26 = smov 0   ;;  %s5483_s27 = smov 0  }
  0x25   :  { %s5485_s28 = smov 0   ;;  %s5487_s29 = smov 0  }
  0x26   :  { %s5489_s30 = smov 0   ;;  %s5491_s16 = smov 0  }
  0x27 LB: > { %7266 = sst [smem:[#allocation31_spill]] %s5316_s18  ;;  %p77_p0 = scmp.eq.s32.totalorder %s5368_s16, 0  ;;  %s5368_s16 = sphi %s5491_s16, %s50_s16   ;;  %s5364_s30 = sphi %s5489_s30, %s7357_s30   ;;  %s5360_s29 = sphi %s5487_s29, %s7368_s29   ;;  %s5356_s28 = sphi %s5485_s28, %s7367_s28   ;;  %s5352_s27 = sphi %s5483_s27, %s7366_s27   ;;  %s5348_s26 = sphi %s5481_s26, %s7365_s26   ;;  %s5344_s25 = sphi %s5479_s25, %s7364_s25   ;;  %s5340_s24 = sphi %s5477_s24, %s7363_s24   ;;  %s5336_s23 = sphi %s5475_s23, %s7352_s23   ;;  %s5332_s22 = sphi %s5473_s22, %s7362_s22   ;;  %s5328_s21 = sphi %s5471_s21, %s7361_s21   ;;  %s5324_s20 = sphi %s5469_s20, %s7350_s20   ;;  %s5320_s19 = sphi %s5467_s19, %s7360_s19   ;;  %s5316_s18 = sphi %s5465_s18, %s7359_s18  }
  0x28   : > { %7267 = sst [smem:[#allocation32_spill]] %s5324_s20  ;;  %p102_p1 = scmp.ne.s32.totalorder %s5336_s23, %s5332_s22 }
  0x29   : > { %7268 = sst [smem:[#allocation33_spill]] %s5336_s23  ;;  %p7233_p2 = scmp.lt.s32.totalorder %s5368_s16, 4 }
  0x2a   : > { %7269 = sst [smem:[#allocation34_spill]] %s5340_s24  ;;  %p104_p3 = por %p102_p1, %p77_p0 }
  0x2b   : > { %7270 = sst [smem:[#allocation35_spill]] %s5348_s26  ;;  %s5542_s17 = sand.u32 1, %s5368_s16  }
  0x2c   : > { %7271 = sst [smem:[#allocation36_spill]] %s5352_s27  ;;  %s5545_s15 = sand.u32 1, %s5336_s23  }
  0x2d   : > { %7272 = sst [smem:[#allocation37_spill]] %s5356_s28  ;;  %s519_s9 = scalar_lea.vmem [#allocation6], %s5545_s15 }
  0x2e   : > { %7273 = sst [smem:[#allocation38_spill]] %s5364_s30  ;;  %s526_s11 = sshll.u32 %s519_s9, 4  ;;  %s527_s11 = int_to_ptr.vmem [resolvable:$true] %s526_s11 }
  0x2f   : > { %s7274_s1 = sld [smem:[#allocation48_spill]]  ;;  %p5554_p4 = pnand %p7233_p2, %p104_p3 }
  0x30   : > { %p4026_p5 = scmp.ge.s32.totalorder %s5368_s16, 1  ;;  %p700_p6 = scmp.lt.s32.totalorder %s5368_s16, 5 }
  0x31   : > { %s4546_s14 = smul.u32 192, %s5545_s15  ;;  %s7228_s28 = scalar_lea.sflag [#allocation7], %s5542_s17 }
  0x32   : > { %p5566_p7 = pnand %p4026_p5, %p700_p6  ;;  %s7278_s3 = sld [smem:[#allocation50_spill]] }
  0x33   : > { %s7279_s5 = sld [smem:[#allocation52_spill]]  ;;  %s597_s6 = scalar_lea.vmem [#allocation12], %s5545_s15 }
  0x34   : > { %s7276_s9 = scalar_select %p5566_p7, 1, 0 }
  0x35   : > { %s522_s13 = scalar_lea.hbm %s7274_s1, %s5360_s29  ;;  %s554_s1 = scalar_lea.vmem [#allocation9], %s4546_s14 }
  0x36   : > { %s524_s12 = sshll.u32 %s522_s13, 4  ;;  %7277 = sst [smem:[#allocation39_spill]] %s7276_s9  ;;  %s525_s12 = int_to_ptr.hbm [resolvable:$true] %s524_s12 }
  0x37   : > { %4579 = dma.hbm_to_vmem [thread:$0]  (!%p5554_p4), %s525_s12, 16, %s527_s11, %s7228_s28  }
  0x38   : > { %s4547_s13 = smul.u32 192, %s5360_s29  ;;  %s562_s10 = sshll.u32 %s554_s1, 4  ;;  %s563_s10 = int_to_ptr.vmem [resolvable:$true] %s562_s10 }
  0x39   : > { %s7232_s11 = scalar_lea.sflag [#allocation10], %s5542_s17  ;;  %s5370_s12 = smov 192  }
  0x3a   : > { %s559_s4 = scalar_lea.hbm %s7278_s3, %s4547_s13  ;;  %s5371_s28 = smov 12  }
  0x3b   : > { %s560_s2 = sshll.u32 %s559_s4, 4  ;;  %s600_s9 = scalar_lea.hbm %s7279_s5, %s5360_s29  ;;  %s561_s2 = int_to_ptr.hbm [resolvable:$true] %s560_s2 }
  0x3c   : > { %4585 = dma.hbm_to_vmem [thread:$0]  (!%p5554_p4), %s561_s2, 3072, %s563_s10, %s7232_s11, %s5370_s12, %s5370_s12, %s5371_s28  }
  0x3d   : > { %s604_s8 = sshll.u32 %s597_s6, 4  ;;  %s602_s4 = sshll.u32 %s600_s9, 4  ;;  %s605_s8 = int_to_ptr.vmem [resolvable:$true] %s604_s8  ;;  %s603_s4 = int_to_ptr.hbm [resolvable:$true] %s602_s4 }
  0x3e   : > { %s7231_s13 = scalar_lea.sflag [#allocation13], %s5542_s17  ;;  %s7280_s7 = sld [smem:[#allocation54_spill]] }
  0x3f   : > { %4591 = dma.hbm_to_vmem [thread:$0]  (!%p5554_p4), %s603_s4, 16, %s605_s8, %s7231_s13  }
  0x40   : > { %s631_s14 = scalar_lea.vmem [#allocation15], %s5545_s15  ;;  %s7230_s1 = scalar_lea.sflag [#allocation16], %s5542_s17 }
  0x41   : > { %s638_s9 = sshll.u32 %s631_s14, 4  ;;  %s5600_s6 = sadd.s32 4294967295, %s5368_s16   ;;  %s639_s9 = int_to_ptr.vmem [resolvable:$true] %s638_s9 }
  0x42   : > { %s59_s4 = sadd.s32 1, %s5360_s29  ;;  %s62_s2 = sadd.s32 1, %s5364_s30 }
  0x43   : > { %p60_p8 = scmp.ge.s32.totalorder %s59_s4, 2  ;;  %s69_s10 = sadd.s32 1, %s5348_s26 }
  0x44   : > { %s634_s28 = scalar_lea.hbm %s7280_s7, %s5360_s29  ;;  %p7235_p9 = scmp.ne.s32.totalorder %s5348_s26, %s5344_s25 }
  0x45   : > { %s636_s12 = sshll.u32 %s634_s28, 4  ;;  %p7234_p10 = scmp.ne.s32.totalorder %s5344_s25, %s5340_s24  ;;  %s637_s12 = int_to_ptr.hbm [resolvable:$true] %s636_s12 }
  0x46   : > { %4597 = dma.hbm_to_vmem [thread:$0]  (!%p5554_p4), %s637_s12, 16, %s639_s9, %s7230_s1  }
  0x47   : > { %s7370_s4 = smov (%p60_p8, %s59_s4), 0  ;;  %s7372_s2 = smov (!%p60_p8, %s62_s2), %s5364_s30 }
  0x48   : > { %7281 = sst [smem:[#allocation40_spill]] %s7370_s4  ;;  %p5618_p11 = por %p77_p0, %p7235_p9 }
  0x49   : > { %p83_p12 = scmp.eq.s32.totalorder %s5600_s6, 0  ;;  %p64_p13 = scmp.ge.s32.totalorder %s7372_s2, 2 }
  0x4a   : > { %s92_s12 = ssub.s32 %s5360_s29, %s7370_s4  ;;  %s95_s9 = sadd.s32 1, %s5336_s23 }
  0x4b   : > { %p5628_p1 = por %p83_p12, %p7234_p10  ;;  %p93_p3 = scmp.eq.s32.totalorder %s92_s12, 0 }
  0x4c   : > { %s7374_s2 = smov (%p64_p13, %s7372_s2), 0  ;;  %p108_p0 = scmp.ne.s32.totalorder %s5332_s22, %s5328_s21 }
  0x4d   : > { %s7283_s14 = scalar_select %p5628_p1, 1, 0 }
  0x4e   : > { %7284 = sst [smem:[#allocation41_spill]] %s7374_s2  ;;  %s66_s1 = ssub.s32 %s5364_s30, %s7374_s2 }
  0x4f   : > { %s425_s13 = sadd.s32 1, %s5324_s20  ;;  %p67_p5 = scmp.eq.s32.totalorder %s66_s1, 0 }
  0x50   : > { %p5640_p6 = por %p108_p0, %p83_p12  ;;  %s422_s5 = sor.u32 %s92_s12, %s66_s1 }
  0x51   : > { %s5645_s8 = scalar_select %p93_p3, %s5336_s23, %s95_s9  }
  0x52   : > { %s7285_s11 = scalar_select %p5640_p6, 1, 0 }
  0x53   : > { %7286 = sst [smem:[#allocation42_spill]] %s5645_s8  ;;  %p435_p8 = scmp.ne.s32.totalorder %s5324_s20, %s5320_s19 }
  0x54   : > { %s5648_s3 = scalar_select %p67_p5, %s5348_s26, %s69_s10  }
  0x55   : > { %p423_p13 = scmp.eq.s32.totalorder %s422_s5, 0  ;;  %p436_p2 = scmp.eq.s32.totalorder %s5600_s6, 3 }
  0x56   : > { %7287 = sst [smem:[#allocation43_spill]] %s5648_s3  ;;  %p441_p10 = scmp.ne.s32.totalorder %s5320_s19, %s5316_s18 }
  0x57   : > { %s7288_s21 = sadd.s32 4294967294, %s5368_s16   ;;  %p5660_p12 = por %p436_p2, %p435_p8 }
  0x58   : > { %p442_p9 = scmp.eq.s32.totalorder %s7288_s21, 3  ;;  %p7293_p0 = scmp.ne.s32.totalorder %s5348_s26, %s5344_s25 }
  0x59   : > { %s5658_s7 = scalar_select %p423_p13, %s5324_s20, %s425_s13  }
  0x5a   : > { %p5664_p3 = por %p442_p9, %p441_p10  ;;  %p5671_p5 = por %p436_p2, %p7293_p0 }
  0x5b   : > { %7289 = sst [smem:[#allocation44_spill]] %s5658_s7  ;;  %p7295_p6 = scmp.ne.s32.totalorder %s5344_s25, %s5340_s24 }
  0x5c   : > { %s7291_s9 = scalar_select %p5664_p3, 1, 0 }
  0x5d   : > { %p5678_p1 = por %p442_p9, %p7295_p6  ;;  %s494_s13 = sand.u32 1, %s5348_s26  }
  0x5e   : > { %7292 = sst [smem:[#allocation45_spill]] %s7291_s9  ;;  %s4445_s10 = sshll.u32 %s5364_s30, 4 }
  0x5f   : > { %s7296_s1 = scalar_select %p5678_p1, 1, 0 }
  0x60   : > { %s4013_s12 = sshll.u32 %s494_s13, 4  ;;  %s7298_s0 = sld [smem:[#allocation47_spill]] }
  0x61   : > { %7297 = sst [smem:[#allocation46_spill]] %s7296_s1  ;;  %s498_s23 = scalar_lea.vmem [#allocation3], %s4013_s12 }
  0x62   : > { %s506_s7 = sshll.u32 %s498_s23, 4  ;;  %p7299_p2 = scmp.lt.s32.totalorder %s5368_s16, 4  ;;  %s507_s7 = int_to_ptr.vmem [resolvable:$true] %s506_s7 }
  0x63   : > { %s7300_s30 = sld [smem:[#allocation49_spill]]  ;;  %s495_s24 = scalar_lea.sflag [#allocation4], %s494_s13 }
  0x64   : > { %p4574_p9 = pnand %p7299_p2, %p5618_p11  ;;  %s5372_s9 = smov 128  }
  0x65   : > { %s5373_s4 = smov 8   ;;  %s7301_s28 = scalar_lea.sflag [#allocation7], %s5542_s17 }
  0x66   : > { %s503_s3 = scalar_lea.hbm %s7298_s0, %s4445_s10  ;;  %s536_s10 = scalar_lea.vmem [#allocation8], %s5545_s15 }
  0x67   : > { %s504_s8 = sshll.u32 %s503_s3, 4  ;;  %s543_s23 = sshll.u32 %s536_s10, 4  ;;  %s505_s8 = int_to_ptr.hbm [resolvable:$true] %s504_s8  ;;  %s544_s23 = int_to_ptr.vmem [resolvable:$true] %s543_s23 }
  0x68   : > { %4576 = dma.hbm_to_vmem [thread:$0]  (!%p4574_p9), %s505_s8, 256, %s507_s7, %s495_s24, %s5372_s9, %s5372_s9, %s5373_s4  }
  0x69   : > { %s539_s1 = scalar_lea.hbm %s7300_s30, %s5360_s29  ;;  %s4017_s12 = sshll.u32 %s5545_s15, 6 }
  0x6a   : > { %s541_s3 = sshll.u32 %s539_s1, 4  ;;  %s4446_s21 = sshll.u32 %s5360_s29, 6  ;;  %s542_s3 = int_to_ptr.hbm [resolvable:$true] %s541_s3 }
  0x6b   : > { %4582 = dma.hbm_to_vmem [thread:$0]  (!%p5554_p4), %s542_s3, 16, %s544_s23, %s7301_s28  }
  0x6c   : > { %s7302_s30 = sld [smem:[#allocation51_spill]]  ;;  %s576_s8 = scalar_lea.vmem [#allocation11], %s4017_s12 }
  0x6d   : > { %s584_s9 = sshll.u32 %s576_s8, 4  ;;  %s7248_s1 = smov 64   ;;  %s585_s9 = int_to_ptr.vmem [resolvable:$true] %s584_s9 }
  0x6e   : > { %s7249_s13 = smov 4   ;;  %s7303_s4 = scalar_lea.sflag [#allocation10], %s5542_s17 }
  0x6f   : > { %s7304_s23 = sld [smem:[#allocation53_spill]]  ;;  %s614_s20 = scalar_lea.vmem [#allocation14], %s5545_s15 }
  0x70   : > { %s621_s12 = sshll.u32 %s614_s20, 4  ;;  %s7305_s26 = scalar_lea.sflag [#allocation13], %s5542_s17  ;;  %s622_s12 = int_to_ptr.vmem [resolvable:$true] %s621_s12 }
  0x71   : > { %s7306_s18 = sld [smem:[#allocation55_spill]]  ;;  %s5376_s10 = smov 256  }
  0x72   : > { %s581_s7 = scalar_lea.hbm %s7302_s30, %s4446_s21  ;;  %s4020_s30 = sshll.u32 %s5545_s15, 8 }
  0x73   : > { %s582_s24 = sshll.u32 %s581_s7, 4  ;;  %s4447_s7 = sshll.u32 %s5360_s29, 8  ;;  %s583_s24 = int_to_ptr.hbm [resolvable:$true] %s582_s24 }
  0x74   : > { %4588 = dma.hbm_to_vmem [thread:$0]  (!%p5554_p4), %s583_s24, 1024, %s585_s9, %s7303_s4, %s7248_s1, %s7248_s1, %s7249_s13  }
  0x75   : > { %s617_s28 = scalar_lea.hbm %s7304_s23, %s5360_s29  ;;  %s649_s4 = scalar_lea.vmem [#allocation17], %s4020_s30 }
  0x76   : > { %s619_s21 = sshll.u32 %s617_s28, 4  ;;  %s657_s3 = sshll.u32 %s649_s4, 4  ;;  %s620_s21 = int_to_ptr.hbm [resolvable:$true] %s619_s21  ;;  %s658_s3 = int_to_ptr.vmem [resolvable:$true] %s657_s3 }
  0x77   : > { %4594 = dma.hbm_to_vmem [thread:$0]  (!%p5554_p4), %s620_s21, 16, %s622_s12, %s7305_s26  }
  0x78   : > { %s654_s24 = scalar_lea.hbm %s7306_s18, %s4447_s7  ;;  %s5377_s23 = smov 16  }
  0x79   : > { %s655_s9 = sshll.u32 %s654_s24, 4  ;;  %s7307_s28 = scalar_lea.sflag [#allocation16], %s5542_s17  ;;  %s656_s9 = int_to_ptr.hbm [resolvable:$true] %s655_s9 }
  0x7a   : > { %4600 = dma.hbm_to_vmem [thread:$0]  (!%p5554_p4), %s656_s9, 4096, %s658_s3, %s7307_s28, %s5376_s10, %s5376_s10, %s5377_s23  }
  0x7b   : > { %s7308_s12 = sld [smem:[#allocation57_spill]]  ;;  %s678_s1 = scalar_lea.vmem [#allocation18], %s4020_s30 }
  0x7c   : > { %s686_s13 = sshll.u32 %s678_s1, 4  ;;  %s675_s18 = scalar_lea.sflag [#allocation19], %s5545_s15  ;;  %s687_s13 = int_to_ptr.vmem [resolvable:$true] %s686_s13 }
  0x7d   : > { %s7309_s8 = smov 4   ;;  %s7310_s24 = smov 64  }
  0x7e   : > { %s5742_s17 = sand.u32 (!%p5566_p7), 1, %s5344_s25   ;;  %p7312_p10 = scmp.ne.s32.totalorder (!%p5566_p7), %s7283_s14, 0 }
  0x7f   : > { %704 = sbr.rel (%p5566_p7) target bundleno = 2154 (0x86a), region = 76  ;;  %s4027_s1 = sshll.u32 (!%p5566_p7), %s5742_s17, 4 }
  0x80   : > { %s707_s30 = scalar_lea.sflag (!%p5566_p7), [#allocation4], %s5742_s17 }
  0x81   : > { %s683_s26 = scalar_lea.hbm %s7308_s12, %s4447_s7  ;;  %s5748_s7 = scalar_lea.vmem (!%p5566_p7), [#allocation3], %s4027_s1 }
  0x82   : > { %s684_s0 = sshll.u32 %s683_s26, 4  ;;  %s685_s0 = int_to_ptr.hbm [resolvable:$true] %s684_s0 }
  0x83   : > { %4603 = dma.hbm_to_vmem [thread:$0]  (!%p5554_p4), %s685_s0, 4096, %s687_s13, %s675_s18, %s7310_s24, %s7310_s24, %s7309_s8  }
  0x84   : > { %5283 = dma.done.wait (%p7312_p10), %s707_s30, 256  }
  0x85   : > { %5285 = vsyncadd (%p7312_p10), %s707_s30, 4294967040  ;;  %s716_s15 = sand.u32 1, %s5600_s6   ;;  %s5756_s27 = sand.u32 1, %s5332_s22  }
  0x86   : > { %s717_s13 = scalar_lea.sflag [#allocation7], %s716_s15  ;;  %s719_s9 = scalar_lea.vmem [#allocation6], %s5756_s27 }
  0x87   : > { %p7313_p4 = scmp.ne.s32.totalorder %s7285_s11, 0 }
  0x89   : > { %5287 = dma.done.wait (%p7313_p4), %s717_s13, 32  }
  0x8a   : > { %5289 = vsyncadd (%p7313_p4), %s717_s13, 4294967264  ;;  %s4548_s3 = smul.u32 192, %s5756_s27  ;;  %s735_s10 = scalar_lea.sflag [#allocation10], %s716_s15 }
  0x8c   : > { %s5765_s23 = scalar_lea.vmem [#allocation9], %s4548_s3 }
  0x8d   : > { %5291 = dma.done.wait (%p7313_p4), %s735_s10, 4096  }
  0x8e   : > { %5293 = vsyncadd (%p7313_p4), %s735_s10, 4294963200  ;;  %s4028_s6 = sshll.u32 %s5756_s27, 6  ;;  %s755_s20 = scalar_lea.sflag [#allocation13], %s716_s15 }
  0x8f   : > { %s5772_s28 = scalar_lea.vmem [#allocation11], %s4028_s6 }
  0x90   : > { %5295 = dma.done.wait (%p7313_p4), %s755_s20, 32  }
  0x91   : > { %5297 = vsyncadd (%p7313_p4), %s755_s20, 4294967264  ;;  %s773_s26 = scalar_lea.sflag [#allocation16], %s716_s15 }
  0x92   : > { %5299 = dma.done.wait (%p7313_p4), %s773_s26, 4112  }
  0x93   : > { %5301 = vsyncadd (%p7313_p4), %s773_s26, 4294963184  ;;  %s4029_s18 = sshll.u32 %s5756_s27, 8  ;;  %s792_s24 = scalar_lea.sflag [#allocation19], %s5756_s27 }
  0x94   : > { %s5786_s8 = scalar_lea.vmem [#allocation17], %s4029_s18  ;;  %s5789_s4 = scalar_lea.vmem [#allocation18], %s4029_s18 }
  0x95   : > { %5303 = dma.done.wait (%p7313_p4), %s792_s24, 4096  }
  0x96   : > { %5305 = vsyncadd (%p7313_p4), %s792_s24, 4294963200  ;;  %s7314_s30 = sld [smem:[#allocation36_spill]]  ;;  %s885_s15 = sand.u32 1, %s5320_s19  }
  0x97   : > { %s4031_s13 = sshll.u32 %s885_s15, 4  ;;  %s7315_s26 = sld [smem:[#allocation58_spill]] }
  0x98   : > { %s7316_s0 = sld [smem:[#allocation56_spill]]  ;;  %s5812_s21 = scalar_lea.vmem [#allocation20], %s4031_s13 }
  0x99   : > { %s5816_s14 = scalar_lea.vmem [#allocation21], %s4027_s1 }
  0x9c   : > { %p895_p7 = scmp.lt.s32.totalorder %s7314_s30, 1  ;;  %p4034_p11 = scmp.ne.s32.totalorder %s7314_s30, 0 }
  0x9e   : > { %s5800_s3 = scalar_select %p895_p7, %s7314_s30, 1 }
  0x9f   : > { %906 = sbr.rel (%p4034_p11) target bundleno = 167 (0xa7), region = 120 }
  0xa0   : > { %s4033_s10 = sshll.u32 %s5800_s3, 2  ;;  %s901_s18 = scalar_lea.vmem %s7315_s26, %s5800_s3 }
  0xa1   : > { %s5810_s12 = scalar_lea.vmem %s7316_s0, %s4033_s10 }
  0xa4   : > { %v907_v0 = vld [vmem:[%s5748_s7] sm:$0xff]  ;;  %v908_v1 = vld [vmem:[%s5748_s7 + $0x8] sm:$0xff] }
  0xa5   : > { %909 = vst [vmem:[#allocation2] sm:$0xff] %v907_v0 }
  0xa6   : > { %910 = vst [vmem:[#allocation2 + $0x8] sm:$0xff] %v908_v1 }
  0xa7 PF: > { %v4121_v6 = vld [vmem:[%s5765_s23 + $0xa8] sm:$0xf]  ;;  %v4471_v7 = vld [vmem:[%s5765_s23 + $0xb0] sm:$0xf0]  ;;  %v4470_v8 = vld [vmem:[%s5765_s23 + $0xac] sm:$0xf] }
  0xa8   : > { %v4122_v9 = vor.u32 %v4471_v7, %v4121_v6  ;;  %v4123_v10 = vld [vmem:[%s5765_s23 + $0xb4] sm:$0xf0]  ;;  %v4129_v11 = vld [vmem:[%s5765_s23 + $0xb0] sm:$0xf]  ;;  %v4472_v12 = vld [vmem:[%s5765_s23 + $0xb8] sm:$0xf0] }
  0xa9   : > { %v4126_v13 = vor.u32 %v4470_v8, %v4123_v10  ;;  %v4130_v14 = vor.u32 %v4472_v12, %v4129_v11  ;;  %v4109_v15 = vld [vmem:[%s5765_s23 + $0x90] sm:$0xf]  ;;  %v4468_v16 = vld [vmem:[%s5765_s23 + $0x98] sm:$0xf0]  ;;  %v4467_v17 = vld [vmem:[%s5765_s23 + $0x94] sm:$0xf] }
  0xaa   : > { %1134 = vmatpush.bf16.msra.mxu0 %v4122_v9  ;;  %v4110_v18 = vor.u32 %v4468_v16, %v4109_v15  ;;  %v4111_v19 = vld [vmem:[%s5765_s23 + $0x9c] sm:$0xf0]  ;;  %v4117_v20 = vld [vmem:[%s5765_s23 + $0x98] sm:$0xf]  ;;  %v4469_v21 = vld [vmem:[%s5765_s23 + $0xa0] sm:$0xf0] }
  0xab   : > { %1148 = vmatpush.bf16.msra.mxu1 %v4126_v13  ;;  %1162 = vmatpush.bf16.msra.mxu2 %v4130_v14  ;;  %v4114_v22 = vor.u32 %v4467_v17, %v4111_v19  ;;  %v4118_v23 = vor.u32 %v4469_v21, %v4117_v20  ;;  %v4097_v24 = vld [vmem:[%s5765_s23 + $0x78] sm:$0xf]  ;;  %v4465_v25 = vld [vmem:[%s5765_s23 + $0x80] sm:$0xf0]  ;;  %v4464_v26 = vld [vmem:[%s5765_s23 + $0x7c] sm:$0xf] }
  0xac   : > { %v5821_v2 = vld [vmem:[#allocation2] sm:$0xff]  ;;  %v4098_v27 = vor.u32 %v4465_v25, %v4097_v24  ;;  %v4099_v28 = vld [vmem:[%s5765_s23 + $0x84] sm:$0xf0]  ;;  %v4105_v29 = vld [vmem:[%s5765_s23 + $0x80] sm:$0xf]  ;;  %s7317_s1 = scalar_lea.vmem [#allocation8], %s5756_s27 }
  0xad   : > { %v5823_v3 = vld [vmem:[#allocation2 + $0x8] sm:$0xff]  ;;  %917 = vadd.xlane.f32.xlu0 %v5821_v2  ;;  %913 = vst [vmem:[%s5812_s21] sm:$0xff] %v5821_v2  ;;  %v923_v4 = vmul.f32 %v5821_v2, %v5821_v2  ;;  %v4466_v30 = vld [vmem:[%s5765_s23 + $0x88] sm:$0xf0]  ;;  %v4102_v31 = vor.u32 %v4464_v26, %v4099_v28  ;;  %v4085_v33 = vld [vmem:[%s5765_s23 + $0x60] sm:$0xf]  ;;  %s5378_s7 = smov 96  }
  0xae   : > { %914 = vst [vmem:[%s5812_s21 + $0x8] sm:$0xff] %v5823_v3  ;;  %v924_v5 = vmul.f32 %v5823_v3, %v5823_v3  ;;  %1135 = vmatpush.bf16.msra.mxu0 %v4110_v18  ;;  %v4106_v32 = vor.u32 %v4466_v30, %v4105_v29  ;;  %v4462_v34 = vld [vmem:[%s5765_s23 + $0x68] sm:$0xf0]  ;;  %v4461_v35 = vld [vmem:[%s5765_s23 + $0x64] sm:$0xf]  ;;  %vm1237_vm6 = vcmask 1047556  }
  0xaf   : > { %925 = vadd.xlane.f32.xlu1 %v923_v4  ;;  %1149 = vmatpush.bf16.msra.mxu1 %v4114_v22  ;;  %v4086_v36 = vor.u32 %v4462_v34, %v4085_v33  ;;  %v4087_v37 = vld [vmem:[%s5765_s23 + $0x6c] sm:$0xf0]  ;;  %v4093_v38 = vld [vmem:[%s5765_s23 + $0x68] sm:$0xf]  ;;  %v4463_v39 = vld [vmem:[%s5765_s23 + $0x70] sm:$0xf0] }
  0xb0   : > { %1163 = vmatpush.bf16.msra.mxu2 %v4118_v23  ;;  %v4090_v40 = vor.u32 %v4461_v35, %v4087_v37  ;;  %v4094_v41 = vor.u32 %v4463_v39, %v4093_v38  ;;  %v4073_v42 = vld [vmem:[%s5765_s23 + $0x48] sm:$0xf]  ;;  %v4459_v43 = vld [vmem:[%s5765_s23 + $0x50] sm:$0xf0]  ;;  %v4458_v44 = vld [vmem:[%s5765_s23 + $0x4c] sm:$0xf] }
  0xb1   : > { %v4074_v45 = vor.u32 %v4459_v43, %v4073_v42  ;;  %v4075_v46 = vld [vmem:[%s5765_s23 + $0x54] sm:$0xf0]  ;;  %v4081_v47 = vld [vmem:[%s5765_s23 + $0x50] sm:$0xf]  ;;  %v4460_v48 = vld [vmem:[%s5765_s23 + $0x58] sm:$0xf0] }
  0xb2   : > { %1136 = vmatpush.bf16.msra.mxu0 %v4098_v27  ;;  %v4078_v49 = vor.u32 %v4458_v44, %v4075_v46  ;;  %v4082_v50 = vor.u32 %v4460_v48, %v4081_v47  ;;  %v4061_v52 = vld [vmem:[%s5765_s23 + $0x30] sm:$0xf]  ;;  %v4456_v53 = vld [vmem:[%s5765_s23 + $0x38] sm:$0xf0]  ;;  %v4455_v54 = vld [vmem:[%s5765_s23 + $0x34] sm:$0xf] }
  0xb3   : > { %1150 = vmatpush.bf16.msra.mxu1 %v4102_v31  ;;  %v4062_v56 = vor.u32 %v4456_v53, %v4061_v52  ;;  %v4063_v57 = vld [vmem:[%s5765_s23 + $0x3c] sm:$0xf0]  ;;  %v4069_v58 = vld [vmem:[%s5765_s23 + $0x38] sm:$0xf]  ;;  %v4457_v61 = vld [vmem:[%s5765_s23 + $0x40] sm:$0xf0] }
  0xb4   : > { %1164 = vmatpush.bf16.msra.mxu2 %v4106_v32  ;;  %v4066_v60 = vor.u32 %v4455_v54, %v4063_v57  ;;  %v4070_v0 = vor.u32 %v4457_v61, %v4069_v58  ;;  %v4049_v1 = vld [vmem:[%s5765_s23 + $0x18] sm:$0xf]  ;;  %v4453_v4 = vld [vmem:[%s5765_s23 + $0x20] sm:$0xf0]  ;;  %v4452_v6 = vld [vmem:[%s5765_s23 + $0x1c] sm:$0xf] }
  0xb5   : > { %919 = vadd.xlane.f32.xlu0 %v5823_v3  ;;  %v4051_v7 = vld [vmem:[%s5765_s23 + $0x24] sm:$0xf0]  ;;  %v4057_v8 = vld [vmem:[%s5765_s23 + $0x20] sm:$0xf]  ;;  %v4454_v11 = vld [vmem:[%s5765_s23 + $0x28] sm:$0xf0] }
  0xb6   : > { %1137 = vmatpush.bf16.msra.mxu0 %v4086_v36  ;;  %v4054_v10 = vor.u32 %v4452_v6, %v4051_v7  ;;  %v4037_v12 = vld [vmem:[%s5765_s23] sm:$0xf]  ;;  %v4450_v13 = vld [vmem:[%s5765_s23 + $0x8] sm:$0xf0]  ;;  %v4058_v14 = vor.u32 %v4454_v11, %v4057_v8  ;;  %v4449_v15 = vld [vmem:[%s5765_s23 + $0x4] sm:$0xf] }
  0xb7   : > { %927 = vadd.xlane.f32.xlu1 %v924_v5  ;;  %1151 = vmatpush.bf16.msra.mxu1 %v4090_v40  ;;  %v4050_v5 = vor.u32 %v4453_v4, %v4049_v1  ;;  %v4039_v16 = vld [vmem:[%s5765_s23 + $0xc] sm:$0xf0]  ;;  %v4045_v17 = vld [vmem:[%s5765_s23 + $0x8] sm:$0xf]  ;;  %v4038_v19 = vor.u32 %v4450_v13, %v4037_v12  ;;  %v4451_v20 = vld [vmem:[%s5765_s23 + $0x10] sm:$0xf0] }
  0xb8   : > { %1165 = vmatpush.bf16.msra.mxu2 %v4094_v41  ;;  %v4042_v22 = vor.u32 %v4449_v15, %v4039_v16  ;;  %v4046_v25 = vor.u32 %v4451_v20, %v4045_v17  ;;  %v4800_v46 = vld [vmem:[%s719_s9] ss:$0 sm:$0xff]  ;;  %s5379_s9 = smov 64   ;;  %s5380_s23 = smov 32   ;;  %v5381_v8 = vmov 1983009808  }
  0xb9   : > { %v4801_v52 = vld [vmem:[%s7317_s1] ss:$0 sm:$0xff]  ;;  %vm1939_vm7 = vcmask 261120   ;;  %vm2050_vm8 = vcmask 130048   ;;  %vm2505_vm9 = vcmask 523264   ;;  %vm2508_vm10 = vcmask 785408  }
  0xba   : > { %1138 = vmatpush.bf16.msra.mxu0 %v4074_v45  ;;  %s7322_s0 = scalar_lea.vmem [#allocation14], %s5756_s27  ;;  %s7337_s30 = sld [smem:[#allocation36_spill]] }
  0xbb   : > { %1152 = vmatpush.bf16.msra.mxu1 %v4078_v49 }
  0xbc   : > { %1166 = vmatpush.bf16.msra.mxu2 %v4082_v50 }
  0xbe   : > { %1139 = vmatpush.bf16.msra.mxu0 %v4062_v56 }
  0xbf   : > { %1153 = vmatpush.bf16.msra.mxu1 %v4066_v60 }
  0xc0   : > { %1167 = vmatpush.bf16.msra.mxu2 %v4070_v0  ;;  %p4435_p6 = scmp.ne.s32.totalorder %s7337_s30, 1 }
  0xc1   : > { %s7338_s10 = sld [smem:[#allocation59_spill]] (!%p4435_p6) }
  0xc2   : > { %1140 = vmatpush.bf16.msra.mxu0 %v4050_v5  ;;  %s7339_s26 = sld [smem:[#allocation60_spill]] (!%p4435_p6) }
  0xc3   : > { %1154 = vmatpush.bf16.msra.mxu1 %v4054_v10 }
  0xc4   : > { %1168 = vmatpush.bf16.msra.mxu2 %v4058_v14 }
  0xc6   : > { %1141 = vmatpush.bf16.msra.mxu0 %v4038_v19 }
  0xc7   : > { %1155 = vmatpush.bf16.msra.mxu1 %v4042_v22  ;;  %v5382_v22 = vmov 1934713408  }
  0xc8   : > { %1169 = vmatpush.bf16.msra.mxu2 %v4046_v25 }
 0x120   : > { %v918_v51 = vpop.xlane.xlu0 %917 }
 0x121   : > { %v5868_v55 = vmul.f32 0.0078125, %v918_v51 }
 0x122   : > { %v926_v59 = vpop.xlane.xlu1 %925 }
 0x123   : > { %v931_v62 = vmul.f32 %v5868_v55, %v5868_v55  ;;  %v929_v63 = vmul.f32 0.0078125, %v926_v59  ;;  %v937_v43 = vsub.f32 %v5821_v2, %v5868_v55 }
 0x125   : > { %v933_v9 = vsub.f32 %v929_v63, %v931_v62 }
 0x127   : > { %v935_v18 = vmax.f32 %v933_v9, 0.0  ;;  %v1242_v9 = vunpack.c.l.s4 %v5381_v8 }
 0x128   : > { %v920_v21 = vpop.xlane.xlu0 %919 }
 0x129   : > { %v939_v23 = vadd.f32 1e-05, %v935_v18  ;;  %v922_v24 = vmul.f32 0.0078125, %v920_v21  ;;  %v5921_v15 = vunpack.c.0.s8 %v1242_v9 }
 0x12a   : > { %v928_v26 = vpop.xlane.xlu1 %927 }
 0x12b   : > { %4806 = vrsqrt.f32 %v939_v23  ;;  %v932_v27 = vmul.f32 %v922_v24, %v922_v24  ;;  %v930_v28 = vmul.f32 0.0078125, %v928_v26  ;;  %vm947_vm1 = vweird.f32 %v939_v23 }
 0x12c   : > { %v938_v48 = vsub.f32 %v5823_v3, %v922_v24 }
 0x12d   : > { %v934_v29 = vsub.f32 %v930_v28, %v932_v27 }
 0x12f   : > { %v936_v30 = vmax.f32 %v934_v29, 0.0 }
 0x131   : > { %v4807_v31 = vpop.eup %4806  ;;  %v940_v33 = vadd.f32 1e-05, %v936_v30 }
 0x132   : > { %v942_v32 = vmul.f32 %v4807_v31, %v939_v23  ;;  %vm948_vm0 = vweird.f32 %v4807_v31  ;;  %v1290_v23 = vunpack.c.l.s4 %v5382_v22 }
 0x133   : > { %4808 = vrsqrt.f32 %v940_v33  ;;  %vm949_vm2 = vmor %vm947_vm1, %vm948_vm0  ;;  %vm957_vm4 = vweird.f32 %v940_v33 }
 0x134   : > { %v943_v34 = vmul.f32 %v4807_v31, %v942_v32 }
 0x136   : > { %v944_v35 = vmul.f32 0.5, %v943_v34 }
 0x138   : > { %v945_v36 = vsub.f32 1.5, %v944_v35 }
 0x139   : > { %v4809_v37 = vpop.eup %4808 }
 0x13a   : > { %v946_v38 = vmul.f32 %v4807_v31, %v945_v36  ;;  %v952_v39 = vmul.f32 %v4809_v37, %v940_v33  ;;  %vm958_vm3 = vweird.f32 %v4809_v37 }
 0x13b   : > { %vm959_vm5 = vmor %vm957_vm4, %vm958_vm3 }
 0x13c   : > { %v953_v40 = vmul.f32 %v4809_v37, %v952_v39  ;;  %v950_v42 = vsel %vm949_vm2, %v4807_v31, %v946_v38 }
 0x13d   : > { %v961_v45 = vmul.f32 %v950_v42, %v937_v43 }
 0x13e   : > { %v954_v41 = vmul.f32 0.5, %v953_v40 }
 0x13f   : > { %v966_v51 = vmul.f32 %v4800_v46, %v961_v45 }
 0x140   : > { %v955_v44 = vsub.f32 1.5, %v954_v41 }
 0x141   : > { %v971_v54 = vadd.f32 %v4801_v52, %v966_v51 }
 0x142   : > { %v956_v47 = vmul.f32 %v4809_v37, %v955_v44 }
 0x144   : > { %v960_v49 = vsel %vm959_vm5, %v4809_v37, %v956_v47  ;;  %v5937_v37 = vunpack.c.0.s8 %v1290_v23 }
 0x145   : > { %v962_v50 = vmul.f32 %v960_v49, %v938_v48 }
 0x147   : > { %v967_v53 = vmul.f32 %v4800_v46, %v962_v50 }
 0x149   : > { %v972_v56 = vadd.f32 %v4801_v52, %v967_v53 }
 0x14b   : > { %v973_v57 = vpack.c.bf16 %v972_v56, %v971_v54 }
 0x14d   : > { %1142 = vmatmul.bf16.vlgmr.msra.gmra.mxu0 %v973_v57  ;;  %1156 = vmatmul.bf16.vlgmr.msra.gmra.mxu1 %v973_v57 }
 0x14e   : > { %1170 = vmatmul.bf16.vlgmr.msra.gmra.mxu2 %v973_v57 }
 0x1ca   : > { %v5894_v2 = vpop.f32.mrf.mxu0  ;;  %v5896_v55 = vpop.f32.mrf.mxu1 }
 0x1cb   : > { %v1239_v24 = vrot.slane %v5894_v2, 4  ;;  %v1263_v29 = vrot.slane %v5896_v55, 4 }
 0x1d1   : > { %v5898_v58 = vpop.f32.mrf.mxu2 }
 0x1d2   : > { %v5900_v3 = vpop.f32.mrf.mxu0  ;;  %v5902_v59 = vpop.f32.mrf.mxu1  ;;  %v1351_v30 = vrot.slane %v5898_v58, 4 }
 0x1d3   : > { %v4750_v60 = vpack.i.bf16 %v5902_v59, %v5896_v55  ;;  %v4755_v61 = vpack.i.bf16 %v5900_v3, %v5894_v2  ;;  %v1407_v31 = vrot.slane %v5900_v3, 4  ;;  %v1431_v32 = vrot.slane %v5902_v59, 4 }
 0x1d5   : > { %4751 = vrot.lane.b32.xlu0 %v4750_v60, %s5378_s7  ;;  %4756 = vrot.lane.b32.xlu1 %v4755_v61, %s5379_s9 }
 0x1d6   : > { %4741 = vrot.lane.b32.xlu2 %v4755_v61, %s5378_s7 }
 0x1d9   : > { %v5911_v62 = vpop.f32.mrf.mxu2 }
 0x1da   : > { %v4775_v63 = vpack.i.bf16 %v5911_v62, %v5898_v58  ;;  %v1519_v33 = vrot.slane %v5911_v62, 4 }
 0x1dd   : > { %4776 = vrot.lane.b32.xlu0 %v4775_v63, %s5379_s9 }
 0x1de   : > { %4746 = vrot.lane.b32.xlu2 %v4755_v61, %s5380_s23 }
 0x1e6   : > { %4761 = vrot.lane.b32.xlu2 %v4750_v60, %s5380_s23 }
 0x1ee   : > { %4766 = vrot.lane.b32.xlu2 %v4750_v60, %s5379_s9 }
 0x1f6   : > { %4771 = vrot.lane.b32.xlu2 %v4775_v63, %s5378_s7 }
 0x1fe   : > { %4781 = vrot.lane.b32.xlu2 %v4775_v63, %s5380_s23 }
 0x230   : > { %v4742_v0 = vpop.permute.xlu2 %4741 }
 0x231   : > { %v4744_v6 = vunpack.i.h.bf16 %v4742_v0  ;;  %v4743_v7 = vunpack.i.l.bf16 %v4742_v0 }
 0x233   : > { %v1419_v12 = vrot.slane %v4744_v6, 4  ;;  %v1251_v13 = vrot.slane %v4743_v7, 4 }
 0x238   : > { %v4747_v1 = vpop.permute.xlu2 %4746 }
 0x239   : > { %v4749_v4 = vunpack.i.h.bf16 %v4747_v1  ;;  %v4748_v5 = vunpack.i.l.bf16 %v4747_v1 }
 0x23b   : > { %v1417_v10 = vrot.slane %v4749_v4, 4  ;;  %v1249_v11 = vrot.slane %v4748_v5, 4  ;;  %v1252_v17 = vsel %vm1237_vm6, %v4748_v5, %v1251_v13  ;;  %v1420_v19 = vsel %vm1237_vm6, %v4749_v4, %v1419_v12 }
 0x23c   : > { %v1260_v26 = vperm.slane %v1252_v17, %v5921_v15  ;;  %v1428_v28 = vperm.slane %v1420_v19, %v5921_v15 }
 0x23d   : > { %v1250_v16 = vsel %vm1237_vm6, %v1249_v11, %v4743_v7  ;;  %v1418_v18 = vsel %vm1237_vm6, %v1417_v10, %v4744_v6 }
 0x23e   : > { %v1256_v25 = vperm.slane %v1250_v16, %v5921_v15  ;;  %v1424_v27 = vperm.slane %v1418_v18, %v5921_v15  ;;  %v1297_v44 = vrot.slane %v1260_v26, 4  ;;  %v1465_v46 = vrot.slane %v1428_v28, 4 }
 0x240   : > { %v4762_v14 = vpop.permute.xlu2 %4761  ;;  %v1285_v43 = vrot.slane %v1256_v25, 4  ;;  %v1453_v45 = vrot.slane %v1424_v27, 4 }
 0x241   : > { %v4764_v20 = vunpack.i.h.bf16 %v4762_v14  ;;  %v4763_v21 = vunpack.i.l.bf16 %v4762_v14 }
 0x243   : > { %v1441_v34 = vrot.slane %v4764_v20, 4  ;;  %v1273_v35 = vrot.slane %v4763_v21, 4 }
 0x247   : > { %v4752_v36 = vpop.permute.xlu0 %4751  ;;  %v4757_v38 = vpop.permute.xlu1 %4756 }
 0x248   : > { %v4754_v39 = vunpack.i.h.bf16 %v4752_v36  ;;  %v4753_v40 = vunpack.i.l.bf16 %v4752_v36  ;;  %v4759_v41 = vunpack.i.h.bf16 %v4757_v38  ;;  %v4758_v42 = vunpack.i.l.bf16 %v4757_v38  ;;  %v4767_v51 = vpop.permute.xlu2 %4766 }
 0x249   : > { %v4769_v4 = vunpack.i.h.bf16 %v4767_v51  ;;  %v4768_v5 = vunpack.i.l.bf16 %v4767_v51 }
 0x24a   : > { %v1443_v47 = vrot.slane %v4754_v39, 4  ;;  %v1274_v48 = vsel %vm1237_vm6, %v1273_v35, %v4753_v40  ;;  %v1275_v49 = vrot.slane %v4753_v40, 4  ;;  %v1442_v50 = vsel %vm1237_vm6, %v1441_v34, %v4754_v39 }
 0x24b   : > { %v5942_v52 = vperm.slane %v1274_v48, %v5921_v15  ;;  %v5945_v53 = vperm.slane %v1442_v50, %v5921_v15  ;;  %v1405_v54 = vrot.slane %v4759_v41, 4  ;;  %v1236_v56 = vrot.slane %v4758_v42, 4 }
 0x24c   : > { %v1276_v57 = vsel %vm1237_vm6, %v4763_v21, %v1275_v49  ;;  %v1444_v60 = vsel %vm1237_vm6, %v4764_v20, %v1443_v47  ;;  %v1240_v61 = vsel %vm1237_vm6, %v4758_v42, %v1239_v24  ;;  %v1408_v63 = vsel %vm1237_vm6, %v4759_v41, %v1407_v31 }
 0x24d   : > { %v5952_v0 = vperm.slane %v1276_v57, %v5921_v15  ;;  %v1309_v1 = vrot.slane %v5942_v52, 4  ;;  %v1406_v6 = vsel %vm1237_vm6, %v1405_v54, %v5900_v3  ;;  %v1238_v7 = vsel %vm1237_vm6, %v1236_v56, %v5894_v2 }
 0x24e   : > { %v1248_v8 = vperm.slane %v1240_v61, %v5921_v15  ;;  %v1416_v9 = vperm.slane %v1408_v63, %v5921_v15  ;;  %v1452_v10 = vperm.slane %v1444_v60, %v5921_v15  ;;  %v1477_v11 = vrot.slane %v5945_v53, 4 }
 0x24f   : > { %v1412_v12 = vperm.slane %v1406_v6, %v5921_v15  ;;  %v1244_v13 = vperm.slane %v1238_v7, %v5921_v15  ;;  %v1321_v31 = vrot.slane %v5952_v0, 4  ;;  %v1429_v42 = vrot.slane %v4769_v4, 4  ;;  %v4777_v57 = vpop.permute.xlu0 %4776 }
 0x250   : > { %v1298_v14 = vsel %vm1237_vm6, %v1297_v44, %v1248_v8  ;;  %v1299_v16 = vrot.slane %v1248_v8, 4  ;;  %v1466_v3 = vsel %vm1237_vm6, %v1465_v46, %v1416_v9  ;;  %v1467_v17 = vrot.slane %v1416_v9, 4 }
 0x251   : > { %v1455_v18 = vrot.slane %v1412_v12, 4  ;;  %v1286_v2 = vsel %vm1237_vm6, %v1285_v43, %v1244_v13  ;;  %v1287_v19 = vrot.slane %v1244_v13, 4  ;;  %v5969_v20 = vperm.slane %v1298_v14, %v5937_v37 }
 0x252   : > { %v5972_v21 = vperm.slane %v1286_v2, %v5937_v37  ;;  %v1300_v22 = vsel %vm1237_vm6, %v1260_v26, %v1299_v16  ;;  %v1454_v23 = vsel %vm1237_vm6, %v1453_v45, %v1412_v12  ;;  %v1468_v24 = vsel %vm1237_vm6, %v1428_v28, %v1467_v17  ;;  %v6028_v16 = vpop.permute.xlu2 %4771 }
 0x253   : > { %v1288_v34 = vsel %vm1237_vm6, %v1256_v25, %v1287_v19  ;;  %v5980_v35 = vperm.slane %v1300_v22, %v5937_v37  ;;  %v1456_v36 = vsel %vm1237_vm6, %v1424_v27, %v1455_v18  ;;  %v1489_v38 = vrot.slane %v1452_v10, 4 }
 0x254   : > { %v5984_v39 = vperm.slane %v1288_v34, %v5937_v37  ;;  %v5987_v40 = vperm.slane %v1454_v23, %v5937_v37  ;;  %v5990_v26 = vperm.slane %v1456_v36, %v5937_v37  ;;  %v1343_v28 = vrot.slane %v5969_v20, 4 }
 0x255   : > { %v1472_v41 = vperm.slane %v1466_v3, %v5937_v37  ;;  %v5995_v25 = vperm.slane %v1468_v24, %v5937_v37  ;;  %v1335_v27 = vrot.slane %v5972_v21, 4  ;;  %v1347_v44 = vrot.slane %v5980_v35, 4 }
 0x256   : > { %v1339_v43 = vrot.slane %v5984_v39, 4  ;;  %v1432_v45 = vsel %vm1237_vm6, %v4769_v4, %v1431_v32  ;;  %v1503_v46 = vrot.slane %v5987_v40, 4  ;;  %v1507_v47 = vrot.slane %v5990_v26, 4 }
 0x257   : > { %v1430_v48 = vsel %vm1237_vm6, %v1429_v42, %v5902_v59  ;;  %v1440_v49 = vperm.slane %v1432_v45, %v5921_v15  ;;  %v1511_v50 = vrot.slane %v1472_v41, 4  ;;  %v1261_v54 = vrot.slane %v4768_v5, 4 }
 0x258   : > { %v1436_v51 = vperm.slane %v1430_v48, %v5921_v15  ;;  %v1264_v56 = vsel %vm1237_vm6, %v4768_v5, %v1263_v29  ;;  %v1515_v32 = vrot.slane %v5995_v25, 4  ;;  %v4779_v9 = vunpack.i.h.bf16 %v4777_v57 }
 0x259   : > { %v1491_v60 = vrot.slane %v1440_v49, 4  ;;  %v1272_v61 = vperm.slane %v1264_v56, %v5921_v15  ;;  %v1490_v63 = vsel %vm1237_vm6, %v1489_v38, %v1440_v49  ;;  %v1262_v59 = vsel %vm1237_vm6, %v1261_v54, %v5896_v55 }
 0x25a   : > { %v1479_v4 = vrot.slane %v1436_v51, 4  ;;  %v1478_v6 = vsel %vm1237_vm6, %v1477_v11, %v1436_v51  ;;  %v1496_v7 = vperm.slane %v1490_v63, %v5937_v37  ;;  %v1268_v8 = vperm.slane %v1262_v59, %v5921_v15 }
 0x25b   : > { %v1322_v29 = vsel %vm1237_vm6, %v1321_v31, %v1272_v61  ;;  %v1323_v5 = vrot.slane %v1272_v61, 4  ;;  %v6025_v14 = vperm.slane %v1478_v6, %v5937_v37  ;;  %v1492_v55 = vsel %vm1237_vm6, %v1452_v10, %v1491_v60 }
 0x25c   : > { %v1328_v12 = vperm.slane %v1322_v29, %v5937_v37  ;;  %v1480_v13 = vsel %vm1237_vm6, %v5945_v53, %v1479_v4  ;;  %v1310_v11 = vsel %vm1237_vm6, %v1309_v1, %v1268_v8  ;;  %v1311_v3 = vrot.slane %v1268_v8, 4 }
 0x25d   : > { %v1324_v17 = vsel %vm1237_vm6, %v5952_v0, %v1323_v5  ;;  %v1509_v18 = vrot.slane %v1496_v7, 4  ;;  %v1316_v2 = vperm.slane %v1310_v11, %v5937_v37  ;;  %v6040_v22 = vperm.slane %v1480_v13, %v5937_v37 }
 0x25e   : > { %v6037_v53 = vperm.slane %v1324_v17, %v5937_v37  ;;  %v1341_v19 = vrot.slane %v1328_v12, 4  ;;  %v1312_v10 = vsel %vm1237_vm6, %v5942_v52, %v1311_v3  ;;  %v6045_v23 = vsel %vm1237_vm6, %v1328_v12, %v1343_v28 }
 0x25f   : > { %v6048_v1 = vperm.slane %v1492_v55, %v5937_v37  ;;  %v4778_v0 = vunpack.i.l.bf16 %v4777_v57  ;;  %v1320_v24 = vperm.slane %v1312_v10, %v5937_v37  ;;  %v6052_v31 = vsel %vm1237_vm6, %v1316_v2, %v1335_v27 }
 0x260   : > { %v1501_v34 = vrot.slane %v6025_v14, 4  ;;  %v6057_v36 = vsel %vm1237_vm6, %v6025_v14, %v1503_v46  ;;  %v1333_v38 = vrot.slane %v1316_v2, 4  ;;  %v6061_v52 = vsel %vm1237_vm6, %v1341_v19, %v5969_v20 }
 0x261   : > { %v1345_v28 = vrot.slane %v6037_v53, 4  ;;  %v6066_v42 = vsel %vm1237_vm6, %v6037_v53, %v1347_v44  ;;  %v1337_v45 = vrot.slane %v1320_v24, 4  ;;  %v1505_v27 = vrot.slane %v6040_v22, 4 }
 0x262   : > { %v6070_v48 = vsel %vm1237_vm6, %v1509_v18, %v1472_v41  ;;  %v6074_v46 = vsel %vm1237_vm6, %v6048_v1, %v1515_v32  ;;  %v6077_v49 = vsel %vm1237_vm6, %v1496_v7, %v1511_v50  ;;  %v1513_v20 = vrot.slane %v6048_v1, 4  ;;  %v4782_v7 = vpop.permute.xlu2 %4781 }
 0x263   : > { %v1587_v51 = vrot.slane %v6052_v31, 4  ;;  %v1609_v44 = vrot.slane %v6066_v42, 4  ;;  %v1599_v54 = vrot.slane %v6061_v52, 4  ;;  %v1611_v56 = vrot.slane %v6045_v23, 4 }
 0x264   : > { %v1699_v41 = vrot.slane %v6057_v36, 4  ;;  %v1721_v57 = vrot.slane %v6074_v46, 4  ;;  %v1517_v60 = vrot.slane %v4779_v9, 4  ;;  %v1520_v50 = vsel %vm1237_vm6, %v4779_v9, %v1519_v33 }
 0x265   : > { %v1610_v32 = vsel %vm1237_vm6, %v1609_v44, %v6045_v23  ;;  %v1349_v61 = vrot.slane %v4778_v0, 4  ;;  %v1711_v63 = vrot.slane %v6070_v48, 4  ;;  %v1528_v59 = vperm.slane %v1520_v50, %v5921_v15 }
 0x266   : > { %v1722_v4 = vsel %vm1237_vm6, %v1721_v57, %v6077_v49  ;;  %v1352_v6 = vsel %vm1237_vm6, %v4778_v0, %v1351_v30  ;;  %v1723_v8 = vrot.slane %v6077_v49, 4  ;;  %v1518_v29 = vsel %vm1237_vm6, %v1517_v60, %v5911_v62 }
 0x267   : > { %v1350_v33 = vsel %vm1237_vm6, %v1349_v61, %v5898_v58  ;;  %v1360_v5 = vperm.slane %v1352_v6, %v5921_v15  ;;  %v6105_v9 = vperm.slane %v1610_v32, %v5921_v15  ;;  %v1524_v12 = vperm.slane %v1518_v29, %v5921_v15 }
 0x268   : > { %v1356_v13 = vperm.slane %v1350_v33, %v5921_v15  ;;  %v4774_v30 = vunpack.i.h.bf16 %v6028_v16  ;;  %v6111_v14 = vperm.slane %v1722_v4, %v5921_v15  ;;  %v4773_v55 = vunpack.i.l.bf16 %v6028_v16 }
 0x269   : > { %v4784_v62 = vunpack.i.h.bf16 %v4782_v7  ;;  %v4783_v11 = vunpack.i.l.bf16 %v4782_v7  ;;  %v1543_v3 = vrot.slane %v1524_v12, 4  ;;  %v1555_v58 = vrot.slane %v1528_v59, 4 }
 0x26a   : > { %v1387_v17 = vrot.slane %v1360_v5, 4  ;;  %v1531_v18 = vrot.slane %v4774_v30, 4  ;;  %v1375_v2 = vrot.slane %v1356_v13, 4  ;;  %v1363_v53 = vrot.slane %v4773_v55, 4 }
 0x26b   : > { %v1529_v19 = vrot.slane %v4784_v62, 4  ;;  %v1361_v10 = vrot.slane %v4783_v11, 4  ;;  %v6117_v44 = vsel %vm1237_vm6, %v1333_v38, %v5972_v21  ;;  %v6121_v57 = vsel %vm1237_vm6, %v1337_v45, %v5984_v39 }
 0x26c   : > { %v1532_v0 = vsel %vm1237_vm6, %v4784_v62, %v1531_v18  ;;  %v6126_v16 = vsel %vm1237_vm6, %v1320_v24, %v1339_v43  ;;  %v1364_v60 = vsel %vm1237_vm6, %v4783_v11, %v1363_v53  ;;  %v6137_v39 = vsel %vm1237_vm6, %v1345_v28, %v5980_v35 }
 0x26d   : > { %v1362_v32 = vsel %vm1237_vm6, %v1361_v10, %v4773_v55  ;;  %v1530_v50 = vsel %vm1237_vm6, %v1529_v19, %v4774_v30  ;;  %v1540_v61 = vperm.slane %v1532_v0, %v5921_v15  ;;  %v1372_v38 = vperm.slane %v1364_v60, %v5921_v15 }
 0x26e   : > { %v1368_v21 = vperm.slane %v1362_v32, %v5921_v15  ;;  %v1536_v45 = vperm.slane %v1530_v50, %v5921_v15  ;;  %v6142_v4 = vsel %vm1237_vm6, %v1501_v34, %v5987_v40  ;;  %v6146_v6 = vsel %vm1237_vm6, %v1505_v27, %v5990_v26 }
 0x26f   : > { %v1553_v43 = vrot.slane %v1540_v61, 4  ;;  %v1556_v24 = vsel %vm1237_vm6, %v1540_v61, %v1555_v58  ;;  %v1385_v33 = vrot.slane %v1372_v38, 4  ;;  %v1388_v30 = vsel %vm1237_vm6, %v1372_v38, %v1387_v17 }
 0x270   : > { %v1373_v7 = vrot.slane %v1368_v21, 4  ;;  %v1376_v29 = vsel %vm1237_vm6, %v1368_v21, %v1375_v2  ;;  %v1396_v28 = vperm.slane %v1388_v30, %v5937_v37  ;;  %v1541_v55 = vrot.slane %v1536_v45, 4 }
 0x271   : > { %v1384_v35 = vperm.slane %v1376_v29, %v5937_v37  ;;  %v1544_v62 = vsel %vm1237_vm6, %v1536_v45, %v1543_v3  ;;  %v1386_v34 = vsel %vm1237_vm6, %v1385_v33, %v1360_v5  ;;  %v1554_v11 = vsel %vm1237_vm6, %v1553_v43, %v1528_v59 }
 0x272   : > { %v1374_v40 = vsel %vm1237_vm6, %v1373_v7, %v1356_v13  ;;  %v1552_v27 = vperm.slane %v1544_v62, %v5937_v37  ;;  %v6161_v17 = vperm.slane %v1386_v34, %v5937_v37  ;;  %v6165_v2 = vrot.slane %v1396_v28, 4 }
 0x273   : > { %v6158_v58 = vperm.slane %v1374_v40, %v5937_v37  ;;  %v6163_v18 = vrot.slane %v1384_v35, 4  ;;  %v1542_v3 = vsel %vm1237_vm6, %v1541_v55, %v1524_v12  ;;  %v6169_v13 = vperm.slane %v1554_v11, %v5937_v37 }
 0x274   : > { %v1564_v5 = vperm.slane %v1556_v24, %v5937_v37  ;;  %v6172_v53 = vrot.slane %v1552_v27, 4  ;;  %v1401_v19 = vrot.slane %v6161_v17, 4  ;;  %v6181_v10 = vsel %vm1237_vm6, 0.0, %v6165_v2 }
 0x275   : > { %v6176_v59 = vsel %vm1237_vm6, 0.0, %v6163_v18  ;;  %v6187_v12 = vsel %vm1237_vm6, %v6040_v22, %v1507_v47  ;;  %v6190_v0 = vperm.slane %v1542_v3, %v5937_v37  ;;  %v1569_v60 = vrot.slane %v6169_v13, 4 }
 0x276   : > { %v6194_v32 = vsel %vm1237_vm6, 0.0, %v6172_v53  ;;  %v6197_v50 = vrot.slane %v1564_v5, 4  ;;  %v1397_v61 = vrot.slane %v6158_v58, 4  ;;  %v6201_v21 = vsel %vm1237_vm6, 0.0, %v1401_v19 }
 0x277   : > { %v1802_v26 = vrot.slane %v6176_v59, 4  ;;  %v6208_v47 = vsel %vm1237_vm6, %v1513_v20, %v5995_v25  ;;  %v1565_v22 = vrot.slane %v6190_v0, 4  ;;  %v6212_v38 = vsel %vm1237_vm6, 0.0, %v1569_v60 }
 0x278   : > { %v1813_v45 = vrot.slane %v6181_v10, 4  ;;  %v6218_v24 = vsel %vm1237_vm6, 0.0, %v6197_v50  ;;  %v1573_v7 = vrot.slane %v6121_v57, 4  ;;  %v1575_v1 = vrot.slane %v6117_v44, 4 }
 0x279   : > { %v1588_v25 = vsel %vm1237_vm6, %v6126_v16, %v1587_v51  ;;  %v1585_v20 = vrot.slane %v6126_v16, 4  ;;  %v1600_v33 = vsel %vm1237_vm6, %v6137_v39, %v1599_v54  ;;  %v1612_v30 = vsel %vm1237_vm6, %v6066_v42, %v1611_v56 }
 0x27a   : > { %v1596_v29 = vperm.slane %v1588_v25, %v5921_v15  ;;  %v1576_v35 = vsel %vm1237_vm6, %v6121_v57, %v1575_v1  ;;  %v1597_v28 = vrot.slane %v6137_v39, 4  ;;  %v1608_v51 = vperm.slane %v1600_v33, %v5921_v15 }
 0x27b   : > { %v1620_v55 = vperm.slane %v1612_v30, %v5921_v15  ;;  %v1584_v62 = vperm.slane %v1576_v35, %v5921_v15  ;;  %v1685_v34 = vrot.slane %v6146_v6, 4  ;;  %v1687_v54 = vrot.slane %v6142_v4, 4 }
 0x27c   : > { %v1633_v40 = vrot.slane %v1596_v29, 4  ;;  %v1697_v27 = vrot.slane %v6187_v12, 4  ;;  %v1700_v42 = vsel %vm1237_vm6, %v6187_v12, %v1699_v41  ;;  %v1712_v56 = vsel %vm1237_vm6, %v6208_v47, %v1711_v63 }
 0x27d   : > { %v1657_v23 = vrot.slane %v1620_v55, 4  ;;  %v1635_v3 = vrot.slane %v1584_v62, 4  ;;  %v1688_v5 = vsel %vm1237_vm6, %v6146_v6, %v1687_v54  ;;  %v1708_v19 = vperm.slane %v1700_v42, %v5921_v15 }
 0x27e   : > { %v1634_v11 = vsel %vm1237_vm6, %v1633_v40, %v1584_v62  ;;  %v1696_v1 = vperm.slane %v1688_v5, %v5921_v15  ;;  %v1709_v25 = vrot.slane %v6208_v47, 4  ;;  %v1720_v41 = vperm.slane %v1712_v56, %v5921_v15 }
 0x27f   : > { %v1658_v60 = vsel %vm1237_vm6, %v1657_v23, %v1608_v51  ;;  %v1640_v33 = vperm.slane %v1634_v11, %v5937_v37  ;;  %v1724_v30 = vsel %vm1237_vm6, %v6074_v46, %v1723_v8  ;;  %v1745_v35 = vrot.slane %v1708_v19, 4 }
 0x280   : > { %v1664_v63 = vperm.slane %v1658_v60, %v5937_v37  ;;  %v1732_v62 = vperm.slane %v1724_v30, %v5921_v15  ;;  %v1747_v40 = vrot.slane %v1696_v1, 4  ;;  %v1636_v54 = vsel %vm1237_vm6, %v1596_v29, %v1635_v3 }
 0x281   : > { %v1659_v23 = vrot.slane %v1608_v51, 4  ;;  %v1746_v5 = vsel %vm1237_vm6, %v1745_v35, %v1696_v1  ;;  %v6271_v56 = vperm.slane %v1636_v54, %v5937_v37  ;;  %v1771_v11 = vrot.slane %v1720_v41, 4 }
 0x282   : > { %v1677_v42 = vrot.slane %v1664_v63, 4  ;;  %v1752_v60 = vperm.slane %v1746_v5, %v5937_v37  ;;  %v1769_v49 = vrot.slane %v1732_v62, 4  ;;  %v1748_v46 = vsel %vm1237_vm6, %v1708_v19, %v1747_v40 }
 0x283   : > { %v1660_v43 = vsel %vm1237_vm6, %v1620_v55, %v1659_v23  ;;  %v1683_v29 = vrot.slane %v6271_v56, 4  ;;  %v6282_v51 = vperm.slane %v1748_v46, %v5937_v37  ;;  %v1772_v35 = vsel %vm1237_vm6, %v1732_v62, %v1771_v11 }
 0x284   : > { %v1678_v8 = vsel %vm1237_vm6, %v1677_v42, %v1640_v33  ;;  %v6278_v30 = vperm.slane %v1660_v43, %v5937_v37  ;;  %v1770_v3 = vsel %vm1237_vm6, %v1769_v49, %v1720_v41  ;;  %v1679_v54 = vrot.slane %v1640_v33, 4 }
 0x285   : > { %v1913_v1 = vpack.c.bf16 %v1678_v8, %v1678_v8  ;;  %v1776_v55 = vperm.slane %v1770_v3, %v5937_v37  ;;  %v6290_v43 = vperm.slane %v1772_v35, %v5937_v37  ;;  %v1795_v23 = vrot.slane %v6282_v51, 4 }
 0x286   : > { %v1684_v19 = vsel %vm1237_vm6, %v6278_v30, %v1683_v29  ;;  %v1681_v40 = vrot.slane %v6278_v30, 4  ;;  %v1680_v41 = vsel %vm1237_vm6, %v1664_v63, %v1679_v54  ;;  %v1791_v62 = vrot.slane %v1752_v60, 4 }
 0x287   : > { %v1919_v42 = vpack.c.bf16 %v1684_v19, %v1684_v19  ;;  %v1789_v5 = vrot.slane %v1776_v55, 4  ;;  %v1936_v49 = vunpack.c.l.b16 %v1913_v1  ;;  %v1915_v33 = vpack.c.bf16 %v1680_v41, %v1680_v41 }
 0x288   : > { %v1796_v11 = vsel %vm1237_vm6, %v6290_v43, %v1795_v23  ;;  %v1574_v8 = vsel %vm1237_vm6, %v1573_v7, %v6117_v44  ;;  %v1586_v29 = vsel %vm1237_vm6, %v1585_v20, %v6052_v31  ;;  %v1792_v1 = vsel %vm1237_vm6, %v1776_v55, %v1791_v62 }
 0x289   : > { %v2027_v46 = vunpack.c.l.b16 %v1919_v42  ;;  %v1790_v63 = vsel %vm1237_vm6, %v1789_v5, %v1752_v60  ;;  %v1920_v3 = vpack.c.bf16 %v1796_v11, %v1796_v11  ;;  %v1967_v35 = vunpack.c.l.b16 %v1915_v33 }
 0x28a   : > { %v1914_v54 = vpack.c.bf16 %v1790_v63, %v1790_v63  ;;  %v1916_v19 = vpack.c.bf16 %v1792_v1, %v1792_v1  ;;  %v1580_v23 = vperm.slane %v1574_v8, %v5921_v15  ;;  %v1592_v42 = vperm.slane %v1586_v29, %v5921_v15 }
 0x28b   : > { %v2028_v57 = vunpack.c.l.b16 %v1920_v3  ;;  %v1598_v44 = vsel %vm1237_vm6, %v1597_v28, %v6061_v52  ;;  %v1645_v31 = vrot.slane %v6105_v9, 4  ;;  %v1686_v16 = vsel %vm1237_vm6, %v1685_v34, %v6142_v4 }
 0x28c   : > { %v1937_v7 = vunpack.c.l.b16 %v1914_v54  ;;  %v1968_v20 = vunpack.c.l.b16 %v1916_v19  ;;  %v1604_v60 = vperm.slane %v1598_v44, %v5921_v15  ;;  %v1621_v55 = vrot.slane %v1592_v42, 4 }
 0x28d   : > { %v2029_v41 = vpack.c.b16 %v2028_v57, %v2027_v46  ;;  %v1623_v5 = vrot.slane %v1580_v23, 4  ;;  %v1692_v62 = vperm.slane %v1686_v16, %v5921_v15  ;;  %v1698_v52 = vsel %vm1237_vm6, %v1697_v27, %v6057_v36 }
 0x28e   : > { %v1938_v39 = vpack.c.b16 %v1937_v7, %v1936_v49  ;;  %v1969_v28 = vpack.c.b16 %v1968_v20, %v1967_v35  ;;  %v1622_v6 = vsel %vm1237_vm6, %v1621_v55, %v1580_v23  ;;  %v1646_v4 = vsel %vm1237_vm6, %v1645_v31, %v1604_v60 }
 0x28f   : > { %v2034_v34 = vsel %vm1939_vm7, %v2029_v41, 0  ;;  %v6328_v33 = vperm.slane %v1622_v6, %v5937_v37  ;;  %v6331_v11 = vperm.slane %v1646_v4, %v5937_v37  ;;  %v1704_v46 = vperm.slane %v1698_v52, %v5921_v15 }
 0x290   : > { %v1944_v12 = vsel %vm1939_vm7, %v1938_v39, 0  ;;  %2043 = vmatpush.bf16.xpose.msrb.mxu0 %v2034_v34  ;;  %v1974_v36 = vsel %vm1939_vm7, %v1969_v28, 0  ;;  %v1710_v27 = vsel %vm1237_vm6, %v1709_v25, %v6070_v48  ;;  %v1735_v49 = vrot.slane %v1692_v62, 4 }
 0x291   : > { %1953 = vmatpush.bf16.xpose.msra.mxu3 %v1944_v12  ;;  %v1793_v8 = vrot.slane %v6290_v43, 4  ;;  %v1669_v29 = vrot.slane %v6331_v11, 4  ;;  %v1716_v63 = vperm.slane %v1710_v27, %v5921_v15  ;;  %v1733_v3 = vrot.slane %v1704_v46, 4 }
 0x292   : > { %v1757_v1 = vrot.slane %v6111_v14, 4  ;;  %v1624_v35 = vsel %vm1237_vm6, %v1592_v42, %v1623_v5  ;;  %v1647_v54 = vrot.slane %v1604_v60, 4  ;;  %v1736_v19 = vsel %vm1237_vm6, %v1704_v46, %v1735_v49 }
 0x293   : > { %v1670_v48 = vsel %vm1237_vm6, %v1669_v29, %v6328_v33  ;;  %v1734_v47 = vsel %vm1237_vm6, %v1733_v3, %v1692_v62  ;;  %v6350_v25 = vperm.slane %v1624_v35, %v5937_v37  ;;  %v6353_v43 = vperm.slane %v1736_v19, %v5937_v37 }
 0x294   : > { %v6356_v23 = vperm.slane %v1734_v47, %v5937_v37  ;;  %v1758_v57 = vsel %vm1237_vm6, %v1757_v1, %v1716_v63  ;;  %v1905_v42 = vpack.c.bf16 %v1670_v48, %v1670_v48  ;;  %v1648_v44 = vsel %vm1237_vm6, %v6105_v9, %v1647_v54 }
 0x295   : > { %v6362_v31 = vperm.slane %v1758_v57, %v5937_v37  ;;  %v6365_v16 = vperm.slane %v1648_v44, %v5937_v37  ;;  %v1675_v7 = vrot.slane %v6350_v25, 4  ;;  %v1759_v20 = vrot.slane %v1716_v63, 4 }
 0x296   : > { %v1867_v60 = vrot.slane %v6218_v24, 4  ;;  %v1671_v55 = vrot.slane %v6328_v33, 4  ;;  %v1787_v41 = vrot.slane %v6353_v43, 4  ;;  %v1682_v9 = vsel %vm1237_vm6, %v1681_v40, %v6271_v56 }
 0x297   : > { %v1781_v5 = vrot.slane %v6362_v31, 4  ;;  %v1783_v62 = vrot.slane %v6356_v23, 4  ;;  %v1676_v52 = vsel %vm1237_vm6, %v6365_v16, %v1675_v7  ;;  %v1760_v39 = vsel %vm1237_vm6, %v6111_v14, %v1759_v20 }
 0x298   : > { %v6382_v24 = vperm.slane %v1760_v39, %v5937_v37  ;;  %v1911_v28 = vpack.c.bf16 %v1676_v52, %v1676_v52  ;;  %v1794_v6 = vsel %vm1237_vm6, %v1793_v8, %v6282_v51  ;;  %v1917_v30 = vpack.c.bf16 %v1682_v9, %v1682_v9 }
 0x299   : > { %1983 = vmatpush.bf16.xpose.msrb.mxu3 %v1974_v36  ;;  %v1782_v56 = vsel %vm1237_vm6, %v1781_v5, %v6356_v23  ;;  %v1931_v40 = vunpack.c.l.b16 %v1905_v42  ;;  %v1918_v4 = vpack.c.bf16 %v1794_v6, %v1794_v6  ;;  %v1398_v34 = vsel %vm1237_vm6, 0.0, %v1397_v61 }
 0x29a   : > { %v1906_v46 = vpack.c.bf16 %v1782_v56, %v1782_v56  ;;  %v1788_v14 = vsel %vm1237_vm6, %v6382_v24, %v1787_v41  ;;  %v2022_v12 = vunpack.c.l.b16 %v1911_v28  ;;  %v1566_v36 = vsel %vm1237_vm6, 0.0, %v1565_v22 }
 0x29b   : > { %v1912_v51 = vpack.c.bf16 %v1788_v14, %v1788_v14  ;;  %v1997_v27 = vunpack.c.l.b16 %v1917_v30  ;;  %v1998_v49 = vunpack.c.l.b16 %v1918_v4  ;;  %v1797_v8 = vsel %vm1237_vm6, %v6163_v18, %v6158_v58 }
 0x29c   : > { %v1932_v29 = vunpack.c.l.b16 %v1906_v46  ;;  %v1801_v63 = vperm.slane %v1797_v8, %v5921_v15  ;;  %v1803_v61 = vsel %vm1237_vm6, %v1802_v26, %v1398_v34  ;;  %v1808_v3 = vsel %vm1237_vm6, %v6165_v2, %v6161_v17 }
 0x29d   : > { %v2023_v1 = vunpack.c.l.b16 %v1912_v51  ;;  %v1999_v22 = vpack.c.b16 %v1998_v49, %v1997_v27  ;;  %v1807_v35 = vperm.slane %v1803_v61, %v5921_v15  ;;  %v1812_v54 = vperm.slane %v1808_v3, %v5921_v15 }
 0x29e   : > { %v1933_v19 = vpack.c.b16 %v1932_v29, %v1931_v40  ;;  %v1814_v58 = vsel %vm1237_vm6, %v1813_v45, %v6201_v21  ;;  %v1821_v18 = vrot.slane %v1801_v63, 4  ;;  %v1851_v59 = vsel %vm1237_vm6, %v6172_v53, %v6190_v0 }
 0x29f   : > { %v2024_v26 = vpack.c.b16 %v2023_v1, %v2022_v12  ;;  %v2004_v17 = vsel %vm1939_vm7, %v1999_v22, 0  ;;  %v1818_v2 = vperm.slane %v1814_v58, %v5921_v15  ;;  %v1819_v48 = vrot.slane %v1807_v35, 4 }
 0x2a0   : > { %4131 = vmatmul.msk.bf16.vlgmr.msra.gmra.mxu3 %vm1939_vm7, %v1933_v19  ;;  %v1833_v47 = vrot.slane %v1812_v54, 4  ;;  %v1855_v57 = vperm.slane %v1851_v59, %v5921_v15  ;;  %v7318_v10 = vrot.slane %v6194_v32, 4  ;;  %v1862_v45 = vsel %vm1237_vm6, %v6197_v50, %v6169_v13 }
 0x2a1   : > { %4134 = vmatmul.msk.bf16.vlgmr.msrb.gmra.mxu0 %vm1939_vm7, %v2024_v26  ;;  %2013 = vmatpush.bf16.xpose.msra.mxu3 %v2004_v17  ;;  %v1820_v53 = vsel %vm1237_vm6, %v1819_v48, %v1801_v63  ;;  %v1831_v0 = vrot.slane %v1818_v2, 4  ;;  %v1866_v44 = vperm.slane %v1862_v45, %v5921_v15  ;;  %v1868_v32 = vsel %vm1237_vm6, %v1867_v60, %v6212_v38 }
 0x2a2   : > { %v1857_v21 = vsel %vm1237_vm6, %v7318_v10, %v1566_v36  ;;  %v1826_v7 = vperm.slane %v1820_v53, %v5937_v37  ;;  %v1875_v20 = vrot.slane %v1855_v57, 4  ;;  %v1822_v41 = vsel %vm1237_vm6, %v1807_v35, %v1821_v18 }
 0x2a3   : > { %v1861_v42 = vperm.slane %v1857_v21, %v5921_v15  ;;  %v1832_v13 = vsel %vm1237_vm6, %v1831_v0, %v1812_v54  ;;  %v1872_v50 = vperm.slane %v1868_v32, %v5921_v15  ;;  %v1887_v5 = vrot.slane %v1866_v44, 4 }
 0x2a4   : > { %v1838_v52 = vperm.slane %v1832_v13, %v5937_v37  ;;  %v1845_v39 = vrot.slane %v1826_v7, 4  ;;  %v1830_v28 = vperm.slane %v1822_v41, %v5937_v37  ;;  %v1834_v6 = vsel %vm1237_vm6, %v1818_v2, %v1833_v47 }
 0x2a5   : > { %v1873_v9 = vrot.slane %v1861_v42, 4  ;;  %v1885_v56 = vrot.slane %v1872_v50, 4  ;;  %v1842_v38 = vperm.slane %v1834_v6, %v5937_v37  ;;  %v1876_v60 = vsel %vm1237_vm6, %v1861_v42, %v1875_v20 }
 0x2a6   : > { %v1843_v40 = vrot.slane %v1838_v52, 4  ;;  %v1849_v34 = vrot.slane %v1830_v28, 4  ;;  %v1884_v46 = vperm.slane %v1876_v60, %v5937_v37  ;;  %v1888_v12 = vsel %vm1237_vm6, %v1872_v50, %v1887_v5 }
 0x2a7   : > { %v1874_v30 = vsel %vm1237_vm6, %v1873_v9, %v1855_v57  ;;  %v1886_v14 = vsel %vm1237_vm6, %v1885_v56, %v1866_v44  ;;  %v1846_v36 = vsel %vm1237_vm6, %v1838_v52, %v1845_v39  ;;  %v1672_v51 = vsel %vm1237_vm6, %v6331_v11, %v1671_v55 }
 0x2a8   : > { %v1880_v4 = vperm.slane %v1874_v30, %v5937_v37  ;;  %v1844_v27 = vsel %vm1237_vm6, %v1843_v40, %v1826_v7  ;;  %v1892_v49 = vperm.slane %v1886_v14, %v5937_v37  ;;  %v1850_v29 = vsel %vm1237_vm6, %v1842_v38, %v1849_v34 }
 0x2a9   : > { %v1921_v63 = vpack.c.bf16 %v1844_v27, %v1844_v27  ;;  %v1896_v61 = vperm.slane %v1888_v12, %v5937_v37  ;;  %v1903_v3 = vrot.slane %v1884_v46, 4  ;;  %v1927_v1 = vpack.c.bf16 %v1850_v29, %v1850_v29 }
 0x2aa   : > { %v1899_v8 = vrot.slane %v1880_v4, 4  ;;  %v1897_v22 = vrot.slane %v1892_v49, 4  ;;  %v1923_v54 = vpack.c.bf16 %v1846_v36, %v1846_v36  ;;  %v1784_v33 = vsel %vm1237_vm6, %v6362_v31, %v1783_v62 }
 0x2ab   : > { %v2138_v11 = vunpack.c.l.b16 %v1921_v63  ;;  %v1904_v55 = vsel %vm1237_vm6, %v1896_v61, %v1903_v3  ;;  %v2222_v19 = vunpack.c.l.b16 %v1927_v1  ;;  %v1907_v17 = vpack.c.bf16 %v1672_v51, %v1672_v51 }
 0x2ac   : > { %v1900_v35 = vsel %vm1237_vm6, %v1892_v49, %v1899_v8  ;;  %v1898_v18 = vsel %vm1237_vm6, %v1897_v22, %v1880_v4  ;;  %v1928_v59 = vpack.c.bf16 %v1904_v55, %v1904_v55  ;;  %v2166_v26 = vunpack.c.l.b16 %v1923_v54 }
 0x2ad   : > { %v1924_v58 = vpack.c.bf16 %v1900_v35, %v1900_v35  ;;  %v1922_v2 = vpack.c.bf16 %v1898_v18, %v1898_v18  ;;  %v1908_v47 = vpack.c.bf16 %v1784_v33, %v1784_v33  ;;  %v1847_v57 = vrot.slane %v1842_v38, 4 }
 0x2ae   : > { %v2223_v10 = vunpack.c.l.b16 %v1928_v59  ;;  %v1962_v21 = vunpack.c.l.b16 %v1907_v17  ;;  %v1901_v23 = vrot.slane %v1896_v61, 4  ;;  %v1673_v41 = vrot.slane %v6365_v16, 4 }
 0x2af   : > { %v2167_v48 = vunpack.c.l.b16 %v1924_v58  ;;  %v2139_v45 = vunpack.c.l.b16 %v1922_v2  ;;  %v1963_v53 = vunpack.c.l.b16 %v1908_v47  ;;  %v1848_v31 = vsel %vm1237_vm6, %v1847_v57, %v1830_v28 }
 0x2b0   : > { %v2224_v62 = vpack.c.b16 %v2223_v10, %v2222_v19  ;;  %v1902_v42 = vsel %vm1237_vm6, %v1901_v23, %v1884_v46  ;;  %v1925_v44 = vpack.c.bf16 %v1848_v31, %v1848_v31  ;;  %v1785_v13 = vrot.slane %v6382_v24, 4 }
 0x2b1   : > { %v2168_v0 = vpack.c.b16 %v2167_v48, %v2166_v26  ;;  %v2140_v7 = vpack.c.b16 %v2139_v45, %v2138_v11  ;;  %v1964_v32 = vpack.c.b16 %v1963_v53, %v1962_v21  ;;  %v1926_v20 = vpack.c.bf16 %v1902_v42, %v1902_v42 }
 0x2b2   : > { %2236 = vmatpush.bf16.msra.mxu0 %v2224_v62  ;;  %v2194_v50 = vunpack.c.l.b16 %v1925_v44  ;;  %v1674_v52 = vsel %vm1237_vm6, %v1673_v41, %v6350_v25  ;;  %v1786_v39 = vsel %vm1237_vm6, %v1785_v13, %v6353_v43 }
 0x2b3   : > { %2152 = vmatpush.bf16.msrb.mxu2 %v2140_v7  ;;  %4132 = vmatmul.msk.bf16.vlgmr.msrb.gmra.mxu3 %vm1939_vm7, %v1964_v32  ;;  %v2195_v9 = vunpack.c.l.b16 %v1926_v20  ;;  %v1909_v28 = vpack.c.bf16 %v1674_v52, %v1674_v52  ;;  %v1910_v6 = vpack.c.bf16 %v1786_v39, %v1786_v39 }
 0x2b5   : > { %v2196_v5 = vpack.c.b16 %v2195_v9, %v2194_v50  ;;  %v1992_v16 = vunpack.c.l.b16 %v1909_v28  ;;  %v1993_v30 = vunpack.c.l.b16 %v1910_v6 }
 0x2b7   : > { %2180 = vmatpush.bf16.msra.mxu2 %v2168_v0  ;;  %2208 = vmatpush.bf16.msrb.mxu3 %v2196_v5  ;;  %v1994_v24 = vpack.c.b16 %v1993_v30, %v1992_v16 }
 0x2c3   : > { %4133 = vmatmul.msk.bf16.vlgmr.msra.gmra.mxu3 %vm1939_vm7, %v1994_v24 }
 0x31e   : > { %v6473_v25 = vpop.f32.mrf.mxu0 }
 0x31f   : > { %v2069_v8 = vsel %vm2050_vm8, %v6473_v25, -inf }
 0x323   : > { %v1955_v56 = vpop.f32.mrf.mxu3 }
 0x324   : > { %v2051_v38 = vsel %vm2050_vm8, %v1955_v56, -inf }
 0x325   : > { %2052 = vmax.xlane.f32.xlu1 %v2051_v38 }
 0x326   : > { %v2047_v34 = vpop.f32.mrf.mxu0 }
 0x327   : > { %v2072_v14 = vsel %vm2050_vm8, %v2047_v34, -inf }
 0x32b   : > { %v1957_v60 = vpop.f32.mrf.mxu3 }
 0x32c   : > { %v2054_v40 = vsel %vm2050_vm8, %v1957_v60, -inf }
 0x32d   : > { %2055 = vmax.xlane.f32.xlu0 %v2054_v40 }
 0x336   : > { %v1985_v43 = vpop.f32.mrf.mxu3 }
 0x337   : > { %v2057_v4 = vsel %vm2050_vm8, %v1985_v43, -inf }
 0x338   : > { %2058 = vmax.xlane.f32.xlu0 %v2057_v4 }
 0x33e   : > { %v1987_v46 = vpop.f32.mrf.mxu3 }
 0x33f   : > { %v2060_v27 = vsel %vm2050_vm8, %v1987_v46, -inf }
 0x340   : > { %2073 = vmax.xlane.f32.xlu0 %v2072_v14 }
 0x346   : > { %v2015_v12 = vpop.f32.mrf.mxu3 }
 0x347   : > { %v2063_v36 = vsel %vm2050_vm8, %v2015_v12, -inf }
 0x348   : > { %2064 = vmax.xlane.f32.xlu2 %v2063_v36 }
 0x34e   : > { %v2017_v51 = vpop.f32.mrf.mxu3 }
 0x34f   : > { %v2066_v49 = vsel %vm2050_vm8, %v2017_v51, -inf }
 0x350   : > { %2061 = vmax.xlane.f32.xlu2 %v2060_v27  ;;  %2067 = vmax.xlane.f32.xlu1 %v2066_v49 }
 0x358   : > { %2070 = vmax.xlane.f32.xlu1 %v2069_v8 }
 0x398   : > { %v2053_v29 = vpop.xlane.xlu1 %2052 }
 0x399   : > { %v2075_v63 = vsub.f32 %v1955_v56, %v2053_v29 }
 0x39b   : > { %v2083_v61 = vmul.f32 1.442695, %v2075_v63 }
 0x39d   : > { %4810 = vpow2.f32 %v2083_v61 }
 0x3a0   : > { %v2056_v3 = vpop.xlane.xlu0 %2055 }
 0x3a1   : > { %v2076_v1 = vsub.f32 %v1957_v60, %v2056_v3 }
 0x3a3   : > { %v4811_v22 = vpop.eup %4810  ;;  %v2085_v35 = vmul.f32 1.442695, %v2076_v1 }
 0x3a4   : > { %v2099_v54 = vsel %vm2050_vm8, %v4811_v22, 0.0  ;;  %v2123_v33 = vpack.c.bf16 %v4811_v22, %v4811_v22 }
 0x3a5   : > { %4812 = vpow2.f32 %v2085_v35  ;;  %2100 = vadd.xlane.f32.xlu0 %v2099_v54 }
 0x3a6   : > { %v2133_v18 = vunpack.c.l.b16 %v2123_v33 }
 0x3ab   : > { %v4813_v11 = vpop.eup %4812  ;;  %v2059_v55 = vpop.xlane.xlu0 %2058 }
 0x3ac   : > { %v2124_v19 = vpack.c.bf16 %v4813_v11, %v4813_v11  ;;  %v2102_v58 = vsel %vm2050_vm8, %v4813_v11, 0.0  ;;  %v2077_v57 = vsub.f32 %v1985_v43, %v2059_v55 }
 0x3ad   : > { %2103 = vadd.xlane.f32.xlu2 %v2102_v58 }
 0x3ae   : > { %v2134_v59 = vunpack.c.l.b16 %v2124_v19  ;;  %v2087_v53 = vmul.f32 1.442695, %v2077_v57 }
 0x3b0   : > { %v2135_v26 = vpack.c.b16 %v2134_v59, %v2133_v18 }
 0x3b2   : > { %4135 = vmatmul.msk.bf16.vlgmr.msrb.gmra.mxu2 %vm2050_vm8, %v2135_v26 }
 0x3b3   : > { %v2074_v17 = vpop.xlane.xlu0 %2073 }
 0x3b4   : > { %v2082_v2 = vsub.f32 %v2047_v34, %v2074_v17 }
 0x3b6   : > { %v2097_v48 = vmul.f32 1.442695, %v2082_v2 }
 0x3b8   : > { %4814 = vpow2.f32 %v2097_v48 }
 0x3bb   : > { %v2065_v47 = vpop.xlane.xlu2 %2064 }
 0x3bc   : > { %v2079_v10 = vsub.f32 %v2015_v12, %v2065_v47 }
 0x3be   : > { %v4815_v21 = vpop.eup %4814  ;;  %v2091_v23 = vmul.f32 1.442695, %v2079_v10 }
 0x3bf   : > { %v2120_v45 = vsel %vm2050_vm8, %v4815_v21, 0.0  ;;  %v2130_v4 = vpack.c.bf16 %v4815_v21, %v4815_v21 }
 0x3c0   : > { %4816 = vpow2.f32 %v2091_v23  ;;  %2121 = vadd.xlane.f32.xlu0 %v2120_v45 }
 0x3c1   : > { %4818 = vpow2.f32 %v2087_v53  ;;  %v2218_v14 = vunpack.c.l.b16 %v2130_v4 }
 0x3c3   : > { %v2062_v31 = vpop.xlane.xlu2 %2061  ;;  %v2068_v62 = vpop.xlane.xlu1 %2067 }
 0x3c4   : > { %v2078_v0 = vsub.f32 %v1987_v46, %v2062_v31  ;;  %v2080_v42 = vsub.f32 %v2017_v51, %v2068_v62 }
 0x3c6   : > { %v4817_v44 = vpop.eup %4816  ;;  %v2089_v7 = vmul.f32 1.442695, %v2078_v0  ;;  %v2093_v32 = vmul.f32 1.442695, %v2080_v42 }
 0x3c7   : > { %v2111_v20 = vsel %vm2050_vm8, %v4817_v44, 0.0  ;;  %v4819_v41 = vpop.eup %4818  ;;  %v2127_v52 = vpack.c.bf16 %v4817_v44, %v4817_v44 }
 0x3c8   : > { %4820 = vpow2.f32 %v2089_v7  ;;  %2112 = vadd.xlane.f32.xlu2 %v2111_v20  ;;  %v2125_v9 = vpack.c.bf16 %v4819_v41, %v4819_v41  ;;  %v2105_v16 = vsel %vm2050_vm8, %v4819_v41, 0.0 }
 0x3c9   : > { %4822 = vpow2.f32 %v2093_v32  ;;  %v2189_v38 = vunpack.c.l.b16 %v2127_v52 }
 0x3ca   : > { %v2161_v24 = vunpack.c.l.b16 %v2125_v9 }
 0x3cb   : > { %v2071_v13 = vpop.xlane.xlu1 %2070 }
 0x3cc   : > { %v2081_v50 = vsub.f32 %v6473_v25, %v2071_v13 }
 0x3ce   : > { %v4821_v5 = vpop.eup %4820  ;;  %v2095_v39 = vmul.f32 1.442695, %v2081_v50 }
 0x3cf   : > { %v4823_v28 = vpop.eup %4822  ;;  %v2126_v6 = vpack.c.bf16 %v4821_v5, %v4821_v5  ;;  %v2108_v27 = vsel %vm2050_vm8, %v4821_v5, 0.0 }
 0x3d0   : > { %v2128_v30 = vpack.c.bf16 %v4823_v28, %v4823_v28  ;;  %4824 = vpow2.f32 %v2095_v39  ;;  %2106 = vadd.xlane.f32.xlu2 %v2105_v16  ;;  %v2114_v51 = vsel %vm2050_vm8, %v4823_v28, 0.0 }
 0x3d1   : > { %v2162_v56 = vunpack.c.l.b16 %v2126_v6 }
 0x3d2   : > { %v2190_v60 = vunpack.c.l.b16 %v2128_v30 }
 0x3d3   : > { %v2163_v40 = vpack.c.b16 %v2162_v56, %v2161_v24 }
 0x3d4   : > { %v2191_v43 = vpack.c.b16 %v2190_v60, %v2189_v38 }
 0x3d5   : > { %4136 = vmatmul.msk.bf16.vlgmr.msra.gmra.mxu2 %vm2050_vm8, %v2163_v40 }
 0x3d6   : > { %v4825_v25 = vpop.eup %4824  ;;  %4137 = vmatmul.msk.bf16.vlgmr.msrb.gmra.mxu3 %vm2050_vm8, %v2191_v43 }
 0x3d7   : > { %v2129_v34 = vpack.c.bf16 %v4825_v25, %v4825_v25  ;;  %v2117_v46 = vsel %vm2050_vm8, %v4825_v25, 0.0 }
 0x3d8   : > { %2118 = vadd.xlane.f32.xlu1 %v2117_v46 }
 0x3d9   : > { %v2217_v12 = vunpack.c.l.b16 %v2129_v34 }
 0x3db   : > { %v2219_v36 = vpack.c.b16 %v2218_v14, %v2217_v12 }
 0x3dd   : > { %4138 = vmatmul.msk.bf16.vlgmr.msra.gmra.mxu0 %vm2050_vm8, %v2219_v36 }
 0x3e0   : > { %2115 = vadd.xlane.f32.xlu1 %v2114_v51 }
 0x3e8   : > { %2109 = vadd.xlane.f32.xlu1 %v2108_v27 }
 0x418   : > { %v2101_v61 = vpop.xlane.xlu0 %2100 }
 0x419   : > { %4826 = vrcp.f32 %v2101_v61 }
 0x41f   : > { %v4827_v35 = vpop.eup %4826 }
 0x420   : > { %v2104_v49 = vpop.xlane.xlu2 %2103 }
 0x433   : > { %v2122_v33 = vpop.xlane.xlu0 %2121 }
 0x435   : > { %v2154_v29 = vpop.f32.mrf.mxu2 }
 0x436   : > { %v2251_v54 = vmul.f32 %v4827_v35, %v2154_v29 }
 0x438   : > { %v2261_v26 = vrot.slane %v2251_v54, 4 }
 0x43b   : > { %v2113_v8 = vpop.xlane.xlu2 %2112 }
 0x43d   : > { %v2156_v1 = vpop.f32.mrf.mxu2 }
 0x443   : > { %v2107_v3 = vpop.xlane.xlu2 %2106 }
 0x444   : > { %4828 = vrcp.f32 %v2107_v3 }
 0x445   : > { %4830 = vrcp.f32 %v2113_v8 }
 0x44a   : > { %v4829_v11 = vpop.eup %4828 }
 0x44b   : > { %v2119_v63 = vpop.xlane.xlu1 %2118  ;;  %v4831_v19 = vpop.eup %4830 }
 0x44c   : > { %4832 = vrcp.f32 %v2119_v63 }
 0x44d   : > { %4834 = vrcp.f32 %v2104_v49 }
 0x44e   : > { %4836 = vrcp.f32 %v2122_v33 }
 0x452   : > { %v4833_v59 = vpop.eup %4832 }
 0x453   : > { %v2116_v22 = vpop.xlane.xlu1 %2115  ;;  %v4835_v10 = vpop.eup %4834 }
 0x454   : > { %4838 = vrcp.f32 %v2116_v22  ;;  %v2252_v45 = vmul.f32 %v4835_v10, %v2156_v1  ;;  %v4837_v20 = vpop.eup %4836 }
 0x456   : > { %v2317_v9 = vrot.slane %v2252_v45, 4 }
 0x458   : > { %v2182_v55 = vpop.f32.mrf.mxu2 }
 0x459   : > { %v2253_v58 = vmul.f32 %v4829_v11, %v2182_v55  ;;  %v2210_v18 = vpop.f32.mrf.mxu3 }
 0x45a   : > { %v2255_v17 = vmul.f32 %v4831_v19, %v2210_v18  ;;  %v2238_v2 = vpop.f32.mrf.mxu0  ;;  %v4839_v50 = vpop.eup %4838 }
 0x45b   : > { %v2273_v48 = vrot.slane %v2253_v58, 4  ;;  %v2257_v47 = vmul.f32 %v4833_v59, %v2238_v2  ;;  %v2110_v57 = vpop.xlane.xlu1 %2109 }
 0x45c   : > { %v2259_v21 = vrot.slane %v2255_v17, 4  ;;  %v2262_v23 = vsel %vm1237_vm6, %v2255_v17, %v2261_v26  ;;  %4840 = vrcp.f32 %v2110_v57 }
 0x45d   : > { %v2270_v53 = vperm.slane %v2262_v23, %v5921_v15  ;;  %v2271_v31 = vrot.slane %v2257_v47, 4  ;;  %v2274_v62 = vsel %vm1237_vm6, %v2257_v47, %v2273_v48 }
 0x45e   : > { %v2260_v0 = vsel %vm1237_vm6, %v2259_v21, %v2251_v54  ;;  %v2282_v42 = vperm.slane %v2274_v62, %v5921_v15 }
 0x45f   : > { %v2266_v44 = vperm.slane %v2260_v0, %v5921_v15  ;;  %v2297_v7 = vrot.slane %v2270_v53, 4  ;;  %v2272_v32 = vsel %vm1237_vm6, %v2271_v31, %v2253_v58 }
 0x460   : > { %v2278_v41 = vperm.slane %v2272_v32, %v5921_v15  ;;  %v2295_v13 = vrot.slane %v2282_v42, 4  ;;  %v2184_v24 = vpop.f32.mrf.mxu2 }
 0x461   : > { %v2285_v5 = vrot.slane %v2266_v44, 4  ;;  %v2298_v52 = vsel %vm1237_vm6, %v2282_v42, %v2297_v7  ;;  %v2212_v39 = vpop.f32.mrf.mxu3 }
 0x462   : > { %v4841_v28 = vpop.eup %4840  ;;  %v2283_v6 = vrot.slane %v2278_v41, 4  ;;  %v2296_v16 = vsel %vm1237_vm6, %v2295_v13, %v2270_v53  ;;  %v2306_v30 = vperm.slane %v2298_v52, %v5937_v37  ;;  %v2256_v56 = vmul.f32 %v4839_v50, %v2212_v39  ;;  %v2240_v38 = vpop.f32.mrf.mxu0 }
 0x463   : > { %v2286_v60 = vsel %vm1237_vm6, %v2278_v41, %v2285_v5  ;;  %v2302_v40 = vperm.slane %v2296_v16, %v5937_v37  ;;  %v2254_v43 = vmul.f32 %v4841_v28, %v2184_v24  ;;  %v2258_v4 = vmul.f32 %v4837_v20, %v2240_v38 }
 0x464   : > { %v2284_v25 = vsel %vm1237_vm6, %v2283_v6, %v2266_v44  ;;  %v2294_v34 = vperm.slane %v2286_v60, %v5937_v37  ;;  %v2313_v46 = vrot.slane %v2306_v30, 4  ;;  %v2315_v14 = vrot.slane %v2256_v56, 4 }
 0x465   : > { %v2290_v12 = vperm.slane %v2284_v25, %v5937_v37  ;;  %v2311_v36 = vrot.slane %v2302_v40, 4  ;;  %v2329_v51 = vrot.slane %v2254_v43, 4  ;;  %v2318_v27 = vsel %vm1237_vm6, %v2256_v56, %v2317_v9 }
 0x466   : > { %v2309_v49 = vrot.slane %v2294_v34, 4  ;;  %v2314_v8 = vsel %vm1237_vm6, 0.0, %v2313_v46  ;;  %v2382_v29 = vsel %vm1237_vm6, %v2313_v46, %v2302_v40  ;;  %v2316_v63 = vsel %vm1237_vm6, %v2315_v14, %v2252_v45 }
 0x467   : > { %v2307_v61 = vrot.slane %v2290_v12, 4  ;;  %v2312_v3 = vsel %vm1237_vm6, 0.0, %v2311_v36  ;;  %v2387_v1 = vrot.slane %v2314_v8, 4  ;;  %v2322_v22 = vperm.slane %v2316_v63, %v5921_v15 }
 0x468   : > { %v2310_v35 = vsel %vm1237_vm6, 0.0, %v2309_v49  ;;  %v2371_v54 = vsel %vm1237_vm6, %v2309_v49, %v2290_v12  ;;  %v2326_v33 = vperm.slane %v2318_v27, %v5921_v15  ;;  %v2327_v11 = vrot.slane %v2258_v4, 4 }
 0x469   : > { %v2308_v55 = vsel %vm1237_vm6, 0.0, %v2307_v61  ;;  %v2376_v19 = vrot.slane %v2310_v35, 4  ;;  %v2341_v58 = vrot.slane %v2322_v22, 4  ;;  %v2330_v18 = vsel %vm1237_vm6, %v2258_v4, %v2329_v51 }
 0x46a   : > { %v2353_v59 = vrot.slane %v2326_v33, 4  ;;  %v2328_v26 = vsel %vm1237_vm6, %v2327_v11, %v2254_v43  ;;  %v2338_v17 = vperm.slane %v2330_v18, %v5921_v15  ;;  %v2375_v2 = vperm.slane %v2371_v54, %v5921_v15 }
 0x46b   : > { %v2334_v48 = vperm.slane %v2328_v26, %v5921_v15  ;;  %v2377_v47 = vsel %vm1237_vm6, %v2376_v19, %v2308_v55  ;;  %v2386_v57 = vperm.slane %v2382_v29, %v5921_v15  ;;  %v2388_v10 = vsel %vm1237_vm6, %v2387_v1, %v2312_v3 }
 0x46c   : > { %v2351_v21 = vrot.slane %v2338_v17, 4  ;;  %v2354_v23 = vsel %vm1237_vm6, %v2338_v17, %v2353_v59  ;;  %v2381_v45 = vperm.slane %v2377_v47, %v5921_v15  ;;  %v2392_v53 = vperm.slane %v2388_v10, %v5921_v15 }
 0x46d   : > { %v2339_v31 = vrot.slane %v2334_v48, 4  ;;  %v2342_v62 = vsel %vm1237_vm6, %v2334_v48, %v2341_v58  ;;  %v2362_v0 = vperm.slane %v2354_v23, %v5937_v37  ;;  %v2395_v42 = vrot.slane %v2375_v2, 4 }
 0x46e   : > { %v2350_v44 = vperm.slane %v2342_v62, %v5937_v37  ;;  %v2352_v7 = vsel %vm1237_vm6, %v2351_v21, %v2326_v33  ;;  %v2407_v32 = vrot.slane %v2386_v57, 4  ;;  %v2393_v52 = vrot.slane %v2381_v45, 4 }
 0x46f   : > { %v2340_v20 = vsel %vm1237_vm6, %v2339_v31, %v2322_v22  ;;  %v2358_v41 = vperm.slane %v2352_v7, %v5937_v37  ;;  %v2369_v13 = vrot.slane %v2362_v0, 4  ;;  %v2396_v5 = vsel %vm1237_vm6, %v2381_v45, %v2395_v42  ;;  %v4480_v7 = vld [vmem:[%s5772_s28 + $0x38] sm:$0xff] }
 0x470   : > { %v2346_v50 = vperm.slane %v2340_v20, %v5937_v37  ;;  %v2365_v9 = vrot.slane %v2350_v44, 4  ;;  %v2408_v16 = vsel %vm1237_vm6, %v2392_v53, %v2407_v32  ;;  %v2404_v43 = vperm.slane %v2396_v5, %v5937_v37  ;;  %2580 = vmatpush.bf16.msrb.mxu1 %v4480_v7  ;;  %v4479_v32 = vld [vmem:[%s5772_s28 + $0x30] sm:$0xff]  ;;  %v4478_v20 = vld [vmem:[%s5772_s28 + $0x28] sm:$0xff]  ;;  %v4473_v5 = vld [vmem:[%s5772_s28] sm:$0xff] }
 0x471   : > { %v2367_v39 = vrot.slane %v2358_v41, 4  ;;  %v2370_v28 = vsel %vm1237_vm6, 0.0, %v2369_v13  ;;  %v2436_v6 = vsel %vm1237_vm6, %v2369_v13, %v2358_v41  ;;  %v2416_v34 = vperm.slane %v2408_v16, %v5937_v37  ;;  %v4477_v41 = vld [vmem:[%s5772_s28 + $0x20] sm:$0xff]  ;;  %v4476_v13 = vld [vmem:[%s5772_s28 + $0x18] sm:$0xff]  ;;  %v4277_v7 = vld [vmem:[%s5786_s8 + $0xc8] sm:$0xf] }
 0x472   : > { %v2363_v30 = vrot.slane %v2346_v50, 4  ;;  %v2366_v24 = vsel %vm1237_vm6, 0.0, %v2365_v9  ;;  %v2425_v56 = vsel %vm1237_vm6, %v2365_v9, %v2346_v50  ;;  %v2441_v38 = vrot.slane %v2370_v28, 4  ;;  %v4475_v50 = vld [vmem:[%s5772_s28 + $0x10] sm:$0xff]  ;;  %v4474_v9 = vld [vmem:[%s5772_s28 + $0x8] sm:$0xff]  ;;  %s7319_s28 = scalar_lea.vmem [#allocation12], %s5756_s27 }
 0x473   : > { %v2368_v60 = vsel %vm1237_vm6, 0.0, %v2367_v39  ;;  %v2430_v40 = vrot.slane %v2366_v24, 4  ;;  %v2429_v4 = vperm.slane %v2425_v56, %v5921_v15  ;;  %v2440_v46 = vperm.slane %v2436_v6, %v5921_v15 }
 0x474   : > { %v2364_v25 = vsel %vm1237_vm6, 0.0, %v2363_v30  ;;  %v2442_v14 = vsel %vm1237_vm6, %v2441_v38, %v2368_v60  ;;  %v2394_v8 = vsel %vm1237_vm6, %v2393_v52, %v2375_v2  ;;  %v2423_v29 = vrot.slane %v2404_v43, 4  ;;  %2581 = vmatpush.bf16.msrb.mxu1 %v4479_v32  ;;  %v4508_v32 = vld [vmem:[%s5786_s8 + $0xd4] sm:$0xf0] }
 0x475   : > { %v2431_v12 = vsel %vm1237_vm6, %v2430_v40, %v2364_v25  ;;  %v2446_v36 = vperm.slane %v2442_v14, %v5921_v15  ;;  %v2449_v51 = vrot.slane %v2429_v4, 4  ;;  %v2461_v49 = vrot.slane %v2440_v46, 4  ;;  %v4802_v14 = vld [vmem:[%s7319_s28] ss:$0 sm:$0xff] }
 0x476   : > { %v2435_v27 = vperm.slane %v2431_v12, %v5921_v15  ;;  %v2400_v63 = vperm.slane %v2394_v8, %v5937_v37  ;;  %v2405_v61 = vrot.slane %v2392_v53, 4  ;;  %v2421_v35 = vrot.slane %v2416_v34, 4 }
 0x477   : > { %v2459_v3 = vrot.slane %v2446_v36, 4  ;;  %v2462_v22 = vsel %vm1237_vm6, %v2446_v36, %v2461_v49  ;;  %v2424_v48 = vsel %vm1237_vm6, %v2416_v34, %v2423_v29 }
 0x478   : > { %v2450_v1 = vsel %vm1237_vm6, %v2435_v27, %v2449_v51  ;;  %v2447_v54 = vrot.slane %v2435_v27, 4  ;;  %v2470_v11 = vperm.slane %v2462_v22, %v5937_v37  ;;  %v2406_v15 = vsel %vm1237_vm6, %v2405_v61, %v2386_v57  ;;  %2582 = vmatpush.bf16.msrb.mxu1 %v4478_v20  ;;  %v4862_v51 = vld [vmem:[%s5812_s21] sm:$0xff]  ;;  %v4506_v20 = vld [vmem:[%s5786_s8 + $0xcc] sm:$0xf] }
 0x479   : > { %v2458_v33 = vperm.slane %v2450_v1, %v5937_v37  ;;  %v2412_v55 = vperm.slane %v2406_v15, %v5937_v37  ;;  %v2419_v19 = vrot.slane %v2400_v63, 4  ;;  %v2460_v18 = vsel %vm1237_vm6, %v2459_v3, %v2440_v46  ;;  %v4285_v15 = vld [vmem:[%s5786_s8 + $0xe0] sm:$0xf] }
 0x47a   : > { %v2448_v58 = vsel %vm1237_vm6, %v2447_v54, %v2429_v4  ;;  %v2475_v26 = vrot.slane %v2470_v11, 4  ;;  %v2466_v2 = vperm.slane %v2460_v18, %v5937_v37  ;;  %v2422_v47 = vsel %vm1237_vm6, %v2421_v35, %v2404_v43  ;;  %v4287_v18 = vld [vmem:[%s5786_s8 + $0xf0] sm:$0xf0] }
 0x47b   : > { %v2477_v59 = vrot.slane %v2458_v33, 4  ;;  %v2454_v17 = vperm.slane %v2448_v58, %v5937_v37  ;;  %v2417_v10 = vrot.slane %v2412_v55, 4  ;;  %v2420_v37 = vsel %vm1237_vm6, %v2412_v55, %v2419_v19  ;;  %v4511_v55 = vld [vmem:[%s5786_s8 + $0xec] sm:$0xf0]  ;;  %v4509_v19 = vld [vmem:[%s5786_s8 + $0xe4] sm:$0xf] }
 0x47c   : > { %v2476_v21 = vsel %vm1237_vm6, %v2475_v26, %v2458_v33  ;;  %v2471_v23 = vrot.slane %v2466_v2, 4  ;;  %2583 = vmatpush.bf16.msrb.mxu1 %v4477_v41  ;;  %v4286_v58 = vor.u32 %v4511_v55, %v4285_v15  ;;  %v4512_v26 = vld [vmem:[%s5786_s8 + $0xf4] sm:$0xf0]  ;;  %v4493_v55 = vld [vmem:[%s5786_s8 + $0x64] sm:$0xf] }
 0x47d   : > { %v2478_v57 = vsel %vm1237_vm6, %v2470_v11, %v2477_v59  ;;  %v2473_v45 = vrot.slane %v2454_v17, 4  ;;  %v4790_v31 = vpack.i.bf16 %v2476_v21, %v2422_v47  ;;  %v2418_v62 = vsel %vm1237_vm6, %v2417_v10, %v2400_v63  ;;  %v4863_v63 = vld [vmem:[%s5812_s21 + $0x8] sm:$0xff] }
 0x47e   : > { %v4795_v53 = vpack.i.bf16 %v2478_v57, %v2424_v48  ;;  %v2472_v42 = vsel %vm1237_vm6, %v2471_v23, %v2454_v17  ;;  %v4293_v59 = vld [vmem:[%s5786_s8 + $0xe8] sm:$0xf]  ;;  %v4510_v47 = vld [vmem:[%s5786_s8 + $0xec] sm:$0xf]  ;;  %v4295_v10 = vld [vmem:[%s5786_s8 + $0xf8] sm:$0xf0]  ;;  %2857 = vmatpush.bf16.msrb.mxu2 %v4286_v58 }
 0x47f   : > { %v2474_v0 = vsel %vm1237_vm6, %v2466_v2, %v2473_v45  ;;  %4791 = vrot.lane.b32.xlu2 %v4790_v31, %s5379_s9  ;;  %v4290_v2 = vor.u32 %v4509_v19, %v4287_v18  ;;  %v4294_v48 = vor.u32 %v4512_v26, %v4293_v59  ;;  %v4298_v21 = vor.u32 %v4510_v47, %v4295_v10  ;;  %v4269_v23 = vld [vmem:[%s5786_s8 + $0xc0] sm:$0xf]  ;;  %v4507_v45 = vld [vmem:[%s5786_s8 + $0xcc] sm:$0xf0]  ;;  %v4223_v19 = vld [vmem:[%s5786_s8 + $0x70] sm:$0xf0] }
 0x480   : > { %4796 = vrot.lane.b32.xlu1 %v4795_v53, %s5378_s7  ;;  %v4785_v44 = vpack.i.bf16 %v2474_v0, %v2420_v37  ;;  %2584 = vmatpush.bf16.msrb.mxu1 %v4476_v13  ;;  %v4505_v53 = vld [vmem:[%s5786_s8 + $0xc4] sm:$0xf]  ;;  %v4270_v37 = vor.u32 %v4507_v45, %v4269_v23  ;;  %v4271_v0 = vld [vmem:[%s5786_s8 + $0xd0] sm:$0xf0]  ;;  %v4279_v13 = vld [vmem:[%s5786_s8 + $0xd8] sm:$0xf0] }
 0x481   : > { %2871 = vmatpush.bf16.msra.mxu3 %v4290_v2  ;;  %2885 = vmatpush.bf16.msrb.mxu0 %v4294_v48  ;;  %v4229_v58 = vld [vmem:[%s5786_s8 + $0x68] sm:$0xf]  ;;  %v4496_v18 = vld [vmem:[%s5786_s8 + $0x74] sm:$0xf0]  ;;  %v4231_v2 = vld [vmem:[%s5786_s8 + $0x78] sm:$0xf0]  ;;  %v4226_v48 = vor.u32 %v4493_v55, %v4223_v19 }
 0x482   : > { %4786 = vrot.lane.b32.xlu0 %v4785_v44, %s5380_s23  ;;  %v4274_v44 = vor.u32 %v4505_v53, %v4271_v0  ;;  %2858 = vmatpush.bf16.msrb.mxu2 %v4270_v37  ;;  %v4205_v47 = vld [vmem:[%s5786_s8 + $0x40] sm:$0xf]  ;;  %v4491_v10 = vld [vmem:[%s5786_s8 + $0x4c] sm:$0xf0]  ;;  %v4230_v23 = vor.u32 %v4496_v18, %v4229_v58  ;;  %v4207_v53 = vld [vmem:[%s5786_s8 + $0x50] sm:$0xf0] }
 0x483   : > { %v4213_v37 = vld [vmem:[%s5786_s8 + $0x48] sm:$0xf]  ;;  %v4492_v0 = vld [vmem:[%s5786_s8 + $0x54] sm:$0xf0] }
 0x484   : > { %2585 = vmatpush.bf16.msrb.mxu1 %v4475_v50  ;;  %v4253_v50 = vld [vmem:[%s5786_s8 + $0xa0] sm:$0xf] }
 0x485   : > { %2872 = vmatpush.bf16.msra.mxu3 %v4274_v44  ;;  %v4215_v44 = vld [vmem:[%s5786_s8 + $0x58] sm:$0xf0] }
 0x488   : > { %2586 = vmatpush.bf16.msrb.mxu1 %v4474_v9  ;;  %v4503_v9 = vld [vmem:[%s5786_s8 + $0xac] sm:$0xf0] }
 0x48c   : > { %2587 = vmatpush.bf16.msrb.mxu1 %v4473_v5 }
 0x490   : > { %2899 = vmatpush.bf16.msra.mxu1 %v4298_v21 }
 0x4d9   : > { %v4792_v52 = vpop.permute.xlu2 %4791 }
 0x4da   : > { %v4794_v30 = vunpack.i.h.bf16 %v4792_v52  ;;  %v4793_v24 = vunpack.i.l.bf16 %v4792_v52  ;;  %v4278_v52 = vor.u32 %v4508_v32, %v4277_v7  ;;  %v4206_v32 = vor.u32 %v4491_v10, %v4205_v47 }
 0x4dc   : > { %2886 = vmatpush.bf16.msrb.mxu0 %v4278_v52  ;;  %v4485_v52 = vld [vmem:[%s5786_s8 + $0x24] sm:$0xf] }
 0x4f2   : > { %v4797_v39 = vpop.permute.xlu1 %4796 }
 0x4f3   : > { %v4799_v56 = vunpack.i.h.bf16 %v4797_v39  ;;  %v4798_v38 = vunpack.i.l.bf16 %v4797_v39  ;;  %v4282_v39 = vor.u32 %v4506_v20, %v4279_v13  ;;  %v4487_v13 = vld [vmem:[%s5786_s8 + $0x2c] sm:$0xf0] }
 0x4f4   : > { %v4787_v28 = vpop.permute.xlu0 %4786 }
 0x4f5   : > { %v4789_v6 = vunpack.i.h.bf16 %v4787_v28  ;;  %v4788_v16 = vunpack.i.l.bf16 %v4787_v28  ;;  %v4254_v28 = vor.u32 %v4503_v9, %v4253_v50  ;;  %2900 = vmatpush.bf16.msra.mxu1 %v4282_v39  ;;  %v4214_v9 = vor.u32 %v4492_v0, %v4213_v37  ;;  %v4191_v39 = vld [vmem:[%s5786_s8 + $0x30] sm:$0xf0] }
 0x4f7   : > { %v2503_v60 = vsel %vm1939_vm7, %v2418_v62, %v4788_v16  ;;  %v2504_v40 = vsel %vm1939_vm7, %v2472_v42, %v4789_v6  ;;  %v4501_v6 = vld [vmem:[%s5786_s8 + $0xa4] sm:$0xf]  ;;  %v4255_v16 = vld [vmem:[%s5786_s8 + $0xb0] sm:$0xf0]  ;;  %2859 = vmatpush.bf16.msrb.mxu2 %v4254_v28  ;;  %v4197_v28 = vld [vmem:[%s5786_s8 + $0x28] sm:$0xf] }
 0x4f8   : > { %v2506_v43 = vsel %vm2505_vm9, %v2503_v60, %v4793_v24  ;;  %v2507_v4 = vsel %vm2505_vm9, %v2504_v40, %v4794_v30  ;;  %v4258_v30 = vor.u32 %v4501_v6, %v4255_v16  ;;  %v4261_v24 = vld [vmem:[%s5786_s8 + $0xa8] sm:$0xf] }
 0x4f9   : > { %v2509_v25 = vsel %vm2508_vm10, %v2506_v43, %v4798_v38  ;;  %v2510_v34 = vsel %vm2508_vm10, %v2507_v4, %v4799_v56  ;;  %v4504_v56 = vld [vmem:[%s5786_s8 + $0xb4] sm:$0xf0]  ;;  %v4502_v38 = vld [vmem:[%s5786_s8 + $0xac] sm:$0xf]  ;;  %v4263_v43 = vld [vmem:[%s5786_s8 + $0xb8] sm:$0xf0] }
 0x4fa   : > { %v2511_v46 = vpack.c.bf16 %v2510_v34, %v2509_v25  ;;  %v4262_v40 = vor.u32 %v4504_v56, %v4261_v24  ;;  %v4237_v4 = vld [vmem:[%s5786_s8 + $0x80] sm:$0xf]  ;;  %v4499_v25 = vld [vmem:[%s5786_s8 + $0x8c] sm:$0xf0]  ;;  %v4266_v34 = vor.u32 %v4502_v38, %v4263_v43  ;;  %2873 = vmatpush.bf16.msra.mxu3 %v4258_v30  ;;  %v4488_v30 = vld [vmem:[%s5786_s8 + $0x34] sm:$0xf0] }
 0x4fb   : > { %v4486_v24 = vld [vmem:[%s5786_s8 + $0x2c] sm:$0xf]  ;;  %v4199_v56 = vld [vmem:[%s5786_s8 + $0x38] sm:$0xf0]  ;;  %v4173_v43 = vld [vmem:[%s5786_s8] sm:$0xf] }
 0x4fc   : > { %2588 = vmatmul.bf16.vlgmr.msrb.gmra.mxu1 %v2511_v46  ;;  %v4497_v46 = vld [vmem:[%s5786_s8 + $0x84] sm:$0xf]  ;;  %2887 = vmatpush.bf16.msrb.mxu0 %v4262_v40 }
 0x4fd   : > { %2901 = vmatpush.bf16.msra.mxu1 %v4266_v34  ;;  %v4198_v34 = vor.u32 %v4488_v30, %v4197_v28 }
 0x579   : > { %v2589_v12 = vpop.f32.mrf.mxu1 }
 0x57a   : > { %v2590_v36 = vadd.f32 %v4802_v14, %v2589_v12  ;;  %v4245_v12 = vld [vmem:[%s5786_s8 + $0x88] sm:$0xf] }
 0x57c   : > { %v6591_v27 = vadd.f32 %v4862_v51, %v2590_v36  ;;  %v4238_v51 = vor.u32 %v4499_v25, %v4237_v4  ;;  %v4483_v4 = vld [vmem:[%s5786_s8 + $0xc] sm:$0xf0]  ;;  %v4481_v25 = vld [vmem:[%s5786_s8 + $0x4] sm:$0xf] }
 0x57e   : > { %2598 = vadd.xlane.f32.xlu0 %v6591_v27  ;;  %v2604_v49 = vmul.f32 %v6591_v27, %v6591_v27  ;;  %2860 = vmatpush.bf16.msrb.mxu2 %v4238_v51 }
 0x580   : > { %2606 = vadd.xlane.f32.xlu1 %v2604_v49  ;;  %v4500_v49 = vld [vmem:[%s5786_s8 + $0x94] sm:$0xf0] }
 0x581   : > { %v2591_v8 = vpop.f32.mrf.mxu1 }
 0x582   : > { %v2592_v29 = vadd.f32 %v4802_v14, %v2591_v8  ;;  %v4239_v14 = vld [vmem:[%s5786_s8 + $0x90] sm:$0xf0]  ;;  %v4498_v8 = vld [vmem:[%s5786_s8 + $0x8c] sm:$0xf] }
 0x584   : > { %v6597_v61 = vadd.f32 %v4863_v63, %v2592_v29  ;;  %v4242_v63 = vor.u32 %v4497_v46, %v4239_v14  ;;  %v4202_v46 = vor.u32 %v4486_v24, %v4199_v56  ;;  %v4175_v14 = vld [vmem:[%s5786_s8 + $0x10] sm:$0xf0] }
 0x586   : > { %2600 = vadd.xlane.f32.xlu2 %v6597_v61  ;;  %v2605_v3 = vmul.f32 %v6597_v61, %v6597_v61  ;;  %2874 = vmatpush.bf16.msra.mxu3 %v4242_v63  ;;  %v4183_v63 = vld [vmem:[%s5786_s8 + $0x18] sm:$0xf0] }
 0x588   : > { %2608 = vadd.xlane.f32.xlu0 %v2605_v3  ;;  %v4247_v3 = vld [vmem:[%s5786_s8 + $0x98] sm:$0xf0] }
 0x589   : > { %v4250_v15 = vor.u32 %v4498_v8, %v4247_v3  ;;  %v4482_v8 = vld [vmem:[%s5786_s8 + $0xc] sm:$0xf] }
 0x58a   : > { %2875 = vmatpush.bf16.msra.mxu3 %v4226_v48  ;;  %v4186_v55 = vor.u32 %v4482_v8, %v4183_v63 }
 0x58b   : > { %2902 = vmatpush.bf16.msra.mxu1 %v4250_v15 }
 0x5f1   : > { %v2599_v1 = vpop.xlane.xlu0 %2598 }
 0x5f2   : > { %v6602_v22 = vmul.f32 0.0078125, %v2599_v1  ;;  %v4221_v1 = vld [vmem:[%s5786_s8 + $0x60] sm:$0xf] }
 0x5f3   : > { %v2607_v35 = vpop.xlane.xlu1 %2606 }
 0x5f4   : > { %v2612_v54 = vmul.f32 %v6602_v22, %v6602_v22  ;;  %v2610_v33 = vmul.f32 0.0078125, %v2607_v35  ;;  %v4495_v35 = vld [vmem:[%s5786_s8 + $0x6c] sm:$0xf0]  ;;  %v2618_v3 = vsub.f32 %v6591_v27, %v6602_v22 }
 0x5f5   : > { %v4222_v26 = vor.u32 %v4495_v35, %v4221_v1  ;;  %v4174_v1 = vor.u32 %v4483_v4, %v4173_v43 }
 0x5f6   : > { %v2614_v11 = vsub.f32 %v2610_v33, %v2612_v54 }
 0x5f7   : > { %2861 = vmatpush.bf16.msrb.mxu2 %v4222_v26 }
 0x5f8   : > { %v2616_v17 = vmax.f32 %v2614_v11, 0.0  ;;  %v4246_v11 = vor.u32 %v4500_v49, %v4245_v12  ;;  %v4181_v12 = vld [vmem:[%s5786_s8 + $0x8] sm:$0xf] }
 0x5f9   : > { %v2601_v57 = vpop.xlane.xlu2 %2600 }
 0x5fa   : > { %v6617_v31 = vadd.f32 1e-05, %v2616_v17  ;;  %v6619_v62 = vmul.f32 0.0078125, %v2601_v57  ;;  %v4494_v17 = vld [vmem:[%s5786_s8 + $0x6c] sm:$0xf]  ;;  %2888 = vmatpush.bf16.msrb.mxu0 %v4246_v11 }
 0x5fb   : > { %v2609_v42 = vpop.xlane.xlu0 %2608  ;;  %v4489_v57 = vld [vmem:[%s5786_s8 + $0x44] sm:$0xf]  ;;  %v4234_v45 = vor.u32 %v4494_v17, %v4231_v2  ;;  %2862 = vmatpush.bf16.msrb.mxu2 %v4206_v32 }
 0x5fc   : > { %4842 = vrsqrt.f32 %v6617_v31  ;;  %v2613_v41 = vmul.f32 %v6619_v62, %v6619_v62  ;;  %v2611_v5 = vmul.f32 0.0078125, %v2609_v42  ;;  %v4490_v42 = vld [vmem:[%s5786_s8 + $0x4c] sm:$0xf]  ;;  %v4210_v20 = vor.u32 %v4489_v57, %v4207_v53 }
 0x5fd   : > { %2903 = vmatpush.bf16.msra.mxu1 %v4234_v45  ;;  %vm2628_vm12 = vweird.f32 %v6617_v31  ;;  %v2619_v22 = vsub.f32 %v6597_v61, %v6619_v62  ;;  %v6708_v62 = vld [vmem:[%s5810_s12] sm:$0xf] }
 0x5fe   : > { %v2615_v60 = vsub.f32 %v2611_v5, %v2613_v41  ;;  %v4189_v41 = vld [vmem:[%s5786_s8 + $0x20] sm:$0xf]  ;;  %2889 = vmatpush.bf16.msrb.mxu0 %v4230_v23  ;;  %v4218_v5 = vor.u32 %v4490_v42, %v4215_v44  ;;  %2876 = vmatpush.bf16.msra.mxu3 %v4210_v20  ;;  %v2692_v10 = vperm.slane %v6708_v62, 3  ;;  %v2689_v53 = vperm.slane %v6708_v62, 0 }
 0x5ff   : > { %v2690_v42 = vperm.slane %v6708_v62, 1 }
 0x600   : > { %v2617_v36 = vmax.f32 %v2615_v60, 0.0  ;;  %v4190_v60 = vor.u32 %v4487_v13, %v4189_v41 }
 0x601   : > { %2904 = vmatpush.bf16.msra.mxu1 %v4218_v5 }
 0x602   : > { %v6644_v29 = vpop.eup %4842  ;;  %v6651_v33 = vadd.f32 1e-05, %v2617_v36  ;;  %2890 = vmatpush.bf16.msrb.mxu0 %v4214_v9  ;;  %v4484_v36 = vld [vmem:[%s5786_s8 + $0x14] sm:$0xf0]  ;;  %2863 = vmatpush.bf16.msrb.mxu2 %v4190_v60  ;;  %s7323_s8 = scalar_lea.vmem [#allocation15], %s5756_s27 }
 0x603   : > { %v2623_v54 = vmul.f32 %v6644_v29, %v6617_v31  ;;  %vm2629_vm11 = vweird.f32 %v6644_v29  ;;  %v4194_v31 = vor.u32 %v4485_v52, %v4191_v39  ;;  %v4182_v15 = vor.u32 %v4484_v36, %v4181_v12  ;;  %v4804_v26 = vld [vmem:[%s7323_s8] ss:$0 sm:$0xff] }
 0x604   : > { %4844 = vrsqrt.f32 %v6651_v33  ;;  %vm6683_vm13 = vmor %vm2628_vm12, %vm2629_vm11  ;;  %vm2638_vm15 = vweird.f32 %v6651_v33 }
 0x605   : > { %v2624_v59 = vmul.f32 %v6644_v29, %v2623_v54  ;;  %2877 = vmatpush.bf16.msra.mxu3 %v4194_v31  ;;  %v4178_v54 = vor.u32 %v4481_v25, %v4175_v14  ;;  %2905 = vmatpush.bf16.msra.mxu1 %v4202_v46 }
 0x606   : > { %2891 = vmatpush.bf16.msrb.mxu0 %v4198_v34  ;;  %2864 = vmatpush.bf16.msrb.mxu2 %v4174_v1 }
 0x607   : > { %v2625_v21 = vmul.f32 0.5, %v2624_v59 }
 0x609   : > { %v2626_v7 = vsub.f32 1.5, %v2625_v21  ;;  %2878 = vmatpush.bf16.msra.mxu3 %v4178_v54  ;;  %2906 = vmatpush.bf16.msra.mxu1 %v4186_v55 }
 0x60a   : > { %v4845_v50 = vpop.eup %4844  ;;  %2892 = vmatpush.bf16.msrb.mxu0 %v4182_v15 }
 0x60b   : > { %v2627_v6 = vmul.f32 %v6644_v29, %v2626_v7  ;;  %v2633_v16 = vmul.f32 %v4845_v50, %v6651_v33  ;;  %vm2639_vm14 = vweird.f32 %v4845_v50  ;;  %v2691_v33 = vperm.slane %v6708_v62, 2 }
 0x60c   : > { %vm2640_vm0 = vmor %vm2638_vm15, %vm2639_vm14 }
 0x60d   : > { %v2634_v40 = vmul.f32 %v4845_v50, %v2633_v16  ;;  %v2631_v51 = vsel %vm6683_vm13, %v6644_v29, %v2627_v6  ;;  %v4803_v29 = vld [vmem:[%s7322_s0] ss:$0 sm:$0xff] }
 0x60e   : > { %v2642_v11 = vmul.f32 %v2631_v51, %v2618_v3 }
 0x60f   : > { %v2635_v49 = vmul.f32 0.5, %v2634_v40 }
 0x610   : > { %v2647_v59 = vmul.f32 %v4803_v29, %v2642_v11 }
 0x611   : > { %v2636_v35 = vsub.f32 1.5, %v2635_v49 }
 0x612   : > { %v2652_v2 = vadd.f32 %v4804_v26, %v2647_v59 }
 0x613   : > { %v2637_v19 = vmul.f32 %v4845_v50, %v2636_v35 }
 0x615   : > { %v2641_v58 = vsel %vm2640_vm0, %v4845_v50, %v2637_v19 }
 0x616   : > { %v2643_v18 = vmul.f32 %v2641_v58, %v2619_v22 }
 0x618   : > { %v2648_v17 = vmul.f32 %v4803_v29, %v2643_v18 }
 0x61a   : > { %v2653_v48 = vadd.f32 %v4804_v26, %v2648_v17 }
 0x61c   : > { %v2654_v47 = vpack.c.bf16 %v2653_v48, %v2652_v2 }
 0x61e   : > { %2865 = vmatmul.bf16.vlgmr.msrb.gmra.mxu2 %v2654_v47  ;;  %2879 = vmatmul.bf16.vlgmr.msra.gmra.mxu3 %v2654_v47 }
 0x61f   : > { %2893 = vmatmul.bf16.vlgmr.msrb.gmra.mxu0 %v2654_v47  ;;  %2907 = vmatmul.bf16.vlgmr.msra.gmra.mxu1 %v2654_v47 }
 0x69c   : > { %v2894_v57 = vpop.f32.mrf.mxu0  ;;  %v2908_v21 = vpop.f32.mrf.mxu1 }
 0x69d   : > { %v6712_v23 = vadd.f32 %v2894_v57, %v2691_v33  ;;  %v6716_v45 = vadd.f32 %v2908_v21, %v2692_v10 }
 0x69f   : > { %v6720_v37 = vmul.f32 0.70710677, %v6712_v23  ;;  %v6723_v0 = vmul.f32 0.70710677, %v6716_v45 }
 0x6a1   : > { %v3009_v44 = vmul.f32 %v6720_v37, %v6720_v37  ;;  %v3049_v7 = vmul.f32 %v6723_v0, %v6723_v0  ;;  %v2866_v32 = vpop.f32.mrf.mxu2  ;;  %v2880_v20 = vpop.f32.mrf.mxu3 }
 0x6a2   : > { %v6732_v41 = vadd.f32 %v2866_v32, %v2689_v53  ;;  %v6740_v9 = vadd.f32 %v2880_v20, %v2690_v42 }
 0x6a3   : > { %v6734_v13 = vmin.f32 %v3009_v44, 16.0  ;;  %v6736_v50 = vmin.f32 %v3049_v7, 16.0 }
 0x6a4   : > { %v6743_v5 = vmul.f32 0.70710677, %v6732_v41  ;;  %v6752_v24 = vmul.f32 0.70710677, %v6740_v9  ;;  %v2896_v63 = vpop.f32.mrf.mxu0 }
 0x6a5   : > { %v3022_v52 = vmul.f32 3.8918573e-05, %v6734_v13  ;;  %v3011_v39 = vmul.f32 2.1237322e-06, %v6734_v13  ;;  %v3051_v28 = vmul.f32 2.1237322e-06, %v6736_v50  ;;  %v6770_v55 = vadd.f32 %v2896_v63, %v2691_v33 }
 0x6a6   : > { %v3062_v6 = vmul.f32 3.8918573e-05, %v6736_v50  ;;  %v2929_v16 = vmul.f32 %v6743_v5, %v6743_v5  ;;  %v2969_v34 = vmul.f32 %v6752_v24, %v6752_v24 }
 0x6a7   : > { %v3023_v30 = vadd.f32 0.001143296, %v3022_v52  ;;  %v3012_v40 = vadd.f32 0.00028619796, %v3011_v39  ;;  %v3052_v31 = vadd.f32 0.00028619796, %v3051_v28  ;;  %v2910_v52 = vpop.f32.mrf.mxu1 }
 0x6a8   : > { %v3063_v56 = vadd.f32 0.001143296, %v3062_v6  ;;  %v6754_v38 = vmin.f32 %v2929_v16, 16.0  ;;  %v6766_v1 = vmin.f32 %v2969_v34, 16.0  ;;  %v6777_v2 = vmul.f32 0.70710677, %v6770_v55 }
 0x6a9   : > { %v3024_v60 = vmul.f32 %v3023_v30, %v6734_v13  ;;  %v3013_v36 = vmul.f32 %v3012_v40, %v6734_v13  ;;  %v3053_v51 = vmul.f32 %v3052_v31, %v6736_v50 }
 0x6aa   : > { %v3064_v43 = vmul.f32 %v3063_v56, %v6736_v50  ;;  %v2942_v4 = vmul.f32 3.8918573e-05, %v6754_v38  ;;  %v2931_v15 = vmul.f32 2.1237322e-06, %v6754_v38  ;;  %v2971_v18 = vmul.f32 2.1237322e-06, %v6766_v1 }
 0x6ab   : > { %v3025_v25 = vadd.f32 0.014752088, %v3024_v60  ;;  %v3014_v29 = vadd.f32 0.0036580483, %v3013_v36  ;;  %v3054_v19 = vadd.f32 0.0036580483, %v3053_v51  ;;  %v3169_v20 = vmul.f32 %v6777_v2, %v6777_v2 }
 0x6ac   : > { %v3065_v46 = vadd.f32 0.014752088, %v3064_v43  ;;  %v2943_v14 = vadd.f32 0.001143296, %v2942_v4  ;;  %v2932_v17 = vadd.f32 0.00028619796, %v2931_v15  ;;  %v6793_v60 = vadd.f32 %v2910_v52, %v2692_v10 }
 0x6ad   : > { %v3026_v12 = vmul.f32 %v3025_v25, %v6734_v13  ;;  %v3015_v48 = vmul.f32 %v3014_v29, %v6734_v13  ;;  %v3055_v47 = vmul.f32 %v3054_v19, %v6736_v50  ;;  %v2972_v57 = vadd.f32 0.00028619796, %v2971_v18 }
 0x6ae   : > { %v3066_v49 = vmul.f32 %v3065_v46, %v6736_v50  ;;  %v2944_v8 = vmul.f32 %v2943_v14, %v6754_v38  ;;  %v2982_v21 = vmul.f32 3.8918573e-05, %v6766_v1  ;;  %v2933_v32 = vmul.f32 %v2932_v17, %v6754_v38 }
 0x6af   : > { %v3027_v3 = vadd.f32 0.112945676, %v3026_v12  ;;  %v3016_v39 = vadd.f32 0.05243302, %v3015_v48  ;;  %v3056_v28 = vadd.f32 0.05243302, %v3055_v47  ;;  %v2973_v16 = vmul.f32 %v2972_v57, %v6766_v1  ;;  %v2868_v12 = vpop.f32.mrf.mxu2 }
 0x6b0   : > { %v3067_v35 = vadd.f32 0.112945676, %v3066_v49  ;;  %v2945_v54 = vadd.f32 0.014752088, %v2944_v8  ;;  %v2983_v30 = vadd.f32 0.001143296, %v2982_v21 }
 0x6b1   : > { %v3028_v11 = vmul.f32 %v3027_v3, %v6734_v13  ;;  %v2934_v40 = vadd.f32 0.0036580483, %v2933_v32  ;;  %v6795_v31 = vmin.f32 %v3169_v20, 16.0  ;;  %v3017_v43 = vmul.f32 %v3016_v39, %v6734_v13 }
 0x6b2   : > { %v3068_v58 = vmul.f32 %v3067_v35, %v6736_v50  ;;  %v2946_v59 = vmul.f32 %v2945_v54, %v6754_v38  ;;  %v3057_v4 = vmul.f32 %v3056_v28, %v6736_v50  ;;  %v2974_v34 = vadd.f32 0.0036580483, %v2973_v16 }
 0x6b3   : > { %v3029_v22 = vadd.f32 0.4994258, %v3028_v11  ;;  %v2984_v46 = vmul.f32 %v2983_v30, %v6766_v1  ;;  %v3171_v14 = vmul.f32 2.1237322e-06, %v6795_v31  ;;  %v3182_v51 = vmul.f32 3.8918573e-05, %v6795_v31 }
 0x6b4   : > { %v3069_v33 = vadd.f32 0.4994258, %v3068_v58  ;;  %v2947_v7 = vadd.f32 0.112945676, %v2946_v59  ;;  %v6805_v10 = vmul.f32 0.70710677, %v6793_v60  ;;  %v2935_v49 = vmul.f32 %v2934_v40, %v6754_v38 }
 0x6b5   : > { %v3030_v26 = vmul.f32 %v3029_v22, %v6734_v13  ;;  %v3018_v63 = vadd.f32 0.18741608, %v3017_v43  ;;  %v6812_v3 = vadd.f32 %v2868_v12, %v2689_v53  ;;  %v3058_v35 = vadd.f32 0.18741608, %v3057_v4 }
 0x6b6   : > { %v3070_v6 = vmul.f32 %v3069_v33, %v6736_v50  ;;  %v2948_v56 = vmul.f32 %v2947_v7, %v6754_v38  ;;  %v2975_v54 = vmul.f32 %v2974_v34, %v6766_v1  ;;  %v2985_v11 = vadd.f32 0.014752088, %v2984_v46 }
 0x6b7   : > { %v6782_v44 = vadd.f32 1.0, %v3030_v26  ;;  %v3172_v15 = vadd.f32 0.00028619796, %v3171_v14  ;;  %v3183_v19 = vadd.f32 0.001143296, %v3182_v51  ;;  %v3209_v22 = vmul.f32 %v6805_v10, %v6805_v10 }
 0x6b8   : > { %v6799_v25 = vadd.f32 1.0, %v3070_v6  ;;  %v2949_v36 = vadd.f32 0.4994258, %v2948_v56  ;;  %v2936_v18 = vadd.f32 0.05243302, %v2935_v49  ;;  %v3019_v53 = vmul.f32 %v3018_v63, %v6734_v13 }
 0x6b9   : > { %4846 = vrcp.f32 %v6782_v44  ;;  %v3173_v59 = vmul.f32 %v3172_v15, %v6795_v31  ;;  %v3059_v26 = vmul.f32 %v3058_v35, %v6736_v50  ;;  %v2976_v17 = vadd.f32 0.05243302, %v2975_v54  ;;  %v4536_v35 = vld [vmem:[%s5789_s4 + $0xb8] sm:$0xff] }
 0x6ba   : > { %4848 = vrcp.f32 %v6799_v25  ;;  %v2950_v29 = vmul.f32 %v2949_v36, %v6754_v38  ;;  %v3184_v48 = vmul.f32 %v3183_v19, %v6795_v31  ;;  %v2986_v33 = vmul.f32 %v2985_v11, %v6766_v1  ;;  %v4544_v54 = vld [vmem:[%s5789_s4 + $0xf8] sm:$0xff]  ;;  %3557 = vmatpush.bf16.msra.mxu0 %v4536_v35  ;;  %v2882_v35 = vpop.f32.mrf.mxu3 }
 0x6bb   : > { %v6828_v57 = vmin.f32 %v3209_v22, 16.0  ;;  %v6831_v21 = vmul.f32 0.70710677, %v6812_v3  ;;  %v6834_v7 = vmul.f32 0.5, %v6712_v23  ;;  %v2937_v32 = vmul.f32 %v2936_v18, %v6754_v38  ;;  %3571 = vmatpush.bf16.msrb.mxu1 %v4544_v54  ;;  %v4534_v54 = vld [vmem:[%s5789_s4 + $0xa8] sm:$0xff] }
 0x6bc   : > { %v6825_v47 = vadd.f32 1.0, %v2950_v29  ;;  %v3020_v50 = vadd.f32 1.1283791, %v3019_v53  ;;  %v6840_v52 = vmul.f32 0.5, %v6716_v45  ;;  %v6843_v39 = vmul.f32 0.5, %v6770_v55 }
 0x6bd   : > { %v3174_v28 = vadd.f32 0.0036580483, %v3173_v59  ;;  %v3041_v6 = vand.u32 2147483647, %v6782_v44  ;;  %v3060_v16 = vadd.f32 1.1283791, %v3059_v26  ;;  %v6847_v30 = vmul.f32 %v2976_v17, %v6766_v1 }
 0x6be   : > { %v3185_v23 = vadd.f32 0.014752088, %v3184_v48  ;;  %4850 = vrcp.f32 %v6825_v47  ;;  %v2987_v56 = vadd.f32 0.112945676, %v2986_v33  ;;  %v3211_v40 = vmul.f32 2.1237322e-06, %v6828_v57 }
 0x6bf   : > { %v6808_v8 = vpop.eup %4846  ;;  %v3089_v45 = vmul.f32 %v6831_v21, %v6831_v21  ;;  %v2938_v4 = vadd.f32 0.18741608, %v2937_v32  ;;  %v6858_v46 = vmul.f32 %v3020_v50, %v6720_v37  ;;  %v3175_v14 = vmul.f32 %v3174_v28, %v6795_v31  ;;  %v4535_v32 = vld [vmem:[%s5789_s4 + $0xb0] sm:$0xff] }
 0x6c0   : > { %v3033_v58 = vmul.f32 %v6808_v8, %v6782_v44  ;;  %v6837_v20 = vpop.eup %4848  ;;  %v3186_v34 = vmul.f32 %v3185_v23, %v6795_v31  ;;  %v3222_v12 = vmul.f32 3.8918573e-05, %v6828_v57  ;;  %vm3037_vm1 = vweird.f32 %v6782_v44  ;;  %3558 = vmatpush.bf16.msra.mxu0 %v4535_v32 }
 0x6c1   : > { %v3073_v43 = vmul.f32 %v6837_v20, %v6799_v25  ;;  %v6862_v36 = vmin.f32 %v3089_v45, 16.0  ;;  %v3043_v51 = vand.u32 2147483648, %v6782_v44  ;;  %v6867_v49 = vmul.f32 %v3060_v16, %v6723_v0  ;;  %v4543_v44 = vld [vmem:[%s5789_s4 + $0xf0] sm:$0xff] }
 0x6c2   : > { %v3034_v13 = vsub.f32 1.0, %v3033_v58  ;;  %v3212_v63 = vadd.f32 0.00028619796, %v3211_v40  ;;  %vm6871_vm2 = vcmp.eq.f32.partialorder %v3041_v6, 8.507059e+37  ;;  %v3081_v37 = vand.u32 2147483647, %v6799_v25  ;;  %3572 = vmatpush.bf16.msrb.mxu1 %v4543_v44 }
 0x6c3   : > { %v2988_v15 = vmul.f32 %v2987_v56, %v6766_v1  ;;  %v3187_v29 = vadd.f32 0.112945676, %v3186_v34  ;;  %vm3038_vm3 = vweird.f32 %v6808_v8  ;;  %v3074_v22 = vsub.f32 1.0, %v3073_v43  ;;  %v4528_v43 = vld [vmem:[%s5789_s4 + $0x78] sm:$0xff] }
 0x6c4   : > { %v3035_v55 = vmul.f32 %v6808_v8, %v3034_v13  ;;  %v3083_v0 = vand.u32 2147483648, %v6799_v25  ;;  %v6880_v58 = vpop.eup %4850  ;;  %v3176_v18 = vadd.f32 0.05243302, %v3175_v14  ;;  %v3223_v59 = vadd.f32 0.001143296, %v3222_v12  ;;  %vm6893_vm5 = vmor %vm3037_vm1, %vm3038_vm3  ;;  %3543 = vmatpush.bf16.msrb.mxu3 %v4528_v43  ;;  %3559 = vmatpush.bf16.msra.mxu0 %v4534_v54  ;;  %v4526_v43 = vld [vmem:[%s5789_s4 + $0x68] sm:$0xff] }
 0x6c5   : > { %v3188_v53 = vmul.f32 %v3187_v29, %v6795_v31  ;;  %v3091_v26 = vmul.f32 2.1237322e-06, %v6862_v36  ;;  %v3044_v17 = vor.u32 1.1754944e-38, %v3043_v51  ;;  %vm3077_vm4 = vweird.f32 %v6799_v25 }
 0x6c6   : > { %v3036_v19 = vadd.f32 %v6808_v8, %v3035_v55  ;;  %v2939_v48 = vmul.f32 %v2938_v4, %v6754_v38  ;;  %v3213_v33 = vmul.f32 %v3212_v63, %v6828_v57  ;;  %v3102_v13 = vmul.f32 3.8918573e-05, %v6862_v36  ;;  %v4520_v55 = vld [vmem:[%s5789_s4 + $0x38] sm:$0xff] }
 0x6c7   : > { %v2989_v28 = vadd.f32 0.4994258, %v2988_v15  ;;  %v3189_v6 = vadd.f32 0.4994258, %v3188_v53  ;;  %v3224_v16 = vmul.f32 %v3223_v59, %v6828_v57  ;;  %v3092_v23 = vadd.f32 0.00028619796, %v3091_v26  ;;  %3529 = vmatpush.bf16.msra.mxu2 %v4520_v55 }
 0x6c8   : > { %v3040_v38 = vsel %vm6893_vm5, %v6808_v8, %v3036_v19  ;;  %v3075_v56 = vmul.f32 %v6837_v20, %v3074_v22  ;;  %v2953_v40 = vmul.f32 %v6880_v58, %v6825_v47  ;;  %v3103_v45 = vadd.f32 0.001143296, %v3102_v13  ;;  %v4542_v15 = vld [vmem:[%s5789_s4 + $0xe8] sm:$0xff]  ;;  %v4527_v13 = vld [vmem:[%s5789_s4 + $0x70] sm:$0xff] }
 0x6c9   : > { %v3177_v4 = vmul.f32 %v3176_v18, %v6795_v31  ;;  %v3190_v34 = vmul.f32 %v3189_v6, %v6795_v31  ;;  %v3225_v14 = vadd.f32 0.014752088, %v3224_v16  ;;  %v3093_v12 = vmul.f32 %v3092_v23, %v6862_v36  ;;  %3573 = vmatpush.bf16.msrb.mxu1 %v4542_v15  ;;  %v4533_v23 = vld [vmem:[%s5789_s4 + $0xa0] sm:$0xff]  ;;  %3544 = vmatpush.bf16.msrb.mxu3 %v4527_v13  ;;  %v4518_v55 = vld [vmem:[%s5789_s4 + $0x28] sm:$0xff] }
 0x6ca   : > { %vm3078_vm6 = vweird.f32 %v6837_v20  ;;  %vm6911_vm7 = vcmp.eq.f32.partialorder %v3081_v37, 8.507059e+37  ;;  %v3214_v51 = vadd.f32 0.0036580483, %v3213_v33  ;;  %v3104_v63 = vmul.f32 %v3103_v45, %v6862_v36  ;;  %v4519_v33 = vld [vmem:[%s5789_s4 + $0x30] sm:$0xff]  ;;  %3560 = vmatpush.bf16.msra.mxu0 %v4533_v23 }
 0x6cb   : > { %v2963_v29 = vand.u32 2147483648, %v6825_v47  ;;  %v2990_v19 = vmul.f32 %v2989_v28, %v6766_v1  ;;  %v6920_v22 = vadd.f32 1.0, %v3190_v34  ;;  %v3226_v37 = vmul.f32 %v3225_v14, %v6828_v57  ;;  %3530 = vmatpush.bf16.msra.mxu2 %v4519_v33  ;;  %vm6941_vm8 = vmor %vm3077_vm4, %vm3078_vm6  ;;  %v4531_v23 = vld [vmem:[%s5789_s4 + $0x90] sm:$0xff] }
 0x6cc   : > { %v3045_v18 = vsel %vm6871_vm2, %v3044_v17, %v3040_v38  ;;  %v3076_v53 = vadd.f32 %v6837_v20, %v3075_v56  ;;  %v3094_v59 = vadd.f32 0.0036580483, %v3093_v12  ;;  %v3105_v26 = vadd.f32 0.014752088, %v3104_v63  ;;  %v4541_v56 = vld [vmem:[%s5789_s4 + $0xe0] sm:$0xff]  ;;  %v4540_v63 = vld [vmem:[%s5789_s4 + $0xd8] sm:$0xff] }
 0x6cd   : > { %v2954_v32 = vsub.f32 1.0, %v2953_v40  ;;  %v3178_v50 = vadd.f32 0.18741608, %v3177_v4  ;;  %4852 = vrcp.f32 %v6920_v22  ;;  %v6931_v28 = vadd.f32 %v2882_v35, %v2690_v42  ;;  %3574 = vmatpush.bf16.msrb.mxu1 %v4541_v56  ;;  %3545 = vmatpush.bf16.msrb.mxu3 %v4526_v43  ;;  %v4539_v38 = vld [vmem:[%s5789_s4 + $0xd0] sm:$0xff]  ;;  %v4524_v43 = vld [vmem:[%s5789_s4 + $0x58] sm:$0xff] }
 0x6ce   : > { %v3084_v6 = vor.u32 1.1754944e-38, %v3083_v0  ;;  %v6933_v11 = vadd.f32 1.1283791, %v2939_v48  ;;  %v3215_v17 = vmul.f32 %v3214_v51, %v6828_v57  ;;  %v3227_v16 = vadd.f32 0.112945676, %v3226_v37  ;;  %v4532_v51 = vld [vmem:[%s5789_s4 + $0x98] sm:$0xff] }
 0x6cf   : > { %v2961_v62 = vand.u32 2147483647, %v6825_v47  ;;  %v6946_v42 = vor.u32 1.1754944e-38, %v2963_v29  ;;  %v6948_v0 = vadd.f32 1.0, %v2990_v19  ;;  %v3106_v48 = vmul.f32 %v3105_v26, %v6862_v36  ;;  %3531 = vmatpush.bf16.msra.mxu2 %v4518_v55  ;;  %3561 = vmatpush.bf16.msra.mxu0 %v4532_v51  ;;  %v4516_v55 = vld [vmem:[%s5789_s4 + $0x18] sm:$0xff]  ;;  %v4537_v19 = vld [vmem:[%s5789_s4 + $0xc0] sm:$0xff] }
 0x6d0   : > { %v6953_v40 = vmul.f32 %v3045_v18, %v6858_v46  ;;  %v3080_v25 = vsel %vm6941_vm8, %v6837_v20, %v3076_v53  ;;  %v3228_v45 = vmul.f32 %v3227_v16, %v6828_v57  ;;  %v3095_v44 = vmul.f32 %v3094_v59, %v6862_v36  ;;  %v4517_v53 = vld [vmem:[%s5789_s4 + $0x20] sm:$0xff] }
 0x6d1   : > { %v2955_v4 = vmul.f32 %v6880_v58, %v2954_v32  ;;  %v3179_v34 = vmul.f32 %v3178_v50, %v6795_v31  ;;  %v3107_v14 = vadd.f32 0.112945676, %v3106_v48  ;;  %v6965_v46 = vmul.f32 0.70710677, %v6931_v28  ;;  %v4525_v59 = vld [vmem:[%s5789_s4 + $0x60] sm:$0xff]  ;;  %3575 = vmatpush.bf16.msrb.mxu1 %v4540_v63 }
 0x6d2   : > { %vm2957_vm9 = vweird.f32 %v6825_v47  ;;  %vm2958_vm10 = vweird.f32 %v6880_v58  ;;  %v3216_v20 = vadd.f32 0.05243302, %v3215_v17  ;;  %v3229_v12 = vadd.f32 0.4994258, %v3228_v45  ;;  %3546 = vmatpush.bf16.msrb.mxu3 %v4525_v59 }
 0x6d3   : > { %v6971_v35 = vpop.eup %4852  ;;  %v3085_v31 = vsel %vm6911_vm7, %v3084_v6, %v3080_v25  ;;  %4854 = vrcp.f32 %v6948_v0  ;;  %v3108_v54 = vmul.f32 %v3107_v14, %v6862_v36  ;;  %v3129_v15 = vmul.f32 %v6965_v46, %v6965_v46  ;;  %3532 = vmatpush.bf16.msra.mxu2 %v4517_v53  ;;  %vm7006_vm12 = vmor %vm2957_vm9, %vm2958_vm10  ;;  %3562 = vmatpush.bf16.msra.mxu0 %v4531_v23 }
 0x6d4   : > { %v4301_v29 = vclamps-f32 %v6953_v40, 1.0  ;;  %vm6980_vm11 = vcmp.eq.f32.partialorder %v2961_v62, 8.507059e+37  ;;  %v3193_v37 = vmul.f32 %v6971_v35, %v6920_v22  ;;  %v3230_v8 = vmul.f32 %v3229_v12, %v6828_v57 }
 0x6d5   : > { %v3096_v18 = vadd.f32 0.05243302, %v3095_v44  ;;  %v2956_v26 = vadd.f32 %v6880_v58, %v2955_v4  ;;  %v3180_v33 = vadd.f32 1.1283791, %v3179_v34  ;;  %v3109_v13 = vadd.f32 0.4994258, %v3108_v54  ;;  %3576 = vmatpush.bf16.msrb.mxu1 %v4539_v38 }
 0x6d6   : > { %v6990_v32 = vmin.f32 %v3129_v15, 16.0  ;;  %v3194_v50 = vsub.f32 1.0, %v3193_v37  ;;  %v3201_v6 = vand.u32 2147483647, %v6920_v22  ;;  %v3217_v17 = vmul.f32 %v3216_v20, %v6828_v57  ;;  %v4530_v54 = vld [vmem:[%s5789_s4 + $0x88] sm:$0xff]  ;;  %3547 = vmatpush.bf16.msrb.mxu3 %v4524_v43 }
 0x6d7   : > { %v6994_v16 = vadd.f32 1.0, %v3230_v8  ;;  %v3203_v62 = vand.u32 2147483648, %v6920_v22  ;;  %v3110_v48 = vmul.f32 %v3109_v13, %v6862_v36  ;;  %vm3198_vm13 = vweird.f32 %v6971_v35  ;;  %3533 = vmatpush.bf16.msra.mxu2 %v4516_v55  ;;  %3563 = vmatpush.bf16.msra.mxu0 %v4530_v54 }
 0x6d8   : > { %v3131_v56 = vmul.f32 2.1237322e-06, %v6990_v32  ;;  %v3142_v40 = vmul.f32 3.8918573e-05, %v6990_v32  ;;  %v3195_v45 = vmul.f32 %v6971_v35, %v3194_v50  ;;  %v3097_v44 = vmul.f32 %v3096_v18, %v6862_v36  ;;  %v4515_v18 = vld [vmem:[%s5789_s4 + $0x10] sm:$0xff] }
 0x6d9   : > { %4856 = vrcp.f32 %v6994_v16  ;;  %v7016_v4 = vpop.eup %4854  ;;  %v7019_v47 = vmul.f32 %v3085_v31, %v6867_v49  ;;  %v2960_v34 = vsel %vm7006_vm12, %v6880_v58, %v2956_v26  ;;  %v7024_v14 = vadd.f32 1.0, %v3110_v48  ;;  %v4538_v49 = vld [vmem:[%s5789_s4 + $0xc8] sm:$0xff] }
 0x6da   : > { %v3132_v20 = vadd.f32 0.00028619796, %v3131_v56  ;;  %v3196_v12 = vadd.f32 %v6971_v35, %v3195_v45  ;;  %vm3197_vm14 = vweird.f32 %v6920_v22  ;;  %v3218_v51 = vadd.f32 0.18741608, %v3217_v17  ;;  %3577 = vmatpush.bf16.msrb.mxu1 %v4538_v49  ;;  %v4522_v56 = vld [vmem:[%s5789_s4 + $0x48] sm:$0xff]  ;;  %v4513_v49 = vld [vmem:[%s5789_s4] sm:$0xff] }
 0x6db   : > { %v3143_v63 = vadd.f32 0.001143296, %v3142_v40  ;;  %v3251_v31 = vadd.f32 1.0, %v4301_v29  ;;  %v3181_v15 = vmul.f32 %v3180_v33, %v6777_v2  ;;  %vm3199_vm15 = vmor %vm3197_vm14, %vm3198_vm13  ;;  %v3204_v58 = vor.u32 1.1754944e-38, %v3203_v62  ;;  %v4523_v29 = vld [vmem:[%s5789_s4 + $0x50] sm:$0xff]  ;;  %3534 = vmatpush.bf16.msra.mxu2 %v4515_v18 }
 0x6dc   : > { %4858 = vrcp.f32 %v7024_v14  ;;  %v3200_v22 = vsel %vm3199_vm15, %v6971_v35, %v3196_v12  ;;  %vm3202_vm0 = vcmp.eq.f32.partialorder %v3201_v6, 8.507059e+37  ;;  %v3098_v37 = vadd.f32 0.18741608, %v3097_v44  ;;  %3548 = vmatpush.bf16.msrb.mxu3 %v4523_v29 }
 0x6dd   : > { %v3133_v8 = vmul.f32 %v3132_v20, %v6990_v32  ;;  %v2965_v2 = vsel %vm6980_vm11, %v6946_v42, %v2960_v34  ;;  %v7043_v53 = vmul.f32 %v7016_v4, %v6948_v0  ;;  %v3205_v59 = vsel %vm3202_vm0, %v3204_v58, %v3200_v22  ;;  %v4529_v42 = vld [vmem:[%s5789_s4 + $0x80] sm:$0xff] }
 0x6de   : > { %v3144_v35 = vmul.f32 %v3143_v63, %v6990_v32  ;;  %v2941_v33 = vmul.f32 %v6933_v11, %v6743_v5  ;;  %v7049_v13 = vadd.f32 0.18741608, %v6847_v30  ;;  %v3206_v50 = vmul.f32 %v3205_v59, %v3181_v15  ;;  %3564 = vmatpush.bf16.msra.mxu0 %v4529_v42  ;;  %3578 = vmatpush.bf16.msrb.mxu1 %v4537_v19 }
 0x6df   : > { %v4857_v26 = vpop.eup %4856  ;;  %v3219_v6 = vmul.f32 %v3218_v51, %v6828_v57  ;;  %v3259_v17 = vmul.f32 %v3251_v31, %v6834_v7  ;;  %v4302_v23 = vclamps-f32 %v7019_v47, 1.0  ;;  %v3099_v11 = vmul.f32 %v3098_v37, %v6862_v36  ;;  %v4514_v57 = vld [vmem:[%s5789_s4 + $0x8] sm:$0xff]  ;;  %v4521_v31 = vld [vmem:[%s5789_s4 + $0x40] sm:$0xff] }
 0x6e0   : > { %v3233_v38 = vmul.f32 %v4857_v26, %v6994_v16  ;;  %v3145_v62 = vadd.f32 0.014752088, %v3144_v35  ;;  %v7057_v5 = vmul.f32 %v2965_v2, %v2941_v33  ;;  %v4305_v30 = vclamps-f32 %v3206_v50, 1.0  ;;  %3535 = vmatpush.bf16.msra.mxu2 %v4514_v57  ;;  %3549 = vmatpush.bf16.msrb.mxu3 %v4522_v56 }
 0x6e1   : > { %v3134_v48 = vadd.f32 0.0036580483, %v3133_v8  ;;  %v2994_v25 = vsub.f32 1.0, %v7043_v53  ;;  %v3243_v7 = vand.u32 2147483648, %v6994_v16  ;;  %v3220_v43 = vadd.f32 1.1283791, %v3219_v6 }
 0x6e2   : > { %v4859_v40 = vpop.eup %4858  ;;  %v3234_v45 = vsub.f32 1.0, %v3233_v38  ;;  %v3146_v44 = vmul.f32 %v3145_v62, %v6990_v32  ;;  %v3255_v55 = vadd.f32 1.0, %v4305_v30  ;;  %vm3237_vm1 = vweird.f32 %v6994_v16 }
 0x6e3   : > { %v3113_v36 = vmul.f32 %v4859_v40, %v7024_v14  ;;  %vm3238_vm2 = vweird.f32 %v4857_v26  ;;  %v3241_v34 = vand.u32 2147483647, %v6994_v16  ;;  %v3100_v51 = vadd.f32 1.1283791, %v3099_v11 }
 0x6e4   : > { %v3235_v47 = vmul.f32 %v4857_v26, %v3234_v45  ;;  %v3147_v20 = vadd.f32 0.112945676, %v3146_v44  ;;  %v3263_v12 = vmul.f32 %v3255_v55, %v6843_v39  ;;  %v3135_v54 = vmul.f32 %v3134_v48, %v6990_v32  ;;  %vm3239_vm3 = vmor %vm3237_vm1, %vm3238_vm2  ;;  %3536 = vmatpush.bf16.msra.mxu2 %v4513_v49  ;;  %3550 = vmatpush.bf16.msrb.mxu3 %v4521_v31 }
 0x6e5   : > { %v3114_v63 = vsub.f32 1.0, %v3113_v36  ;;  %v3244_v58 = vor.u32 1.1754944e-38, %v3243_v7  ;;  %v3123_v22 = vand.u32 2147483648, %v7024_v14  ;;  %vm3118_vm4 = vweird.f32 %v4859_v40 }
 0x6e6   : > { %v3236_v15 = vadd.f32 %v4857_v26, %v3235_v47  ;;  %v3148_v37 = vmul.f32 %v3147_v20, %v6990_v32  ;;  %v3267_v8 = vpack.c.bf16 %v3263_v12, %v3259_v17  ;;  %v3121_v39 = vand.u32 2147483647, %v7024_v14 }
 0x6e7   : > { %v3115_v18 = vmul.f32 %v4859_v40, %v3114_v63  ;;  %v3221_v29 = vmul.f32 %v3220_v43, %v6805_v10  ;;  %vm3242_vm5 = vcmp.eq.f32.partialorder %v3241_v34, 8.507059e+37  ;;  %vm3117_vm6 = vweird.f32 %v7024_v14 }
 0x6e8   : > { %v3240_v2 = vsel %vm3239_vm3, %v4857_v26, %v3236_v15  ;;  %v3149_v53 = vadd.f32 0.4994258, %v3148_v37  ;;  %v3136_v33 = vadd.f32 0.05243302, %v3135_v54  ;;  %3565 = vmatmul.bf16.vlgmr.msra.gmra.mxu0 %v3267_v8  ;;  %v2995_v16 = vmul.f32 %v7016_v4, %v2994_v25  ;;  %vm3119_vm7 = vmor %vm3117_vm6, %vm3118_vm4 }
 0x6e9   : > { %v3245_v59 = vsel %vm3242_vm5, %v3244_v58, %v3240_v2  ;;  %v3116_v35 = vadd.f32 %v4859_v40, %v3115_v18  ;;  %v3124_v6 = vor.u32 1.1754944e-38, %v3123_v22  ;;  %v4299_v10 = vclamps-f32 %v7057_v5, 1.0 }
 0x6ea   : > { %v3246_v50 = vmul.f32 %v3245_v59, %v3221_v29  ;;  %v3150_v42 = vmul.f32 %v3149_v53, %v6990_v32  ;;  %v3101_v26 = vmul.f32 %v3100_v51, %v6831_v21  ;;  %vm3122_vm8 = vcmp.eq.f32.partialorder %v3121_v39, 8.507059e+37 }
 0x6eb   : > { %v3120_v19 = vsel %vm3119_vm7, %v4859_v40, %v3116_v35  ;;  %v3252_v17 = vadd.f32 1.0, %v4302_v23  ;;  %v2979_v30 = vmul.f32 %v7049_v13, %v6766_v1  ;;  %v2920_v11 = vmul.f32 0.5, %v6793_v60 }
 0x6ec   : > { %v4306_v38 = vclamps-f32 %v3246_v50, 1.0  ;;  %v3125_v62 = vsel %vm3122_vm8, %v3124_v6, %v3120_v19  ;;  %v3151_v14 = vadd.f32 1.0, %v3150_v42  ;;  %v3137_v57 = vmul.f32 %v3136_v33, %v6990_v32 }
 0x6ed   : > { %v3126_v48 = vmul.f32 %v3125_v62, %v3101_v26  ;;  %v2996_v56 = vadd.f32 %v7016_v4, %v2995_v16  ;;  %vm2998_vm9 = vweird.f32 %v7016_v4  ;;  %v3249_v21 = vadd.f32 1.0, %v4299_v10 }
 0x6ee   : > { %v3256_v5 = vadd.f32 1.0, %v4306_v38  ;;  %4860 = vrcp.f32 %v3151_v14  ;;  %v3003_v23 = vand.u32 2147483648, %v6948_v0  ;;  %v3260_v25 = vmul.f32 %v3252_v17, %v6840_v52 }
 0x6ef   : > { %v4303_v40 = vclamps-f32 %v3126_v48, 1.0  ;;  %vm2997_vm10 = vweird.f32 %v6948_v0  ;;  %v3001_v1 = vand.u32 2147483647, %v6948_v0  ;;  %v2913_v13 = vmul.f32 0.5, %v6732_v41 }
 0x6f0   : > { %v3264_v60 = vmul.f32 %v3256_v5, %v2920_v11  ;;  %vm2999_vm11 = vmor %vm2997_vm10, %vm2998_vm9  ;;  %v2917_v45 = vmul.f32 0.5, %v6812_v3  ;;  %v3138_v44 = vadd.f32 0.18741608, %v3137_v57  ;;  %v2980_v55 = vadd.f32 1.1283791, %v2979_v30 }
 0x6f1   : > { %v3253_v7 = vadd.f32 1.0, %v4303_v40  ;;  %v3000_v43 = vsel %vm2999_vm11, %v7016_v4, %v2996_v56  ;;  %v3257_v47 = vmul.f32 %v3249_v21, %v2913_v13  ;;  %v3004_v34 = vor.u32 1.1754944e-38, %v3003_v23 }
 0x6f2   : > { %v3268_v36 = vpack.c.bf16 %v3264_v60, %v3260_v25  ;;  %vm3002_vm12 = vcmp.eq.f32.partialorder %v3001_v1, 8.507059e+37  ;;  %v3139_v51 = vmul.f32 %v3138_v44, %v6990_v32  ;;  %v2981_v63 = vmul.f32 %v2980_v55, %v6752_v24 }
 0x6f3   : > { %v3261_v20 = vmul.f32 %v3253_v7, %v2917_v45  ;;  %v3005_v12 = vsel %vm3002_vm12, %v3004_v34, %v3000_v43  ;;  %v3163_v49 = vand.u32 2147483648, %v3151_v14  ;;  %v3161_v15 = vand.u32 2147483647, %v3151_v14 }
 0x6f4   : > { %v4861_v52 = vpop.eup %4860  ;;  %3579 = vmatmul.bf16.vlgmr.msrb.gmra.mxu1 %v3268_v36  ;;  %v3006_v54 = vmul.f32 %v3005_v12, %v2981_v63  ;;  %v3140_v31 = vadd.f32 1.1283791, %v3139_v51  ;;  %vm3157_vm14 = vweird.f32 %v3151_v14  ;;  %v2914_v2 = vmul.f32 0.5, %v6740_v9 }
 0x6f5   : > { %v3265_v0 = vpack.c.bf16 %v3261_v20, %v3257_v47  ;;  %v3153_v41 = vmul.f32 %v4861_v52, %v3151_v14  ;;  %vm3158_vm13 = vweird.f32 %v4861_v52  ;;  %v3164_v22 = vor.u32 1.1754944e-38, %v3163_v49 }
 0x6f6   : > { %vm3159_vm15 = vmor %vm3157_vm14, %vm3158_vm13  ;;  %v4300_v37 = vclamps-f32 %v3006_v54, 1.0  ;;  %v3141_v8 = vmul.f32 %v3140_v31, %v6965_v46  ;;  %vm3162_vm0 = vcmp.eq.f32.partialorder %v3161_v15, 8.507059e+37  ;;  %v2918_v53 = vmul.f32 0.5, %v6931_v28  ;;  %v4805_v46 = vld [vmem:[%s901_s18] ss:$0 sm:$0xff] }
 0x6f7   : > { %v3154_v3 = vsub.f32 1.0, %v3153_v41  ;;  %3537 = vmatmul.bf16.vlgmr.msra.gmra.mxu2 %v3265_v0 }
 0x6f8   : > { %v3250_v39 = vadd.f32 1.0, %v4300_v37 }
 0x6f9   : > { %v3155_v4 = vmul.f32 %v4861_v52, %v3154_v3 }
 0x6fa   : > { %v3258_v35 = vmul.f32 %v3250_v39, %v2914_v2 }
 0x6fb   : > { %v3156_v58 = vadd.f32 %v4861_v52, %v3155_v4 }
 0x6fd   : > { %v3160_v32 = vsel %vm3159_vm15, %v4861_v52, %v3156_v58 }
 0x6fe   : > { %v3165_v18 = vsel %vm3162_vm0, %v3164_v22, %v3160_v32 }
 0x6ff   : > { %v3166_v24 = vmul.f32 %v3165_v18, %v3141_v8 }
 0x701   : > { %v4304_v29 = vclamps-f32 %v3166_v24, 1.0 }
 0x703   : > { %v3254_v59 = vadd.f32 1.0, %v4304_v29 }
 0x705   : > { %v3262_v33 = vmul.f32 %v3254_v59, %v2918_v53 }
 0x707   : > { %v3266_v16 = vpack.c.bf16 %v3262_v33, %v3258_v35 }
 0x709   : > { %3551 = vmatmul.bf16.vlgmr.msrb.gmra.mxu3 %v3266_v16 }
 0x765   : > { %v3566_v42 = vpop.f32.mrf.mxu0 }
 0x76d   : > { %v3568_v11 = vpop.f32.mrf.mxu0 }
 0x771   : > { %v3580_v19 = vpop.f32.mrf.mxu1 }
 0x779   : > { %v3582_v57 = vpop.f32.mrf.mxu1 }
 0x77a   : > { %v3538_v50 = vpop.f32.mrf.mxu2 }
 0x77b   : > { %v3539_v6 = vadd.f32 %v4805_v46, %v3538_v50 }
 0x782   : > { %v3540_v17 = vpop.f32.mrf.mxu2 }
 0x783   : > { %v3541_v28 = vadd.f32 %v4805_v46, %v3540_v17 }
 0x78c   : > { %v3552_v10 = vpop.f32.mrf.mxu3 }
 0x78d   : > { %v3553_v26 = vadd.f32 %v3552_v10, %v3539_v6 }
 0x78f   : > { %v3567_v9 = vadd.f32 %v3566_v42, %v3553_v26 }
 0x791   : > { %v3581_v38 = vadd.f32 %v3580_v19, %v3567_v9 }
 0x793   : > { %v3585_v62 = vadd.f32 %v3581_v38, %v6591_v27 }
 0x794   : > { %v3554_v14 = vpop.f32.mrf.mxu3 }
 0x795   : > { %3587 = vst [vmem:[#allocation2] sm:$0xff] %v3585_v62  ;;  %v3555_v30 = vadd.f32 %v3554_v14, %v3541_v28 }
 0x797   : > { %v3569_v48 = vadd.f32 %v3568_v11, %v3555_v30 }
 0x799   : > { %v3583_v56 = vadd.f32 %v3582_v57, %v3569_v48  ;;  %3592 = sbr.rel (%p4435_p6) target bundleno = 2109 (0x83d), region = 124 }
 0x79b   : > { %v3586_v5 = vadd.f32 %v3583_v56, %v6597_v61 }
 0x79d   : > { %3588 = vst [vmem:[#allocation2 + $0x8] sm:$0xff] %v3586_v5 }
 0x79e   : > { %3595 = vadd.xlane.f32.xlu0 %v3585_v62  ;;  %v3601_v21 = vmul.f32 %v3585_v62, %v3585_v62  ;;  %v3602_v23 = vmul.f32 %v3586_v5, %v3586_v5  ;;  %v4864_v49 = vld [vmem:[%s7338_s10] ss:$0 sm:$0xff] }
 0x79f   : > { %v4865_v58 = vld [vmem:[%s7339_s26] ss:$0 sm:$0xff] }
 0x7a0   : > { %3603 = vadd.xlane.f32.xlu1 %v3601_v21 }
 0x7a6   : > { %3597 = vadd.xlane.f32.xlu0 %v3586_v5 }
 0x7a8   : > { %3605 = vadd.xlane.f32.xlu1 %v3602_v23 }
 0x811   : > { %v3596_v27 = vpop.xlane.xlu0 %3595 }
 0x812   : > { %v3599_v40 = vmul.f32 0.0078125, %v3596_v27 }
 0x813   : > { %v3604_v25 = vpop.xlane.xlu1 %3603 }
 0x814   : > { %v3609_v1 = vmul.f32 %v3599_v40, %v3599_v40  ;;  %v3607_v60 = vmul.f32 0.0078125, %v3604_v25  ;;  %v3615_v54 = vsub.f32 %v3585_v62, %v3599_v40 }
 0x816   : > { %v3611_v13 = vsub.f32 %v3607_v60, %v3609_v1 }
 0x818   : > { %v3613_v45 = vmax.f32 %v3611_v13, 0.0 }
 0x819   : > { %v3598_v7 = vpop.xlane.xlu0 %3597 }
 0x81a   : > { %v3617_v44 = vadd.f32 1e-05, %v3613_v45  ;;  %v3600_v61 = vmul.f32 0.0078125, %v3598_v7 }
 0x81b   : > { %v3606_v55 = vpop.xlane.xlu1 %3605 }
 0x81c   : > { %4866 = vrsqrt.f32 %v3617_v44  ;;  %v3610_v43 = vmul.f32 %v3600_v61, %v3600_v61  ;;  %v3608_v36 = vmul.f32 0.0078125, %v3606_v55  ;;  %vm3625_vm2 = vweird.f32 %v3617_v44 }
 0x81d   : > { %v3616_v39 = vsub.f32 %v3586_v5, %v3600_v61 }
 0x81e   : > { %v3612_v47 = vsub.f32 %v3608_v36, %v3610_v43 }
 0x820   : > { %v3614_v34 = vmax.f32 %v3612_v47, 0.0 }
 0x822   : > { %v4867_v20 = vpop.eup %4866  ;;  %v3618_v12 = vadd.f32 1e-05, %v3614_v34 }
 0x823   : > { %v3620_v52 = vmul.f32 %v4867_v20, %v3617_v44  ;;  %vm3626_vm1 = vweird.f32 %v4867_v20 }
 0x824   : > { %4868 = vrsqrt.f32 %v3618_v12  ;;  %vm3627_vm3 = vmor %vm3625_vm2, %vm3626_vm1  ;;  %vm3635_vm5 = vweird.f32 %v3618_v12 }
 0x825   : > { %v3621_v0 = vmul.f32 %v4867_v20, %v3620_v52 }
 0x827   : > { %v3622_v51 = vmul.f32 0.5, %v3621_v0 }
 0x829   : > { %v3623_v41 = vsub.f32 1.5, %v3622_v51 }
 0x82a   : > { %v4869_v63 = vpop.eup %4868 }
 0x82b   : > { %v3624_v3 = vmul.f32 %v4867_v20, %v3623_v41  ;;  %v3630_v31 = vmul.f32 %v4869_v63, %v3618_v12  ;;  %vm3636_vm4 = vweird.f32 %v4869_v63 }
 0x82c   : > { %vm3637_vm6 = vmor %vm3635_vm5, %vm3636_vm4 }
 0x82d   : > { %v3628_v4 = vsel %vm3627_vm3, %v4867_v20, %v3624_v3  ;;  %v3631_v22 = vmul.f32 %v4869_v63, %v3630_v31 }
 0x82e   : > { %v3639_v15 = vmul.f32 %v3628_v4, %v3615_v54 }
 0x82f   : > { %v3632_v8 = vmul.f32 0.5, %v3631_v22 }
 0x830   : > { %v3644_v37 = vmul.f32 %v4864_v49, %v3639_v15 }
 0x831   : > { %v3633_v18 = vsub.f32 1.5, %v3632_v8 }
 0x832   : > { %v3649_v32 = vadd.f32 %v4865_v58, %v3644_v37 }
 0x833   : > { %v3634_v24 = vmul.f32 %v4869_v63, %v3633_v18 }
 0x834   : > { %3651 = vst [vmem:[%s5816_s14] sm:$0xff] %v3649_v32 }
 0x835   : > { %v3638_v29 = vsel %vm3637_vm6, %v4869_v63, %v3634_v24 }
 0x836   : > { %v3640_v2 = vmul.f32 %v3638_v29, %v3616_v39 }
 0x838   : > { %v3645_v53 = vmul.f32 %v4864_v49, %v3640_v2 }
 0x83a   : > { %v3650_v59 = vadd.f32 %v4865_v58, %v3645_v53 }
 0x83c   : > { %3652 = vst [vmem:[%s5816_s14 + $0x8] sm:$0xff] %v3650_v59 }
 0x83d PF: > { %s7340_s18 = sld [smem:[#allocation37_spill]]  ;;  %s3673_s7 = sshll.u32 %s5812_s21, 4  ;;  %s3674_s7 = int_to_ptr.vmem [resolvable:$true] %s3673_s7 }
 0x83e   : > { %s7341_s11 = sld [smem:[#allocation36_spill]]  ;;  %s3654_s30 = scalar_lea.sflag [#allocation5], %s885_s15 }
 0x83f   : > { %s7342_s8 = sld [smem:[#allocation61_spill]] }
 0x843   : > { %s4438_s24 = sshll.u32 %s7340_s18, 1  ;;  %s4545_s4 = sshll.u32 %s7340_s18, 4 }
 0x844   : > { %s4439_s1 = sshll.u32 %s7341_s11, 2 }
 0x845   : > { %s3670_s9 = sadd.s32 %s4439_s1, %s4438_s24  ;;  %s5190_s6 = scalar_lea.hbm %s7342_s8, 64 }
 0x846   : > { %s4440_s23 = sshll.u32 %s3670_s9, 3 }
 0x847   : > { %s3672_s27 = scalar_lea.hbm %s7342_s8, %s4440_s23 }
 0x848   : > { %s3675_s12 = sshll.u32 %s3672_s27, 4  ;;  %s3676_s12 = int_to_ptr.hbm [resolvable:$true] %s3675_s12 }
 0x849   : > { %s5184_s13 = sshra.s32 %s3676_s12, 4  ;;  %s5185_s13 = int_to_ptr.hbm [resolvable:$true] %s5184_s13 }
 0x84a   : > { %s5186_s3 = scalar_lea.hbm %s5185_s13, 16  ;;  %p5191_p2 = scmp.lt.s32.totalorder %s5185_s13, %s7342_s8 }
 0x84b   : > { %p5187_p8 = scmp.ne.s32.totalorder %s5185_s13, %s5186_s3  ;;  %p5192_p9 = scmp.lt.s32.totalorder %s5190_s6, %s5186_s3 }
 0x84d   : > { %p5188_p13 = pnand %p5187_p8, %p5660_p12  ;;  %p5193_p10 = por %p5192_p9, %p5191_p2 }
 0x84f   : > { %p5189_p0 = pneg %p5188_p13 }
 0x851   : > { %p5194_p4 = pnand %p5193_p10, %p5189_p0 }
 0x853   : > { %5197 = shalt.err (!%p5194_p4)
}
 0x854   : > { %s5383_s15 = smov 128   ;;  %s5384_s18 = smov 8  }
 0x855   : > { %4569 = dma.vmem_to_hbm [thread:$0]  (%p5660_p12), %s3674_s7, 256, %s3676_s12, %s3654_s30, %s5383_s15, %s5383_s15, %s5384_s18  }
 0x856   : > { %s7343_s1 = sld [smem:[#allocation62_spill]]  ;;  %s3690_s23 = sshll.u32 %s5816_s14, 4  ;;  %s3691_s23 = int_to_ptr.vmem [resolvable:$true] %s3690_s23 }
 0x857   : > { %s3659_s0 = scalar_lea.sflag [#allocation22], %s5742_s17 }
 0x85c   : > { %s3689_s9 = scalar_lea.hbm %s7343_s1, %s4545_s4  ;;  %s5218_s2 = scalar_lea.hbm %s7343_s1, 32 }
 0x85d   : > { %s3692_s28 = sshll.u32 %s3689_s9, 4  ;;  %s3693_s28 = int_to_ptr.hbm [resolvable:$true] %s3692_s28 }
 0x85e   : > { %s5212_s27 = sshra.s32 %s3693_s28, 4  ;;  %s5213_s27 = int_to_ptr.hbm [resolvable:$true] %s5212_s27 }
 0x85f   : > { %s5214_s13 = scalar_lea.hbm %s5213_s27, 16  ;;  %p5219_p12 = scmp.lt.s32.totalorder %s5213_s27, %s7343_s1 }
 0x860   : > { %p5215_p7 = scmp.ne.s32.totalorder %s5213_s27, %s5214_s13  ;;  %p5220_p8 = scmp.lt.s32.totalorder %s5218_s2, %s5214_s13 }
 0x862   : > { %p5216_p11 = pnand %p5215_p7, %p5671_p5  ;;  %p5221_p13 = por %p5220_p8, %p5219_p12 }
 0x864   : > { %p5217_p6 = pneg %p5216_p11 }
 0x866   : > { %p5222_p0 = pnand %p5221_p13, %p5217_p6 }
 0x868   : > { %5225 = shalt.err (!%p5222_p0)
}
 0x869   : > { %4570 = dma.vmem_to_hbm [thread:$0]  (%p5671_p5), %s3691_s23, 256, %s3693_s28, %s3659_s0, %s5383_s15, %s5383_s15, %s5384_s18  }
 0x86a PF: > { %s7344_s17 = sld [smem:[#allocation31_spill]]  ;;  %p4612_p2 = scmp.ge.s32.totalorder %s5368_s16, 2 }
 0x86c   : > { %p4605_p9 = pnand %p4612_p2, %p5664_p3 }
 0x86e   : > { %p4606_p10 = pneg %p4605_p9 }
 0x870   : > { %s3707_s4 = sand.u32 1, %s7344_s17  }
 0x871   : > { %s3708_s30 = scalar_lea.sflag [#allocation5], %s3707_s4 }
 0x872   : > { %5307 = dma.done.wait (%p4606_p10), %s3708_s30, 256  }
 0x873   : > { %5309 = vsyncadd (%p4606_p10), %s3708_s30, 4294967040  ;;  %s7346_s10 = sld [smem:[#allocation34_spill]]  ;;  %p4608_p4 = pnand %p4612_p2, %p5678_p1 }
 0x875   : > { %p4609_p7 = pneg %p4608_p4 }
 0x879   : > { %s3717_s20 = sand.u32 1, %s7346_s10  }
 0x87a   : > { %s3718_s5 = scalar_lea.sflag [#allocation22], %s3717_s20 }
 0x87b   : > { %5311 = dma.done.wait (%p4609_p7), %s3718_s5, 256  }
 0x87c   : > { %5313 = vsyncadd (%p4609_p7), %s3718_s5, 4294967040  ;;  %s50_s16 = sadd.s32 1, %s5368_s16   ;;  %s7349_s15 = sld [smem:[#allocation32_spill]] }
 0x87d   : > { %p7161_p5 = scmp.ge.s32.totalorder %s50_s16, 6   ;;  %s7350_s20 = sld [smem:[#allocation44_spill]] }
 0x87e   : > { %s7351_s11 = sld [smem:[#allocation33_spill]]  ;;  %s7359_s18 = smov %s5320_s19 }
 0x87f   : > { %s7352_s23 = sld [smem:[#allocation42_spill]]  ;;  %s7361_s21 = smov %s5332_s22 }
 0x880   : > { %s7353_s9 = sld [smem:[#allocation35_spill]]  ;;  %s7363_s24 = smov %s5344_s25 }
 0x881   : > { %s7354_s28 = sld [smem:[#allocation43_spill]]  ;;  %s7366_s27 = smov %s5360_s29 }
 0x882   : > { %s7355_s0 = sld [smem:[#allocation38_spill]]  ;;  %s7360_s19 = smov %s7349_s15 }
 0x883   : > { %s7356_s13 = sld [smem:[#allocation40_spill]] }
 0x884   : > { %s7357_s30 = sld [smem:[#allocation41_spill]]  ;;  %s7362_s22 = smov %s7351_s11 }
 0x885   :  { %49 = sbr.rel (!%p7161_p5) target bundleno = 39 (0x27), region = 261 }
 0x886   : > { %s7364_s25 = smov %s7353_s9 }
 0x887   : > { %s7365_s26 = smov %s7354_s28 }
 0x888   : > { %s7367_s28 = smov %s7355_s0 }
 0x889   : > { %s7368_s29 = smov %s7356_s13 }
 0x88a   :  { %3724 = vsyncpa [#allocation4], 1 }
 0x88b   :  { %3726 = vsyncpa [#allocation4 + $0x1], 1 }
 0x88c   :  { %3727 = vsyncpa [#allocation7], 1 }
 0x88d   :  { %3729 = vsyncpa [#allocation7 + $0x1], 1 }
 0x88e   :  { %3730 = vsyncpa [#allocation10], 1 }
 0x88f   :  { %3732 = vsyncpa [#allocation10 + $0x1], 1 }
 0x890   :  { %3733 = vsyncpa [#allocation13], 1 }
 0x891   :  { %3735 = vsyncpa [#allocation13 + $0x1], 1 }
 0x892   :  { %3736 = vsyncpa [#allocation16], 1 }
 0x893   :  { %3738 = vsyncpa [#allocation16 + $0x1], 1 }
 0x894   :  { %3739 = vsyncpa [#allocation19], 1 }
 0x895   :  { %3741 = vsyncpa [#allocation19 + $0x1], 1 }
 0x896   :  { %3742 = vsyncpa [#allocation5], 1 }
 0x897   :  { %3744 = vsyncpa [#allocation5 + $0x1], 1 }
 0x898   :  { %3745 = vsyncpa [#allocation22], 1 }
 0x899   :  { %3747 = vsyncpa [#allocation22 + $0x1], 1 }

</bundles_post_ra>
